<compile_context>
chip_gen: v6e
topology: v6e:2x2x1
jax: 0.10.0
libtpu: 0.0.40
codegen_flags: <defaults>
</compile_context>

<pallas_src>
import jax
import jax.numpy as jnp
from jax.experimental import pallas as pl
from jax.experimental.pallas import tpu as pltpu


LATENT_DIM = 64
LATENT_PAD = 128                     # lane-aligned latent (zero-padded)
HIDDEN = (128, 256, 512, 1024)
OUT_DIM = 784
OUT_PAD = 896                        # 7 * 128, lane-aligned output (zero-padded)
DIMS_PAD = (LATENT_PAD,) + HIDDEN + (OUT_PAD,)
BN_EPS = 1e-5
LRELU_SLOPE = 0.2

# Packed bias/gamma/beta layout: per hidden layer (bias, gamma, beta), then the
# padded output bias.  Every width (and hence every offset) is a multiple of
# 128, so in-kernel slices are lane-aligned.
_VEC_WIDTHS = tuple(w for h in HIDDEN for w in (h, h, h)) + (OUT_PAD,)
_VEC_OFFSETS = []
_off = 0
for _w in _VEC_WIDTHS:
    _VEC_OFFSETS.append(_off)
    _off += _w
VEC_TOTAL = _off                     # 6656 = 52 * 128


def generator_kernel(z_ref, w1, w2, w3, w4, w5, vec_ref, out_ref):
    B = z_ref.shape[0]
    inv_b = 1.0 / B                  # static Python float

    def vec(i):
        # Static, lane-aligned slice of the packed (1, VEC_TOTAL) f32 buffer.
        return vec_ref[:, pl.ds(_VEC_OFFSETS[i], _VEC_WIDTHS[i])]

    def linear(x_bf16, w_ref, bias_f32):
        # bf16 operands on the MXU, f32 accumulation, f32 bias add.
        return jnp.dot(x_bf16, w_ref[...],
                       preferred_element_type=jnp.float32) + bias_f32

    def lrelu_bn(y, gamma, beta):
        # LeakyReLU(0.2) then training-mode BatchNorm1d with single-pass
        # batch statistics, folded into one fused scale/shift (all f32).
        x = jnp.where(y > 0, y, LRELU_SLOPE * y)
        s1 = jnp.sum(x, axis=0, keepdims=True)
        s2 = jnp.sum(x * x, axis=0, keepdims=True)
        mu = s1 * inv_b
        var = jnp.maximum(s2 * inv_b - mu * mu, 0.0)       # guard tiny negatives
        scale = jax.lax.rsqrt(var + BN_EPS) * gamma
        shift = beta - mu * scale
        # Cast once to bf16 here -> the next matmul reads bf16 directly.
        return (x * scale + shift).astype(jnp.bfloat16)

    x = z_ref[...]                                          # already bf16
    for layer, w in enumerate((w1, w2, w3, w4)):
        y = linear(x, w, vec(3 * layer))
        x = lrelu_bn(y, vec(3 * layer + 1), vec(3 * layer + 2))
    out_ref[...] = jnp.tanh(linear(x, w5, vec(12))).astype(out_ref.dtype)


def prepare_params(params):
    """One-time parameter prep (run ONCE, outside the per-call forward):
    pad latent/output layers to lane multiples, cast weights to bf16, and pack
    all bias/gamma/beta vectors into a single contiguous f32 buffer."""
    (w1, b1, g1, be1), (w2, b2, g2, be2), (w3, b3, g3, be3), \
        (w4, b4, g4, be4), (w5, b5) = params

    w1_p = jnp.pad(w1, ((0, LATENT_PAD - LATENT_DIM), (0, 0)))
    w5_p = jnp.pad(w5, ((0, 0), (0, OUT_PAD - OUT_DIM)))
    b5_p = jnp.pad(b5, ((0, 0), (0, OUT_PAD - OUT_DIM)))

    weights = tuple(w.astype(jnp.bfloat16) for w in (w1_p, w2, w3, w4, w5_p))
    packed_vec = jnp.concatenate(
        [b1, g1, be1, b2, g2, be2, b3, g3, be3, b4, g4, be4, b5_p],
        axis=1).astype(jnp.float32)
    assert packed_vec.shape == (1, VEC_TOTAL)
    return weights + (packed_vec,)


def _vmem_limit_bytes(B):
    """B-aware VMEM budget (bounded by v7x's 64 MiB physical VMEM)."""
    weight_bytes = 2 * sum(a * b for a, b in zip(DIMS_PAD[:-1], DIMS_PAD[1:]))
    vec_bytes = 4 * VEC_TOTAL
    act_bytes = B * sum(DIMS_PAD) * (4 + 2)       # f32 activations + bf16 copies
    est = weight_bytes + vec_bytes + act_bytes + (4 << 20)
    limit = max(est + est // 2, 32 << 20)         # 1.5x headroom, >= 32 MiB
    if limit > (64 << 20):
        raise ValueError(
            f"batch={B} exceeds the single-program VMEM budget for v7x "
            "(64 MiB); add batch blocking with partial-sum BN (see TODO).")
    return int(limit)


@jax.jit
def generator_forward(z, prepped):
    """z: [B, LATENT_DIM] float32, prepped = prepare_params(params)
    -> [B, 784] float32."""
    B = z.shape[0]
    assert B >= 2, "training-mode BatchNorm1d requires batch size >= 2"
    w1, w2, w3, w4, w5, packed_vec = prepped

    # Only per-call prep left: pad + cast the tiny latent (B x 128 bf16).
    z_p = jnp.pad(z.astype(jnp.bfloat16),
                  ((0, 0), (0, LATENT_PAD - LATENT_DIM)))

    vmem_spec = pl.BlockSpec(memory_space=pltpu.MemorySpace.VMEM)
    flat_inputs = [z_p, w1, w2, w3, w4, w5, packed_vec]

    # Advisory cost estimate for XLA's scheduler.
    mm_elems = sum(a * b for a, b in zip(DIMS_PAD[:-1], DIMS_PAD[1:]))
    flops = 2 * B * mm_elems
    bytes_accessed = (2 * mm_elems                 # bf16 weights
                      + 4 * VEC_TOTAL              # packed bias/gamma/beta
                      + 2 * B * LATENT_PAD         # bf16 z in
                      + 4 * B * OUT_PAD)           # f32 out
    transcendentals = B * OUT_PAD + sum(HIDDEN)    # tanh + rsqrt

    out_p = pl.pallas_call(
        generator_kernel,
        out_shape=jax.ShapeDtypeStruct((B, OUT_PAD), jnp.float32),
        in_specs=[vmem_spec] * len(flat_inputs),
        out_specs=vmem_spec,
        compiler_params=pltpu.CompilerParams(
            vmem_limit_bytes=_vmem_limit_bytes(B)),
        cost_estimate=pl.CostEstimate(flops=flops,
                                      transcendentals=transcendentals,
                                      bytes_accessed=bytes_accessed),
    )(*flat_inputs)

    return out_p[:, :OUT_DIM]


def init_params(key):
    """Deterministic parameter init (PyTorch-like uniform(-1/sqrt(fan_in), ...))."""
    dims = (LATENT_DIM,) + HIDDEN + (OUT_DIM,)
    params = []
    for i in range(len(dims) - 1):
        fan_in, fan_out = dims[i], dims[i + 1]
        key, kw, kb, kg, kbe = jax.random.split(key, 5)
        bound = 1.0 / jnp.sqrt(fan_in)
        w = jax.random.uniform(kw, (fan_in, fan_out), jnp.float32, -bound, bound)
        b = jax.random.uniform(kb, (1, fan_out), jnp.float32, -bound, bound)
        if i < len(dims) - 2:   # hidden layers carry BatchNorm affine params
            gamma = 1.0 + 0.1 * jax.random.normal(kg, (1, fan_out), jnp.float32)
            beta = 0.1 * jax.random.normal(kbe, (1, fan_out), jnp.float32)
            params.append((w, b, gamma, beta))
        else:
            params.append((w, b))
    return params


def reference_forward(z, params):
    """Plain-JAX reference emulating the kernel math exactly (bf16 matmul
    operands, f32 accumulation, single-pass f32 BN statistics)."""
    B = z.shape[0]
    inv_b = 1.0 / B
    x = z.astype(jnp.bfloat16)
    for (w, b, g, be) in params[:-1]:
        y = jnp.dot(x, w.astype(jnp.bfloat16),
                    preferred_element_type=jnp.float32) + b
        a = jnp.where(y > 0, y, LRELU_SLOPE * y)
        mu = jnp.sum(a, axis=0, keepdims=True) * inv_b
        var = jnp.maximum(jnp.sum(a * a, axis=0, keepdims=True) * inv_b
                          - mu * mu, 0.0)
        scale = jax.lax.rsqrt(var + BN_EPS) * g
        x = (a * scale + (be - mu * scale)).astype(jnp.bfloat16)
    w, b = params[-1]
    y = jnp.dot(x, w.astype(jnp.bfloat16),
                preferred_element_type=jnp.float32) + b
    return jnp.tanh(y)


if __name__ == "__main__":
    key = jax.random.PRNGKey(0)
    key, kz = jax.random.split(key)

    B = 8   # small test batch; any 2 <= B <= ~2000 fits the single-program design
    z = jax.random.normal(kz, (B, LATENT_DIM), jnp.float32)
    params = init_params(key)
    prepped = prepare_params(params)        # one-time pad / bf16 / pack

    out = generator_forward(z, prepped)
    out = jax.block_until_ready(out)

    ref = reference_forward(z, params)
    assert out.shape == (B, OUT_DIM)
    assert bool(jnp.all(jnp.isfinite(out)))
    assert jnp.allclose(out, ref, atol=5e-3, rtol=5e-3), "mismatch vs reference"

    print("KERNEL_OK")
</pallas_src>

<mosaic_0001>
module attributes {stable_mosaic.version = 11 : i64} {
  func.func @generator_kernel(%arg0: memref<8x128xbf16, #tpu.memory_space<vmem>>, %arg1: memref<128x128xbf16, #tpu.memory_space<vmem>>, %arg2: memref<128x256xbf16, #tpu.memory_space<vmem>>, %arg3: memref<256x512xbf16, #tpu.memory_space<vmem>>, %arg4: memref<512x1024xbf16, #tpu.memory_space<vmem>>, %arg5: memref<1024x896xbf16, #tpu.memory_space<vmem>>, %arg6: memref<1x6656xf32, #tpu.memory_space<vmem>>, %arg7: memref<8x896xf32, #tpu.memory_space<vmem>>) attributes {dimension_semantics = [], scalar_prefetch = 0 : i64, scratch_operands = 0 : i64, tpu.core_type = #tpu.core_type<tc>} {
    %c0 = arith.constant 0 : index
    %c0_0 = arith.constant 0 : index
    %0 = vector.load %arg0[%c0, %c0_0] : memref<8x128xbf16, #tpu.memory_space<vmem>>, vector<8x128xbf16>
    %c0_1 = arith.constant 0 : index
    %c0_2 = arith.constant 0 : index
    %1 = vector.load %arg6[%c0_1, %c0_2] : memref<1x6656xf32, #tpu.memory_space<vmem>>, vector<1x128xf32>
    %c0_3 = arith.constant 0 : index
    %c0_4 = arith.constant 0 : index
    %2 = vector.load %arg1[%c0_3, %c0_4] : memref<128x128xbf16, #tpu.memory_space<vmem>>, vector<128x128xbf16>
    %cst = arith.constant dense<0.000000e+00> : vector<8x128xf32>
    %3 = tpu.matmul %0, %2, %cst {dimension_numbers = #tpu.dot_dimension_numbers<[1], [0], [0], [1], [0, 0, 1, 1], [], []>} : vector<8x128xbf16>, vector<128x128xbf16>, vector<8x128xf32> -> vector<8x128xf32>
    %4 = vector.broadcast %1 : vector<1x128xf32> to vector<8x128xf32>
    %5 = arith.addf %3, %4 : vector<8x128xf32>
    %c0_5 = arith.constant 0 : index
    %c128 = arith.constant 128 : index
    %6 = vector.load %arg6[%c0_5, %c128] : memref<1x6656xf32, #tpu.memory_space<vmem>>, vector<1x128xf32>
    %c0_6 = arith.constant 0 : index
    %c256 = arith.constant 256 : index
    %7 = vector.load %arg6[%c0_6, %c256] : memref<1x6656xf32, #tpu.memory_space<vmem>>, vector<1x128xf32>
    %cst_7 = arith.constant 0.000000e+00 : f32
    %8 = vector.broadcast %cst_7 : f32 to vector<8x128xf32>
    %9 = arith.cmpf ogt, %5, %8 : vector<8x128xf32>
    %cst_8 = arith.constant 2.000000e-01 : f32
    %10 = vector.broadcast %cst_8 : f32 to vector<8x128xf32>
    %11 = arith.mulf %10, %5 : vector<8x128xf32>
    %12 = arith.select %9, %5, %11 : vector<8x128xi1>, vector<8x128xf32>
    %cst_9 = arith.constant dense<0.000000e+00> : vector<128xf32>
    %13 = vector.multi_reduction <add>, %12, %cst_9 [0] : vector<8x128xf32> to vector<128xf32>
    %14 = vector.shape_cast %13 : vector<128xf32> to vector<1x128xf32>
    %15 = arith.mulf %12, %12 : vector<8x128xf32>
    %cst_10 = arith.constant dense<0.000000e+00> : vector<128xf32>
    %16 = vector.multi_reduction <add>, %15, %cst_10 [0] : vector<8x128xf32> to vector<128xf32>
    %17 = vector.shape_cast %16 : vector<128xf32> to vector<1x128xf32>
    %cst_11 = arith.constant 1.250000e-01 : f32
    %18 = vector.broadcast %cst_11 : f32 to vector<1x128xf32>
    %19 = arith.mulf %14, %18 : vector<1x128xf32>
    %cst_12 = arith.constant 1.250000e-01 : f32
    %20 = vector.broadcast %cst_12 : f32 to vector<1x128xf32>
    %21 = arith.mulf %17, %20 : vector<1x128xf32>
    %22 = arith.mulf %19, %19 : vector<1x128xf32>
    %23 = arith.subf %21, %22 : vector<1x128xf32>
    %cst_13 = arith.constant 0.000000e+00 : f32
    %24 = vector.broadcast %cst_13 : f32 to vector<1x128xf32>
    %25 = arith.maximumf %23, %24 : vector<1x128xf32>
    %cst_14 = arith.constant 9.99999974E-6 : f32
    %26 = vector.broadcast %cst_14 : f32 to vector<1x128xf32>
    %27 = arith.addf %25, %26 : vector<1x128xf32>
    %28 = math.rsqrt %27 : vector<1x128xf32>
    %29 = arith.mulf %28, %6 : vector<1x128xf32>
    %30 = arith.mulf %19, %29 : vector<1x128xf32>
    %31 = arith.subf %7, %30 : vector<1x128xf32>
    %32 = vector.broadcast %29 : vector<1x128xf32> to vector<8x128xf32>
    %33 = arith.mulf %12, %32 : vector<8x128xf32>
    %34 = vector.broadcast %31 : vector<1x128xf32> to vector<8x128xf32>
    %35 = arith.addf %33, %34 : vector<8x128xf32>
    %36 = arith.truncf %35 : vector<8x128xf32> to vector<8x128xbf16>
    %c0_15 = arith.constant 0 : index
    %c384 = arith.constant 384 : index
    %37 = vector.load %arg6[%c0_15, %c384] : memref<1x6656xf32, #tpu.memory_space<vmem>>, vector<1x256xf32>
    %c0_16 = arith.constant 0 : index
    %c0_17 = arith.constant 0 : index
    %38 = vector.load %arg2[%c0_16, %c0_17] : memref<128x256xbf16, #tpu.memory_space<vmem>>, vector<128x256xbf16>
    %cst_18 = arith.constant dense<0.000000e+00> : vector<8x256xf32>
    %39 = tpu.matmul %36, %38, %cst_18 {dimension_numbers = #tpu.dot_dimension_numbers<[1], [0], [0], [1], [0, 0, 1, 1], [], []>} : vector<8x128xbf16>, vector<128x256xbf16>, vector<8x256xf32> -> vector<8x256xf32>
    %40 = vector.broadcast %37 : vector<1x256xf32> to vector<8x256xf32>
    %41 = arith.addf %39, %40 : vector<8x256xf32>
    %c0_19 = arith.constant 0 : index
    %c640 = arith.constant 640 : index
    %42 = vector.load %arg6[%c0_19, %c640] : memref<1x6656xf32, #tpu.memory_space<vmem>>, vector<1x256xf32>
    %c0_20 = arith.constant 0 : index
    %c896 = arith.constant 896 : index
    %43 = vector.load %arg6[%c0_20, %c896] : memref<1x6656xf32, #tpu.memory_space<vmem>>, vector<1x256xf32>
    %cst_21 = arith.constant 0.000000e+00 : f32
    %44 = vector.broadcast %cst_21 : f32 to vector<8x256xf32>
    %45 = arith.cmpf ogt, %41, %44 : vector<8x256xf32>
    %cst_22 = arith.constant 2.000000e-01 : f32
    %46 = vector.broadcast %cst_22 : f32 to vector<8x256xf32>
    %47 = arith.mulf %46, %41 : vector<8x256xf32>
    %48 = arith.select %45, %41, %47 : vector<8x256xi1>, vector<8x256xf32>
    %cst_23 = arith.constant dense<0.000000e+00> : vector<256xf32>
    %49 = vector.multi_reduction <add>, %48, %cst_23 [0] : vector<8x256xf32> to vector<256xf32>
    %50 = vector.shape_cast %49 : vector<256xf32> to vector<1x256xf32>
    %51 = arith.mulf %48, %48 : vector<8x256xf32>
    %cst_24 = arith.constant dense<0.000000e+00> : vector<256xf32>
    %52 = vector.multi_reduction <add>, %51, %cst_24 [0] : vector<8x256xf32> to vector<256xf32>
    %53 = vector.shape_cast %52 : vector<256xf32> to vector<1x256xf32>
    %cst_25 = arith.constant 1.250000e-01 : f32
    %54 = vector.broadcast %cst_25 : f32 to vector<1x256xf32>
    %55 = arith.mulf %50, %54 : vector<1x256xf32>
    %cst_26 = arith.constant 1.250000e-01 : f32
    %56 = vector.broadcast %cst_26 : f32 to vector<1x256xf32>
    %57 = arith.mulf %53, %56 : vector<1x256xf32>
    %58 = arith.mulf %55, %55 : vector<1x256xf32>
    %59 = arith.subf %57, %58 : vector<1x256xf32>
    %cst_27 = arith.constant 0.000000e+00 : f32
    %60 = vector.broadcast %cst_27 : f32 to vector<1x256xf32>
    %61 = arith.maximumf %59, %60 : vector<1x256xf32>
    %cst_28 = arith.constant 9.99999974E-6 : f32
    %62 = vector.broadcast %cst_28 : f32 to vector<1x256xf32>
    %63 = arith.addf %61, %62 : vector<1x256xf32>
    %64 = math.rsqrt %63 : vector<1x256xf32>
    %65 = arith.mulf %64, %42 : vector<1x256xf32>
    %66 = arith.mulf %55, %65 : vector<1x256xf32>
    %67 = arith.subf %43, %66 : vector<1x256xf32>
    %68 = vector.broadcast %65 : vector<1x256xf32> to vector<8x256xf32>
    %69 = arith.mulf %48, %68 : vector<8x256xf32>
    %70 = vector.broadcast %67 : vector<1x256xf32> to vector<8x256xf32>
    %71 = arith.addf %69, %70 : vector<8x256xf32>
    %72 = arith.truncf %71 : vector<8x256xf32> to vector<8x256xbf16>
    %c0_29 = arith.constant 0 : index
    %c1152 = arith.constant 1152 : index
    %73 = vector.load %arg6[%c0_29, %c1152] : memref<1x6656xf32, #tpu.memory_space<vmem>>, vector<1x512xf32>
    %c0_30 = arith.constant 0 : index
    %c0_31 = arith.constant 0 : index
    %74 = vector.load %arg3[%c0_30, %c0_31] : memref<256x512xbf16, #tpu.memory_space<vmem>>, vector<256x512xbf16>
    %cst_32 = arith.constant dense<0.000000e+00> : vector<8x512xf32>
    %75 = tpu.matmul %72, %74, %cst_32 {dimension_numbers = #tpu.dot_dimension_numbers<[1], [0], [0], [1], [0, 0, 1, 1], [], []>} : vector<8x256xbf16>, vector<256x512xbf16>, vector<8x512xf32> -> vector<8x512xf32>
    %76 = vector.broadcast %73 : vector<1x512xf32> to vector<8x512xf32>
    %77 = arith.addf %75, %76 : vector<8x512xf32>
    %c0_33 = arith.constant 0 : index
    %c1664 = arith.constant 1664 : index
    %78 = vector.load %arg6[%c0_33, %c1664] : memref<1x6656xf32, #tpu.memory_space<vmem>>, vector<1x512xf32>
    %c0_34 = arith.constant 0 : index
    %c2176 = arith.constant 2176 : index
    %79 = vector.load %arg6[%c0_34, %c2176] : memref<1x6656xf32, #tpu.memory_space<vmem>>, vector<1x512xf32>
    %cst_35 = arith.constant 0.000000e+00 : f32
    %80 = vector.broadcast %cst_35 : f32 to vector<8x512xf32>
    %81 = arith.cmpf ogt, %77, %80 : vector<8x512xf32>
    %cst_36 = arith.constant 2.000000e-01 : f32
    %82 = vector.broadcast %cst_36 : f32 to vector<8x512xf32>
    %83 = arith.mulf %82, %77 : vector<8x512xf32>
    %84 = arith.select %81, %77, %83 : vector<8x512xi1>, vector<8x512xf32>
    %cst_37 = arith.constant dense<0.000000e+00> : vector<512xf32>
    %85 = vector.multi_reduction <add>, %84, %cst_37 [0] : vector<8x512xf32> to vector<512xf32>
    %86 = vector.shape_cast %85 : vector<512xf32> to vector<1x512xf32>
    %87 = arith.mulf %84, %84 : vector<8x512xf32>
    %cst_38 = arith.constant dense<0.000000e+00> : vector<512xf32>
    %88 = vector.multi_reduction <add>, %87, %cst_38 [0] : vector<8x512xf32> to vector<512xf32>
    %89 = vector.shape_cast %88 : vector<512xf32> to vector<1x512xf32>
    %cst_39 = arith.constant 1.250000e-01 : f32
    %90 = vector.broadcast %cst_39 : f32 to vector<1x512xf32>
    %91 = arith.mulf %86, %90 : vector<1x512xf32>
    %cst_40 = arith.constant 1.250000e-01 : f32
    %92 = vector.broadcast %cst_40 : f32 to vector<1x512xf32>
    %93 = arith.mulf %89, %92 : vector<1x512xf32>
    %94 = arith.mulf %91, %91 : vector<1x512xf32>
    %95 = arith.subf %93, %94 : vector<1x512xf32>
    %cst_41 = arith.constant 0.000000e+00 : f32
    %96 = vector.broadcast %cst_41 : f32 to vector<1x512xf32>
    %97 = arith.maximumf %95, %96 : vector<1x512xf32>
    %cst_42 = arith.constant 9.99999974E-6 : f32
    %98 = vector.broadcast %cst_42 : f32 to vector<1x512xf32>
    %99 = arith.addf %97, %98 : vector<1x512xf32>
    %100 = math.rsqrt %99 : vector<1x512xf32>
    %101 = arith.mulf %100, %78 : vector<1x512xf32>
    %102 = arith.mulf %91, %101 : vector<1x512xf32>
    %103 = arith.subf %79, %102 : vector<1x512xf32>
    %104 = vector.broadcast %101 : vector<1x512xf32> to vector<8x512xf32>
    %105 = arith.mulf %84, %104 : vector<8x512xf32>
    %106 = vector.broadcast %103 : vector<1x512xf32> to vector<8x512xf32>
    %107 = arith.addf %105, %106 : vector<8x512xf32>
    %108 = arith.truncf %107 : vector<8x512xf32> to vector<8x512xbf16>
    %c0_43 = arith.constant 0 : index
    %c2688 = arith.constant 2688 : index
    %109 = vector.load %arg6[%c0_43, %c2688] : memref<1x6656xf32, #tpu.memory_space<vmem>>, vector<1x1024xf32>
    %c0_44 = arith.constant 0 : index
    %c0_45 = arith.constant 0 : index
    %110 = vector.load %arg4[%c0_44, %c0_45] : memref<512x1024xbf16, #tpu.memory_space<vmem>>, vector<512x1024xbf16>
    %cst_46 = arith.constant dense<0.000000e+00> : vector<8x1024xf32>
    %111 = tpu.matmul %108, %110, %cst_46 {dimension_numbers = #tpu.dot_dimension_numbers<[1], [0], [0], [1], [0, 0, 1, 1], [], []>} : vector<8x512xbf16>, vector<512x1024xbf16>, vector<8x1024xf32> -> vector<8x1024xf32>
    %112 = vector.broadcast %109 : vector<1x1024xf32> to vector<8x1024xf32>
    %113 = arith.addf %111, %112 : vector<8x1024xf32>
    %c0_47 = arith.constant 0 : index
    %c3712 = arith.constant 3712 : index
    %114 = vector.load %arg6[%c0_47, %c3712] : memref<1x6656xf32, #tpu.memory_space<vmem>>, vector<1x1024xf32>
    %c0_48 = arith.constant 0 : index
    %c4736 = arith.constant 4736 : index
    %115 = vector.load %arg6[%c0_48, %c4736] : memref<1x6656xf32, #tpu.memory_space<vmem>>, vector<1x1024xf32>
    %cst_49 = arith.constant 0.000000e+00 : f32
    %116 = vector.broadcast %cst_49 : f32 to vector<8x1024xf32>
    %117 = arith.cmpf ogt, %113, %116 : vector<8x1024xf32>
    %cst_50 = arith.constant 2.000000e-01 : f32
    %118 = vector.broadcast %cst_50 : f32 to vector<8x1024xf32>
    %119 = arith.mulf %118, %113 : vector<8x1024xf32>
    %120 = arith.select %117, %113, %119 : vector<8x1024xi1>, vector<8x1024xf32>
    %cst_51 = arith.constant dense<0.000000e+00> : vector<1024xf32>
    %121 = vector.multi_reduction <add>, %120, %cst_51 [0] : vector<8x1024xf32> to vector<1024xf32>
    %122 = vector.shape_cast %121 : vector<1024xf32> to vector<1x1024xf32>
    %123 = arith.mulf %120, %120 : vector<8x1024xf32>
    %cst_52 = arith.constant dense<0.000000e+00> : vector<1024xf32>
    %124 = vector.multi_reduction <add>, %123, %cst_52 [0] : vector<8x1024xf32> to vector<1024xf32>
    %125 = vector.shape_cast %124 : vector<1024xf32> to vector<1x1024xf32>
    %cst_53 = arith.constant 1.250000e-01 : f32
    %126 = vector.broadcast %cst_53 : f32 to vector<1x1024xf32>
    %127 = arith.mulf %122, %126 : vector<1x1024xf32>
    %cst_54 = arith.constant 1.250000e-01 : f32
    %128 = vector.broadcast %cst_54 : f32 to vector<1x1024xf32>
    %129 = arith.mulf %125, %128 : vector<1x1024xf32>
    %130 = arith.mulf %127, %127 : vector<1x1024xf32>
    %131 = arith.subf %129, %130 : vector<1x1024xf32>
    %cst_55 = arith.constant 0.000000e+00 : f32
    %132 = vector.broadcast %cst_55 : f32 to vector<1x1024xf32>
    %133 = arith.maximumf %131, %132 : vector<1x1024xf32>
    %cst_56 = arith.constant 9.99999974E-6 : f32
    %134 = vector.broadcast %cst_56 : f32 to vector<1x1024xf32>
    %135 = arith.addf %133, %134 : vector<1x1024xf32>
    %136 = math.rsqrt %135 : vector<1x1024xf32>
    %137 = arith.mulf %136, %114 : vector<1x1024xf32>
    %138 = arith.mulf %127, %137 : vector<1x1024xf32>
    %139 = arith.subf %115, %138 : vector<1x1024xf32>
    %140 = vector.broadcast %137 : vector<1x1024xf32> to vector<8x1024xf32>
    %141 = arith.mulf %120, %140 : vector<8x1024xf32>
    %142 = vector.broadcast %139 : vector<1x1024xf32> to vector<8x1024xf32>
    %143 = arith.addf %141, %142 : vector<8x1024xf32>
    %144 = arith.truncf %143 : vector<8x1024xf32> to vector<8x1024xbf16>
    %c0_57 = arith.constant 0 : index
    %c5760 = arith.constant 5760 : index
    %145 = vector.load %arg6[%c0_57, %c5760] : memref<1x6656xf32, #tpu.memory_space<vmem>>, vector<1x896xf32>
    %c0_58 = arith.constant 0 : index
    %c0_59 = arith.constant 0 : index
    %146 = vector.load %arg5[%c0_58, %c0_59] : memref<1024x896xbf16, #tpu.memory_space<vmem>>, vector<1024x896xbf16>
    %cst_60 = arith.constant dense<0.000000e+00> : vector<8x896xf32>
    %147 = tpu.matmul %144, %146, %cst_60 {dimension_numbers = #tpu.dot_dimension_numbers<[1], [0], [0], [1], [0, 0, 1, 1], [], []>} : vector<8x1024xbf16>, vector<1024x896xbf16>, vector<8x896xf32> -> vector<8x896xf32>
    %148 = vector.broadcast %145 : vector<1x896xf32> to vector<8x896xf32>
    %149 = arith.addf %147, %148 : vector<8x896xf32>
    %150 = math.tanh %149 : vector<8x896xf32>
    %c0_61 = arith.constant 0 : index
    %c0_62 = arith.constant 0 : index
    %151 = vector.load %arg7[%c0_61, %c0_62] : memref<8x896xf32, #tpu.memory_space<vmem>>, vector<8x896xf32>
    tpu.vector_store %arg7[%c0_61, %c0_62], %150 {strides = array<i32>} : memref<8x896xf32, #tpu.memory_space<vmem>>, vector<8x896xf32>,
    return
  }
}

</mosaic_0001>

<bundles_post_ra>
// kernel: generator_forward.1
= control target key start
LH: loop header
LB: loop body
LE: loop exit
PB: predicated region body
PF: predicated region fallthrough
CT: control target
= control target key end

     0   :  { %12 = vsyncpa [#allocation3], 0  ;;  %s9424_s0 = inlined_call_operand.vmem [shape: bf16[8,128], index: 0, kind: input, shape index: {}]   ;;  %s9425_s1 = inlined_call_operand.hbm [shape: bf16[128,128], index: 1, kind: input, shape index: {}]   ;;  %s9426_s2 = inlined_call_operand.hbm [shape: bf16[128,256], index: 2, kind: input, shape index: {}]   ;;  %s9427_s3 = inlined_call_operand.hbm [shape: bf16[256,512], index: 3, kind: input, shape index: {}]   ;;  %s9428_s4 = inlined_call_operand.hbm [shape: bf16[512,1024], index: 4, kind: input, shape index: {}]   ;;  %s9429_s5 = inlined_call_operand.hbm [shape: bf16[1024,896], index: 5, kind: input, shape index: {}]   ;;  %s9430_s6 = inlined_call_operand.hbm [shape: f32[1,6656], index: 6, kind: input, shape index: {}]   ;;  %s9431_s7 = inlined_call_operand.hbm [shape: f32[8,896], index: 7, kind: output, shape index: {}]  }
   0x1   :  { %13 = vsyncpa [#allocation6], 0 }
   0x2   :  { %14 = vsyncpa [#allocation9], 0 }
   0x3   :  { %15 = vsyncpa [#allocation12], 0 }
   0x4   :  { %16 = vsyncpa [#allocation4], 0  ;;  %s8942_s24 = smov [#allocation5]  }
   0x5   :  { %s36_s25 = sshll.u32 %s8942_s24, 4  ;;  %s37_s25 = int_to_ptr.vmem [resolvable:$true] %s36_s25 }
   0x6   :  { %s8800_s26 = scalar_lea.vmem %s37_s25, 2048  ;;  %p8805_p1 = scmp.lt.s32.totalorder %s37_s25, %s37_s25 }
   0x7   :  { %p8801_p0 = scmp.ne.s32.totalorder %s37_s25, %s8800_s26  ;;  %p8806_p2 = scmp.lt.s32.totalorder %s8800_s26, %s8800_s26 }
   0x9   :  { %p8807_p3 = por %p8806_p2, %p8805_p1 }
   0xb   :  { %p8808_p4 = pnand %p8807_p3, %p8801_p0 }
   0xd   :  { %8811 = shalt.err (!%p8808_p4)
}
   0xe   :  { %s8943_s27 = smov 128   ;;  %s8944_s28 = smov 8  }
   0xf   :  { %42 = dma.hbm_to_vmem [thread:$0]  %s9426_s2, 2048, %s37_s25, [#allocation6], %s8943_s27, %s8943_s27, %s8944_s28  }
  0x10   :  { %s8945_s8 = smov [#allocation8]  }
  0x11   :  { %s60_s9 = sshll.u32 %s8945_s8, 4  ;;  %s61_s9 = int_to_ptr.vmem [resolvable:$true] %s60_s9 }
  0x12   :  { %s8820_s10 = scalar_lea.vmem %s61_s9, 32768  ;;  %p8825_p6 = scmp.lt.s32.totalorder %s61_s9, %s61_s9 }
  0x13   :  { %p8821_p5 = scmp.ne.s32.totalorder %s61_s9, %s8820_s10  ;;  %p8826_p7 = scmp.lt.s32.totalorder %s8820_s10, %s8820_s10 }
  0x15   :  { %p8827_p8 = por %p8826_p7, %p8825_p6 }
  0x17   :  { %p8828_p9 = pnand %p8827_p8, %p8821_p5 }
  0x19   :  { %8831 = shalt.err (!%p8828_p9)
}
  0x1a   :  { %s8946_s11 = smov 512   ;;  %s8947_s12 = smov 32  }
  0x1b   :  { %66 = dma.hbm_to_vmem [thread:$0]  %s9428_s4, 32768, %s61_s9, [#allocation9], %s8946_s11, %s8946_s11, %s8947_s12  }
  0x1c   :  { %s8948_s15 = smov [#allocation2]  }
  0x1d   :  { %s24_s16 = sshll.u32 %s8948_s15, 4  ;;  %s25_s16 = int_to_ptr.vmem [resolvable:$true] %s24_s16 }
  0x1e   :  { %s8840_s2 = scalar_lea.vmem %s25_s16, 1024  ;;  %p8845_p11 = scmp.lt.s32.totalorder %s25_s16, %s25_s16 }
  0x1f   :  { %p8841_p10 = scmp.ne.s32.totalorder %s25_s16, %s8840_s2  ;;  %p8846_p12 = scmp.lt.s32.totalorder %s8840_s2, %s8840_s2 }
  0x21   :  { %p8847_p13 = por %p8846_p12, %p8845_p11 }
  0x23   :  { %p8848_p0 = pnand %p8847_p13, %p8841_p10 }
  0x25   :  { %8851 = shalt.err (!%p8848_p0)
}
  0x26   :  { %s8949_s17 = smov 64   ;;  %s8950_s18 = smov 4  }
  0x27   :  { %30 = dma.hbm_to_vmem [thread:$0]  %s9425_s1, 1024, %s25_s16, [#allocation3], %s8949_s17, %s8949_s17, %s8950_s18  }
  0x28   :  { %s8951_s21 = smov [#allocation7]  }
  0x29   :  { %s48_s22 = sshll.u32 %s8951_s21, 4  ;;  %s49_s22 = int_to_ptr.vmem [resolvable:$true] %s48_s22 }
  0x2a   :  { %s8860_s4 = scalar_lea.vmem %s49_s22, 8192  ;;  %p8865_p2 = scmp.lt.s32.totalorder %s49_s22, %s49_s22 }
  0x2b   :  { %p8861_p1 = scmp.ne.s32.totalorder %s49_s22, %s8860_s4  ;;  %p8866_p3 = scmp.lt.s32.totalorder %s8860_s4, %s8860_s4 }
  0x2d   :  { %p8867_p4 = por %p8866_p3, %p8865_p2 }
  0x2f   :  { %p8868_p5 = pnand %p8867_p4, %p8861_p1 }
  0x31   :  { %8871 = shalt.err (!%p8868_p5)
}
  0x32   :  { %s8952_s23 = smov 256   ;;  %s8953_s24 = smov 16  }
  0x33   :  { %54 = dma.hbm_to_vmem [thread:$0]  %s9427_s3, 8192, %s49_s22, [#allocation6], %s8952_s23, %s8952_s23, %s8953_s24  }
  0x34   :  { %s8954_s27 = smov [#allocation10]  }
  0x35   :  { %s72_s28 = sshll.u32 %s8954_s27, 4  ;;  %s73_s28 = int_to_ptr.vmem [resolvable:$true] %s72_s28 }
  0x36   :  { %s8880_s1 = scalar_lea.vmem %s73_s28, 57344  ;;  %p8885_p7 = scmp.lt.s32.totalorder %s73_s28, %s73_s28 }
  0x37   :  { %p8881_p6 = scmp.ne.s32.totalorder %s73_s28, %s8880_s1  ;;  %p8886_p8 = scmp.lt.s32.totalorder %s8880_s1, %s8880_s1 }
  0x39   :  { %p8887_p9 = por %p8886_p8, %p8885_p7 }
  0x3b   :  { %p8888_p10 = pnand %p8887_p9, %p8881_p6 }
  0x3d   :  { %8891 = shalt.err (!%p8888_p10)
}
  0x3e   :  { %s8955_s29 = smov 448   ;;  %s8956_s30 = smov 28  }
  0x3f   :  { %78 = dma.hbm_to_vmem [thread:$0]  %s9429_s5, 57344, %s73_s28, [#allocation9], %s8955_s29, %s8955_s29, %s8956_s30  }
  0x40   :  { %s8957_s10 = smov [#allocation11]  }
  0x41   :  { %s85_s11 = sshll.u32 %s8957_s10, 4  ;;  %s86_s11 = int_to_ptr.vmem [resolvable:$true] %s85_s11 }
  0x42   :  { %s8900_s3 = scalar_lea.vmem %s86_s11, 832  ;;  %p8905_p12 = scmp.lt.s32.totalorder %s86_s11, %s86_s11 }
  0x43   :  { %p8901_p11 = scmp.ne.s32.totalorder %s86_s11, %s8900_s3  ;;  %p8906_p13 = scmp.lt.s32.totalorder %s8900_s3, %s8900_s3 }
  0x45   :  { %p8907_p0 = por %p8906_p13, %p8905_p12 }
  0x47   :  { %p8908_p1 = pnand %p8907_p0, %p8901_p11 }
  0x49   :  { %8911 = shalt.err (!%p8908_p1)
}
  0x4a   :  { %88 = dma.hbm_to_vmem [thread:$0]  %s9430_s6, 832, %s86_s11, [#allocation12]  }
  0x4b   :  { %8932 = dma.done.wait [#allocation3], 1024  }
  0x4c   :  { %8933 = vsyncadd [#allocation3], 4294966272 }
  0x4d   :  { %8934 = dma.done.wait [#allocation6], 10240  }
  0x4e   :  { %8935 = vsyncadd [#allocation6], 4294957056 }
  0x4f   :  { %8936 = dma.done.wait [#allocation9], 90112  }
  0x50   :  { %8937 = vsyncadd [#allocation9], 4294877184 }
  0x51   :  { %8938 = dma.done.wait [#allocation12], 832  }
  0x52   :  { %8939 = vsyncadd [#allocation12], 4294966464  ;;  %v8958_v0 = vmov 0.0   ;;  %vm8959_vm0 = vmmov 0   ;;  %v7980_v1 = vld [vmem:[#allocation2 + $0x38] sm:$0xff]   ;;  %v7981_v2 = vld [vmem:[#allocation2 + $0x30] sm:$0xff]   ;;  %v248_v57 = vlaneseq }
  0x53   :  { %7939 = vmatprep.subr.bf16.mxu0 %v8958_v0  ;;  %7955 = vmatprep.mubr.msk.bf16.mxu0 %vm8959_vm0, %v8958_v0  ;;  %v7982_v3 = vld [vmem:[#allocation2 + $0x28] sm:$0xff]   ;;  %v7983_v4 = vld [vmem:[#allocation2 + $0x20] sm:$0xff]   ;;  %v7984_v5 = vld [vmem:[#allocation2 + $0x18] sm:$0xff]   ;;  %v8960_v17 = vmov 0  }
  0x54   :  { %7940 = vmatpush3.bf16.msra.mxu0 %v7980_v1  ;;  %v7985_v6 = vld [vmem:[#allocation2 + $0x10] sm:$0xff]   ;;  %v7986_v7 = vld [vmem:[#allocation2 + $0x8] sm:$0xff]   ;;  %v7987_v8 = vld [vmem:[#allocation2] sm:$0xff]   ;;  %401 = vmatprep.mubr.bf16.mxu1 %v8960_v17  ;;  %v9024_v58 = vshrl.u32 %v248_v57, 7 }
  0x55   :  { %7941 = vmatprep.subr.bf16.mxu0 %v8958_v0  ;;  %v108_v9 = vld [vmem:[%s9424_s0] sm:$0xf]  ;;  %v7988_v10 = vld [vmem:[#allocation5 + $0x74] ss:$8 sps:$4 sm:$0xff]   ;;  %v7990_v11 = vld [vmem:[#allocation5 + $0x70] ss:$8 sps:$4 sm:$0xff]  }
  0x56   :  { %v7991_v12 = vld [vmem:[#allocation5 + $0x64] ss:$8 sps:$4 sm:$0xff]   ;;  %369 = vmatprep.subr.bf16.mxu1 %v7988_v10  ;;  %v7993_v13 = vld [vmem:[#allocation5 + $0x60] ss:$8 sps:$4 sm:$0xff]   ;;  %v7994_v14 = vld [vmem:[#allocation5 + $0x54] ss:$8 sps:$4 sm:$0xff]  }
  0x57   :  { %370 = vmatpush1.bf16.msra.mxu1 %v7990_v11  ;;  %v7996_v15 = vld [vmem:[#allocation5 + $0x50] ss:$8 sps:$4 sm:$0xff]   ;;  %v7997_v16 = vld [vmem:[#allocation5 + $0x44] ss:$8 sps:$4 sm:$0xff]   ;;  %v7999_v18 = vld [vmem:[#allocation5 + $0x40] ss:$8 sps:$4 sm:$0xff]  }
  0x58   :  { %7942 = vmatpush3.bf16.msra.mxu0 %v7981_v2  ;;  %371 = vmatprep.subr.bf16.mxu1 %v7991_v12  ;;  %v8000_v19 = vld [vmem:[#allocation5 + $0x34] ss:$8 sps:$4 sm:$0xff]   ;;  %v8002_v20 = vld [vmem:[#allocation5 + $0x30] ss:$8 sps:$4 sm:$0xff]   ;;  %v8003_v21 = vld [vmem:[#allocation5 + $0x24] ss:$8 sps:$4 sm:$0xff]  }
  0x59   :  { %7943 = vmatprep.subr.bf16.mxu0 %v8958_v0  ;;  %v8005_v22 = vld [vmem:[#allocation5 + $0x20] ss:$8 sps:$4 sm:$0xff]   ;;  %v8006_v23 = vld [vmem:[#allocation5 + $0x14] ss:$8 sps:$4 sm:$0xff]   ;;  %v8008_v24 = vld [vmem:[#allocation5 + $0x10] ss:$8 sps:$4 sm:$0xff]  }
  0x5a   :  { %v8009_v25 = vld [vmem:[#allocation5 + $0x4] ss:$8 sps:$4 sm:$0xff]   ;;  %v8011_v26 = vld [vmem:[#allocation5] ss:$8 sps:$4 sm:$0xff]   ;;  %v9027_v60 = vsub.s32 0, %v9024_v58  ;;  %s8962_s0 = smov [#allocation13]  }
  0x5b   :  { %372 = vmatpush1.bf16.msra.mxu1 %v7993_v13  ;;  %v8012_v27 = vld [vmem:[#allocation7 + $0xe0] ss:$16 sps:$4 sm:$0xff]   ;;  %v8014_v28 = vld [vmem:[#allocation7 + $0xe4] ss:$16 sps:$4 sm:$0xff]   ;;  %v8017_v29 = vld [vmem:[#allocation7 + $0xec] ss:$16 sps:$4 sm:$0xff]  }
  0x5c   :  { %7944 = vmatpush3.bf16.msra.mxu0 %v7982_v3  ;;  %373 = vmatprep.subr.bf16.mxu1 %v7994_v14  ;;  %v7049_v30 = vld [vmem:[#allocation11] ss:$0 sm:$0xff]  ;;  %v220_v59 = vld [vmem:[#allocation11 + $0x1] sm:$0x1]  ;;  %v221_v63 = vld [vmem:[#allocation11 + $0x2] sm:$0x1] }
  0x5d   :  { %7945 = vmatprep.subr.bf16.mxu0 %v8958_v0  ;;  %v8018_v10 = vld [vmem:[#allocation7 + $0xc0] ss:$16 sps:$4 sm:$0xff]   ;;  %v8021_v11 = vld [vmem:[#allocation7 + $0xc8] ss:$16 sps:$4 sm:$0xff]   ;;  %v8026_v12 = vld [vmem:[#allocation7 + $0xa4] ss:$16 sps:$4 sm:$0xff]  }
  0x5e   :  { %v8029_v13 = vld [vmem:[#allocation7 + $0xac] ss:$16 sps:$4 sm:$0xff]   ;;  %v8024_v14 = vld [vmem:[#allocation7 + $0xa0] ss:$16 sps:$4 sm:$0xff]   ;;  %s7037_s14 = sshll.u32 %s8962_s0, 4  ;;  %s7038_s14 = int_to_ptr.vmem [resolvable:$true] %s7037_s14 }
  0x5f   :  { %374 = vmatpush1.bf16.msra.mxu1 %v7996_v15  ;;  %v8027_v15 = vld [vmem:[#allocation7 + $0xa8] ss:$16 sps:$4 sm:$0xff]   ;;  %v8035_v17 = vld [vmem:[#allocation7 + $0x8c] ss:$16 sps:$4 sm:$0xff]   ;;  %s8912_s15 = scalar_lea.vmem %s7038_s14, 896  ;;  %p8917_p3 = scmp.lt.s32.totalorder %s7038_s14, %s7038_s14 }
  0x60   :  { %7946 = vmatpush3.bf16.msra.mxu0 %v7983_v4  ;;  %375 = vmatprep.subr.bf16.mxu1 %v7997_v16  ;;  %v8032_v16 = vld [vmem:[#allocation7 + $0x84] ss:$16 sps:$4 sm:$0xff]   ;;  %v8095_v57 = vld [vmem:[#allocation7 + $0x14c] ss:$16 sps:$4 sm:$0xff]   ;;  %p8913_p2 = scmp.ne.s32.totalorder %s7038_s14, %s8912_s15  ;;  %p8918_p4 = scmp.lt.s32.totalorder %s8912_s15, %s8912_s15 }
  0x61   :  { %7947 = vmatprep.subr.bf16.mxu0 %v8958_v0 }
  0x62   :  { %p8919_p5 = por %p8918_p4, %p8917_p3 }
  0x63   :  { %376 = vmatpush1.bf16.msra.mxu1 %v7999_v18  ;;  %v8030_v18 = vld [vmem:[#allocation7 + $0x80] ss:$16 sps:$4 sm:$0xff]  }
  0x64   :  { %7948 = vmatpush3.bf16.msra.mxu0 %v7984_v5  ;;  %377 = vmatprep.subr.bf16.mxu1 %v8000_v19  ;;  %v8033_v19 = vld [vmem:[#allocation7 + $0x88] ss:$16 sps:$4 sm:$0xff]   ;;  %p8920_p6 = pnand %p8919_p5, %p8913_p2 }
  0x65   :  { %7949 = vmatprep.subr.bf16.mxu0 %v8958_v0 }
  0x67   :  { %378 = vmatpush1.bf16.msra.mxu1 %v8002_v20  ;;  %v8038_v20 = vld [vmem:[#allocation7 + $0x64] ss:$16 sps:$4 sm:$0xff]  }
  0x68   :  { %7950 = vmatpush3.bf16.msra.mxu0 %v7985_v6  ;;  %379 = vmatprep.subr.bf16.mxu1 %v8003_v21  ;;  %v8015_v6 = vld [vmem:[#allocation7 + $0xe8] ss:$16 sps:$4 sm:$0xff]   ;;  %v8041_v21 = vld [vmem:[#allocation7 + $0x6c] ss:$16 sps:$4 sm:$0xff]  }
  0x69   :  { %7951 = vmatprep.subr.bf16.mxu0 %v8958_v0 }
  0x6b   :  { %380 = vmatpush1.bf16.msra.mxu1 %v8005_v22  ;;  %v8036_v22 = vld [vmem:[#allocation7 + $0x60] ss:$16 sps:$4 sm:$0xff]  }
  0x6c   :  { %7952 = vmatpush3.bf16.msra.mxu0 %v7986_v7  ;;  %381 = vmatprep.subr.bf16.mxu1 %v8006_v23  ;;  %v8039_v23 = vld [vmem:[#allocation7 + $0x68] ss:$16 sps:$4 sm:$0xff]  }
  0x6d   :  { %7953 = vmatprep.subr.bf16.mxu0 %v8958_v0 }
  0x6f   :  { %382 = vmatpush1.bf16.msra.mxu1 %v8008_v24  ;;  %v8044_v24 = vld [vmem:[#allocation7 + $0x44] ss:$16 sps:$4 sm:$0xff]  }
  0x70   :  { %7954 = vmatpush3.bf16.msra.mxu0 %v7987_v8  ;;  %383 = vmatprep.subr.bf16.mxu1 %v8009_v25  ;;  %v8020_v8 = vld [vmem:[#allocation7 + $0xc4] ss:$16 sps:$4 sm:$0xff]   ;;  %v8047_v25 = vld [vmem:[#allocation7 + $0x4c] ss:$16 sps:$4 sm:$0xff]  }
  0x71   :  { %923 = vmatprep.subr.bf16.mxu0 %v8014_v28  ;;  %v8050_v28 = vld [vmem:[#allocation7 + $0x24] ss:$16 sps:$4 sm:$0xff]  }
  0x73   :  { %7956 = vmatmul.mubr.bf16.vlgmr.msra.gmra.mxu0 %v108_v9  ;;  %384 = vmatpush1.bf16.msra.mxu1 %v8011_v26  ;;  %v8023_v9 = vld [vmem:[#allocation7 + $0xcc] ss:$16 sps:$4 sm:$0xff]   ;;  %v8042_v26 = vld [vmem:[#allocation7 + $0x40] ss:$16 sps:$4 sm:$0xff]  }
  0x74   :  { %964 = vmatprep.subr.bf16.mxu1 %v8017_v29  ;;  %924 = vmatpush1.bf16.msra.mxu0 %v8012_v27  ;;  %v8045_v27 = vld [vmem:[#allocation7 + $0x48] ss:$16 sps:$4 sm:$0xff]   ;;  %v8053_v29 = vld [vmem:[#allocation7 + $0x2c] ss:$16 sps:$4 sm:$0xff]  }
  0x75   :  { %925 = vmatprep.subr.bf16.mxu0 %v8020_v8 }
  0x78   :  { %926 = vmatpush1.bf16.msra.mxu0 %v8018_v10 }
  0x79   :  { %927 = vmatprep.subr.bf16.mxu0 %v8026_v12 }
  0x7c   :  { %928 = vmatpush1.bf16.msra.mxu0 %v8024_v14 }
  0x7d   :  { %929 = vmatprep.subr.bf16.mxu0 %v8032_v16 }
  0x80   :  { %930 = vmatpush1.bf16.msra.mxu0 %v8030_v18 }
  0x81   :  { %931 = vmatprep.subr.bf16.mxu0 %v8038_v20 }
  0x84   :  { %932 = vmatpush1.bf16.msra.mxu0 %v8036_v22 }
  0x85   :  { %933 = vmatprep.subr.bf16.mxu0 %v8044_v24 }
  0x88   :  { %934 = vmatpush1.bf16.msra.mxu0 %v8042_v26 }
  0x89   :  { %935 = vmatprep.subr.bf16.mxu0 %v8050_v28 }
 0x133   :  { %v214_v31 = vpop.f32.mrf.mxu0 }
 0x134   :  { %v215_v32 = vadd.f32 %v7049_v30, %v214_v31  ;;  %v8048_v30 = vld [vmem:[#allocation7 + $0x20] ss:$16 sps:$4 sm:$0xff]   ;;  %v8051_v31 = vld [vmem:[#allocation7 + $0x28] ss:$16 sps:$4 sm:$0xff]  }
 0x135   :  { %v7957_v33 = vpop.f32.mrf.mxu0  ;;  %936 = vmatpush1.bf16.msra.mxu0 %v8048_v30 }
 0x136   :  { %vm222_vm1 = vcmp.gt.f32.partialorder %v215_v32, 0.0  ;;  %v223_v34 = vmul.f32 0.2, %v215_v32  ;;  %v8059_v33 = vld [vmem:[#allocation7 + $0xc] ss:$16 sps:$4 sm:$0xff]  }
 0x137   :  { %v217_v35 = vpop.f32.mrf.mxu0 }
 0x138   :  { %v224_v36 = vsel %vm222_vm1, %v215_v32, %v223_v34  ;;  %v8056_v32 = vld [vmem:[#allocation7 + $0x4] ss:$16 sps:$4 sm:$0xff]   ;;  %v8054_v34 = vld [vmem:[#allocation7] ss:$16 sps:$4 sm:$0xff]   ;;  %v8057_v35 = vld [vmem:[#allocation7 + $0x8] ss:$16 sps:$4 sm:$0xff]  }
 0x139   :  { %v225_v37 = vrot.slane %v224_v36, 4  ;;  %v231_v38 = vmul.f32 %v224_v36, %v224_v36  ;;  %v7958_v39 = vpop.f32.mrf.mxu0  ;;  %937 = vmatprep.subr.bf16.mxu0 %v8056_v32 }
 0x13a   :  { %938 = vmatpush1.bf16.msra.mxu0 %v8054_v34  ;;  %v8063_v39 = vld [vmem:[#allocation7 + $0x1e8] ss:$16 sps:$4 sm:$0xff]  }
 0x13b   :  { %v226_v40 = vadd.f32 %v225_v37, %v224_v36  ;;  %v232_v41 = vrot.slane %v231_v38, 4  ;;  %v8065_v37 = vld [vmem:[#allocation7 + $0x1ec] ss:$16 sps:$4 sm:$0xff]  }
 0x13d   :  { %v227_v42 = vrot.slane %v226_v40, 2  ;;  %v233_v43 = vadd.f32 %v232_v41, %v231_v38  ;;  %v8060_v38 = vld [vmem:[#allocation7 + $0x1e0] ss:$16 sps:$4 sm:$0xff]   ;;  %v8071_v41 = vld [vmem:[#allocation7 + $0x1cc] ss:$16 sps:$4 sm:$0xff]  }
 0x13f   :  { %v228_v44 = vadd.f32 %v227_v42, %v226_v40  ;;  %v234_v45 = vrot.slane %v233_v43, 2  ;;  %v8068_v40 = vld [vmem:[#allocation7 + $0x1c4] ss:$16 sps:$4 sm:$0xff]   ;;  %v8066_v42 = vld [vmem:[#allocation7 + $0x1c0] ss:$16 sps:$4 sm:$0xff]  }
 0x141   :  { %v229_v46 = vrot.slane %v228_v44, 1  ;;  %v235_v47 = vadd.f32 %v234_v45, %v233_v43  ;;  %v8069_v43 = vld [vmem:[#allocation7 + $0x1c8] ss:$16 sps:$4 sm:$0xff]   ;;  %v8077_v45 = vld [vmem:[#allocation7 + $0x1ac] ss:$16 sps:$4 sm:$0xff]  }
 0x143   :  { %v236_v48 = vrot.slane %v235_v47, 1  ;;  %v230_v49 = vadd.f32 %v229_v46, %v228_v44  ;;  %v8074_v44 = vld [vmem:[#allocation7 + $0x1a4] ss:$16 sps:$4 sm:$0xff]   ;;  %v8072_v46 = vld [vmem:[#allocation7 + $0x1a0] ss:$16 sps:$4 sm:$0xff]  }
 0x145   :  { %v237_v50 = vadd.f32 %v236_v48, %v235_v47  ;;  %v238_v51 = vmul.f32 0.125, %v230_v49  ;;  %v8075_v47 = vld [vmem:[#allocation7 + $0x1a8] ss:$16 sps:$4 sm:$0xff]   ;;  %v8080_v48 = vld [vmem:[#allocation7 + $0x184] ss:$16 sps:$4 sm:$0xff]  }
 0x146   :  { %v8083_v49 = vld [vmem:[#allocation7 + $0x18c] ss:$16 sps:$4 sm:$0xff]  }
 0x147   :  { %v239_v52 = vmul.f32 0.125, %v237_v50  ;;  %v240_v53 = vmul.f32 %v238_v51, %v238_v51  ;;  %v8078_v50 = vld [vmem:[#allocation7 + $0x180] ss:$16 sps:$4 sm:$0xff]  }
 0x149   :  { %v241_v54 = vsub.f32 %v239_v52, %v240_v53  ;;  %v8086_v52 = vld [vmem:[#allocation7 + $0x164] ss:$16 sps:$4 sm:$0xff]   ;;  %v8089_v53 = vld [vmem:[#allocation7 + $0x16c] ss:$16 sps:$4 sm:$0xff]  }
 0x14b   :  { %v242_v55 = vmax.f32 %v241_v54, 0.0  ;;  %v8084_v54 = vld [vmem:[#allocation7 + $0x160] ss:$16 sps:$4 sm:$0xff]  }
 0x14d   :  { %v243_v56 = vadd.f32 1e-05, %v242_v55  ;;  %v8087_v55 = vld [vmem:[#allocation7 + $0x168] ss:$16 sps:$4 sm:$0xff]  }
 0x14f   :  { %8748 = vrsqrt.f32 %v243_v56  ;;  %v8092_v56 = vld [vmem:[#allocation7 + $0x144] ss:$16 sps:$4 sm:$0xff]  }
 0x15c   :  { %v8749_v61 = vpop.eup %8748 }
 0x15d   :  { %v245_v62 = vmul.f32 %v8749_v61, %v220_v59  ;;  %v8090_v59 = vld [vmem:[#allocation7 + $0x140] ss:$16 sps:$4 sm:$0xff]   ;;  %v8093_v61 = vld [vmem:[#allocation7 + $0x148] ss:$16 sps:$4 sm:$0xff]  }
 0x15f   :  { %v246_v0 = vmul.f32 %v245_v62, %v238_v51  ;;  %v251_v1 = vrot.slane %v245_v62, %v9027_v60  ;;  %v8081_v51 = vld [vmem:[#allocation7 + $0x188] ss:$16 sps:$4 sm:$0xff]   ;;  %v8098_v62 = vld [vmem:[#allocation7 + $0x124] ss:$16 sps:$4 sm:$0xff]  }
 0x161   :  { %v247_v2 = vsub.f32 %v221_v63, %v246_v0  ;;  %v252_v3 = vmul.f32 %v251_v1, %v224_v36  ;;  %v8062_v36 = vld [vmem:[#allocation7 + $0x1e4] ss:$16 sps:$4 sm:$0xff]   ;;  %v8101_v63 = vld [vmem:[#allocation7 + $0x12c] ss:$16 sps:$4 sm:$0xff]   ;;  %v8096_v0 = vld [vmem:[#allocation7 + $0x120] ss:$16 sps:$4 sm:$0xff]  }
 0x162   :  { %939 = vmatprep.subr.bf16.mxu0 %v8062_v36  ;;  %v8099_v1 = vld [vmem:[#allocation7 + $0x128] ss:$16 sps:$4 sm:$0xff]  }
 0x163   :  { %v257_v4 = vrot.slane %v247_v2, %v9027_v60  ;;  %940 = vmatpush2.bf16.msra.mxu0 %v8060_v38  ;;  %v8104_v2 = vld [vmem:[#allocation7 + $0x104] ss:$16 sps:$4 sm:$0xff]  }
 0x164   :  { %941 = vmatprep.subr.bf16.mxu0 %v8068_v40 }
 0x165   :  { %v259_v5 = vadd.f32 %v257_v4, %v252_v3  ;;  %v8107_v3 = vld [vmem:[#allocation7 + $0x10c] ss:$16 sps:$4 sm:$0xff]   ;;  %v8102_v4 = vld [vmem:[#allocation7 + $0x100] ss:$16 sps:$4 sm:$0xff]  }
 0x167   :  { %v260_v7 = vpack.c.bf16 %v259_v5, %v259_v5  ;;  %942 = vmatpush2.bf16.msra.mxu0 %v8066_v42  ;;  %v8105_v5 = vld [vmem:[#allocation7 + $0x108] ss:$16 sps:$4 sm:$0xff]  }
 0x168   :  { %943 = vmatprep.subr.bf16.mxu0 %v8074_v44 }
 0x169   :  { %402 = vmatmul.mubr.bf16.vlgmr.msra.gmra.mxu1 %v260_v7  ;;  %v9032_v7 = vsub.s32 1, %v9024_v58 }
 0x16a   :  { %965 = vmatpush1.bf16.msra.mxu1 %v8015_v6  ;;  %v261_v6 = vld [vmem:[#allocation11 + $0x3] sm:$0x3] }
 0x16b   :  { %966 = vmatprep.subr.bf16.mxu1 %v8023_v9  ;;  %944 = vmatpush2.bf16.msra.mxu0 %v8072_v46  ;;  %v282_v8 = vrot.slane %v261_v6, %v9027_v60  ;;  %v286_v9 = vrot.slane %v261_v6, %v9032_v7 }
 0x16c   :  { %945 = vmatprep.subr.bf16.mxu0 %v8080_v48 }
 0x16e   :  { %967 = vmatpush1.bf16.msra.mxu1 %v8021_v11 }
 0x16f   :  { %968 = vmatprep.subr.bf16.mxu1 %v8029_v13  ;;  %946 = vmatpush2.bf16.msra.mxu0 %v8078_v50 }
 0x170   :  { %947 = vmatprep.subr.bf16.mxu0 %v8086_v52 }
 0x172   :  { %969 = vmatpush1.bf16.msra.mxu1 %v8027_v15 }
 0x173   :  { %970 = vmatprep.subr.bf16.mxu1 %v8035_v17  ;;  %948 = vmatpush2.bf16.msra.mxu0 %v8084_v54 }
 0x174   :  { %949 = vmatprep.subr.bf16.mxu0 %v8092_v56 }
 0x176   :  { %971 = vmatpush1.bf16.msra.mxu1 %v8033_v19 }
 0x177   :  { %972 = vmatprep.subr.bf16.mxu1 %v8041_v21  ;;  %950 = vmatpush2.bf16.msra.mxu0 %v8090_v59  ;;  %v410_v59 = vld [vmem:[#allocation11 + $0x5] sm:$0x3] }
 0x178   :  { %951 = vmatprep.subr.bf16.mxu0 %v8098_v62  ;;  %v8961_v62 = vmov 1966171168  }
 0x17a   :  { %973 = vmatpush1.bf16.msra.mxu1 %v8039_v23 }
 0x17b   :  { %974 = vmatprep.subr.bf16.mxu1 %v8047_v25  ;;  %952 = vmatpush2.bf16.msra.mxu0 %v8096_v0  ;;  %v466_v0 = vrot.slane %v410_v59, %v9032_v7 }
 0x17c   :  { %953 = vmatprep.subr.bf16.mxu0 %v8104_v2 }
 0x17e   :  { %975 = vmatpush1.bf16.msra.mxu1 %v8045_v27 }
 0x17f   :  { %976 = vmatprep.subr.bf16.mxu1 %v8053_v29  ;;  %954 = vmatpush2.bf16.msra.mxu0 %v8102_v4 }
 0x182   :  { %977 = vmatpush1.bf16.msra.mxu1 %v8051_v31 }
 0x183   :  { %978 = vmatprep.subr.bf16.mxu1 %v8059_v33 }
 0x186   :  { %979 = vmatpush1.bf16.msra.mxu1 %v8057_v35 }
 0x187   :  { %980 = vmatprep.subr.bf16.mxu1 %v8065_v37 }
 0x18a   :  { %981 = vmatpush2.bf16.msra.mxu1 %v8063_v39 }
 0x18b   :  { %982 = vmatprep.subr.bf16.mxu1 %v8071_v41 }
 0x18e   :  { %983 = vmatpush2.bf16.msra.mxu1 %v8069_v43 }
 0x18f   :  { %984 = vmatprep.subr.bf16.mxu1 %v8077_v45 }
 0x192   :  { %985 = vmatpush2.bf16.msra.mxu1 %v8075_v47 }
 0x193   :  { %986 = vmatprep.subr.bf16.mxu1 %v8083_v49 }
 0x196   :  { %987 = vmatpush2.bf16.msra.mxu1 %v8081_v51 }
 0x197   :  { %988 = vmatprep.subr.bf16.mxu1 %v8089_v53 }
 0x19a   :  { %989 = vmatpush2.bf16.msra.mxu1 %v8087_v55 }
 0x19b   :  { %990 = vmatprep.subr.bf16.mxu1 %v8095_v57 }
 0x19e   :  { %991 = vmatpush2.bf16.msra.mxu1 %v8093_v61  ;;  %v462_v61 = vrot.slane %v410_v59, %v9027_v60  ;;  %v1236_v59 = vld [vmem:[#allocation8 + $0xe0] sm:$0xff] }
 0x19f   :  { %992 = vmatprep.subr.bf16.mxu1 %v8101_v63  ;;  %v477_v63 = vunpack.c.l.s4 %v8961_v62 }
 0x1a2   :  { %993 = vmatpush2.bf16.msra.mxu1 %v8099_v1 }
 0x1a3   :  { %994 = vmatprep.subr.bf16.mxu1 %v8107_v3  ;;  %v478_v3 = vunpack.c.0.s8 %v477_v63  ;;  %v1364_v63 = vld [vmem:[#allocation8 + $0x4e0] sm:$0xff] }
 0x1a6   :  { %995 = vmatpush2.bf16.msra.mxu1 %v8105_v5 }
 0x229   :  { %v403_v10 = vpop.f32.mrf.mxu1 }
 0x22a   :  { %v404_v11 = vadd.f32 %v403_v10, %v282_v8 }
 0x22b   :  { %v405_v12 = vpop.f32.mrf.mxu1 }
 0x22c   :  { %vm412_vm2 = vcmp.gt.f32.partialorder %v404_v11, 0.0  ;;  %v414_v13 = vmul.f32 0.2, %v404_v11  ;;  %v406_v14 = vadd.f32 %v405_v12, %v286_v9  ;;  %v9045_v9 = vsub.s32 %v478_v3, %v9024_v58  ;;  %v411_v12 = vld [vmem:[#allocation11 + $0x7] sm:$0x3] }
 0x22d   :  { %v407_v15 = vpop.f32.mrf.mxu1  ;;  %v1224_v3 = vld [vmem:[#allocation8 + $0x80] sm:$0xff] }
 0x22e   :  { %v9036_v16 = vsel %vm412_vm2, %v404_v11, %v414_v13  ;;  %vm413_vm3 = vcmp.gt.f32.partialorder %v406_v14, 0.0  ;;  %v415_v17 = vmul.f32 0.2, %v406_v14 }
 0x22f   :  { %v418_v18 = vrot.slane %v9036_v16, 4  ;;  %v430_v19 = vmul.f32 %v9036_v16, %v9036_v16  ;;  %v408_v20 = vpop.f32.mrf.mxu1 }
 0x230   :  { %v417_v21 = vsel %vm413_vm3, %v406_v14, %v415_v17 }
 0x231   :  { %v419_v22 = vadd.f32 %v418_v18, %v9036_v16  ;;  %v432_v23 = vrot.slane %v430_v19, 4  ;;  %v424_v24 = vrot.slane %v417_v21, 4  ;;  %v431_v25 = vmul.f32 %v417_v21, %v417_v21 }
 0x233   :  { %v420_v26 = vrot.slane %v419_v22, 2  ;;  %v433_v27 = vadd.f32 %v432_v23, %v430_v19  ;;  %v425_v28 = vadd.f32 %v424_v24, %v417_v21  ;;  %v438_v29 = vrot.slane %v431_v25, 4 }
 0x235   :  { %v421_v30 = vadd.f32 %v420_v26, %v419_v22  ;;  %v434_v31 = vrot.slane %v433_v27, 2  ;;  %v426_v32 = vrot.slane %v425_v28, 2  ;;  %v439_v33 = vadd.f32 %v438_v29, %v431_v25  ;;  %v1392_v29 = vld [vmem:[#allocation8 + $0x5c0] sm:$0xff] }
 0x237   :  { %v422_v34 = vrot.slane %v421_v30, 1  ;;  %v435_v35 = vadd.f32 %v434_v31, %v433_v27  ;;  %v427_v36 = vadd.f32 %v426_v32, %v425_v28  ;;  %v440_v37 = vrot.slane %v439_v33, 2  ;;  %v1264_v27 = vld [vmem:[#allocation8 + $0x1c0] sm:$0xff] }
 0x238   :  { %v1268_v28 = vld [vmem:[#allocation8 + $0x1e0] sm:$0xff] }
 0x239   :  { %v423_v38 = vadd.f32 %v422_v34, %v421_v30  ;;  %v436_v39 = vrot.slane %v435_v35, 1  ;;  %v428_v40 = vrot.slane %v427_v36, 1  ;;  %v441_v41 = vadd.f32 %v440_v37, %v439_v33  ;;  %v1396_v31 = vld [vmem:[#allocation8 + $0x5e0] sm:$0xff] }
 0x23a   :  { %v7195_v30 = vcombine.high %v1264_v27, %v1268_v28  ;;  %v7194_v32 = vcombine.low %v1264_v27, %v1268_v28  ;;  %v1256_v33 = vld [vmem:[#allocation8 + $0x180] sm:$0xff] }
 0x23b   :  { %v437_v42 = vadd.f32 %v436_v39, %v435_v35  ;;  %v444_v43 = vmul.f32 0.125, %v423_v38  ;;  %v429_v44 = vadd.f32 %v428_v40, %v427_v36  ;;  %v442_v45 = vrot.slane %v441_v41, 1  ;;  %v1260_v34 = vld [vmem:[#allocation8 + $0x1a0] sm:$0xff] }
 0x23c   :  { %2785 = vmatprep.subr.bf16.mxu0 %v7195_v30  ;;  %v1384_v35 = vld [vmem:[#allocation8 + $0x580] sm:$0xff]  ;;  %v7187_v36 = vcombine.high %v1256_v33, %v1260_v34  ;;  %v7186_v38 = vcombine.low %v1256_v33, %v1260_v34 }
 0x23d   :  { %v446_v46 = vmul.f32 0.125, %v437_v42  ;;  %v448_v47 = vmul.f32 %v444_v43, %v444_v43  ;;  %v443_v48 = vadd.f32 %v442_v45, %v441_v41  ;;  %v445_v49 = vmul.f32 0.125, %v429_v44  ;;  %v1388_v37 = vld [vmem:[#allocation8 + $0x5a0] sm:$0xff] }
 0x23e   :  { %v7314_v39 = vcombine.low %v1384_v35, %v1388_v37  ;;  %v7315_v40 = vcombine.high %v1384_v35, %v1388_v37  ;;  %v1248_v41 = vld [vmem:[#allocation8 + $0x140] sm:$0xff] }
 0x23f   :  { %v450_v50 = vsub.f32 %v446_v46, %v448_v47  ;;  %v447_v51 = vmul.f32 0.125, %v443_v48  ;;  %v449_v52 = vmul.f32 %v445_v49, %v445_v49  ;;  %v1252_v42 = vld [vmem:[#allocation8 + $0x160] sm:$0xff] }
 0x240   :  { %v7179_v44 = vcombine.high %v1248_v41, %v1252_v42  ;;  %v1380_v45 = vld [vmem:[#allocation8 + $0x560] sm:$0xff]  ;;  %v7178_v46 = vcombine.low %v1248_v41, %v1252_v42 }
 0x241   :  { %v452_v53 = vmax.f32 %v450_v50, 0.0  ;;  %v451_v54 = vsub.f32 %v447_v51, %v449_v52  ;;  %v1244_v50 = vld [vmem:[#allocation8 + $0x120] sm:$0xff] }
 0x242   :  { %v1368_v51 = vld [vmem:[#allocation8 + $0x500] sm:$0xff] }
 0x243   :  { %v454_v55 = vadd.f32 1e-05, %v452_v53  ;;  %v453_v56 = vmax.f32 %v451_v54, 0.0  ;;  %v1372_v53 = vld [vmem:[#allocation8 + $0x520] sm:$0xff] }
 0x244   :  { %v1340_v27 = vld [vmem:[#allocation8 + $0x420] sm:$0xff] }
 0x245   :  { %8750 = vrsqrt.f32 %v454_v55  ;;  %v455_v57 = vadd.f32 1e-05, %v453_v56  ;;  %v7298_v55 = vcombine.low %v1368_v51, %v1372_v53  ;;  %v7299_v56 = vcombine.high %v1368_v51, %v1372_v53  ;;  %v1460_v33 = vld [vmem:[#allocation8 + $0x7e0] sm:$0xff] }
 0x246   :  { %v1320_v37 = vld [vmem:[#allocation8 + $0x380] sm:$0xff] }
 0x247   :  { %8752 = vrsqrt.f32 %v455_v57  ;;  %v1232_v57 = vld [vmem:[#allocation8 + $0xc0] sm:$0xff] }
 0x248   :  { %v7163_v62 = vcombine.high %v1232_v57, %v1236_v59  ;;  %v1452_v41 = vld [vmem:[#allocation8 + $0x7a0] sm:$0xff] }
 0x249   :  { %v1304_v53 = vld [vmem:[#allocation8 + $0x300] sm:$0xff] }
 0x252   :  { %v8751_v1 = vpop.eup %8750 }
 0x253   :  { %v469_v2 = vmul.f32 %v8751_v1, %v462_v61  ;;  %v1360_v61 = vld [vmem:[#allocation8 + $0x4c0] sm:$0xff] }
 0x254   :  { %v8753_v4 = vpop.eup %8752  ;;  %v7290_v1 = vcombine.low %v1360_v61, %v1364_v63 }
 0x255   :  { %v470_v5 = vmul.f32 %v8753_v4, %v466_v0  ;;  %v471_v6 = vmul.f32 %v469_v2, %v444_v43  ;;  %v495_v13 = vrot.slane %v469_v2, %v9027_v60  ;;  %v1376_v43 = vld [vmem:[#allocation8 + $0x540] sm:$0xff]  ;;  %v7162_v0 = vcombine.low %v1232_v57, %v1236_v59 }
 0x256   :  { %v7306_v47 = vcombine.low %v1376_v43, %v1380_v45  ;;  %v7307_v48 = vcombine.high %v1376_v43, %v1380_v45  ;;  %v7291_v2 = vcombine.high %v1360_v61, %v1364_v63  ;;  %v1228_v4 = vld [vmem:[#allocation8 + $0xa0] sm:$0xff] }
 0x257   :  { %v472_v8 = vmul.f32 %v470_v5, %v445_v49  ;;  %v499_v15 = vrot.slane %v470_v5, %v9027_v60  ;;  %v500_v18 = vmul.f32 %v495_v13, %v9036_v16  ;;  %v7322_v16 = vcombine.low %v1392_v29, %v1396_v31  ;;  %v1240_v49 = vld [vmem:[#allocation8 + $0x100] sm:$0xff] }
 0x258   :  { %v7171_v52 = vcombine.high %v1240_v49, %v1244_v50  ;;  %v7170_v54 = vcombine.low %v1240_v49, %v1244_v50  ;;  %v1352_v5 = vld [vmem:[#allocation8 + $0x480] sm:$0xff] }
 0x259   :  { %v475_v10 = vcombine.low %v471_v6, %v472_v8  ;;  %v501_v19 = vmul.f32 %v499_v15, %v417_v21  ;;  %v7323_v21 = vcombine.high %v1392_v29, %v1396_v31  ;;  %v7155_v6 = vcombine.high %v1224_v3, %v1228_v4  ;;  %v1356_v8 = vld [vmem:[#allocation8 + $0x4a0] sm:$0xff] }
 0x25a   :  { %v1216_v13 = vld [vmem:[#allocation8 + $0x40] sm:$0xff] }
 0x25b   :  { %v482_v11 = vrot.slane %v475_v10, %v9045_v9  ;;  %2826 = vmatprep.subr.bf16.mxu1 %v7323_v21  ;;  %v7154_v10 = vcombine.low %v1224_v3, %v1228_v4  ;;  %v1344_v15 = vld [vmem:[#allocation8 + $0x440] sm:$0xff] }
 0x25c   :  { %v1328_v31 = vld [vmem:[#allocation8 + $0x3c0] sm:$0xff] }
 0x25d   :  { %v489_v14 = vrot.slane %v482_v11, %v9045_v9  ;;  %v7282_v11 = vcombine.low %v1352_v5, %v1356_v8  ;;  %v1312_v45 = vld [vmem:[#allocation8 + $0x340] sm:$0xff] }
 0x25e   :  { %v1444_v49 = vld [vmem:[#allocation8 + $0x760] sm:$0xff] }
 0x25f   :  { %v491_v17 = vsub.f32 %v411_v12, %v489_v14  ;;  %v7283_v12 = vcombine.high %v1352_v5, %v1356_v8  ;;  %v1220_v14 = vld [vmem:[#allocation8 + $0x60] sm:$0xff] }
 0x260   :  { %v1436_v57 = vld [vmem:[#allocation8 + $0x720] sm:$0xff] }
 0x261   :  { %v510_v20 = vrot.slane %v491_v17, %v9032_v7  ;;  %v506_v22 = vrot.slane %v491_v17, %v9027_v60  ;;  %v7147_v17 = vcombine.high %v1216_v13, %v1220_v14  ;;  %v1296_v63 = vld [vmem:[#allocation8 + $0x2c0] sm:$0xff] }
 0x262   :  { %v1428_v3 = vld [vmem:[#allocation8 + $0x6e0] sm:$0xff] }
 0x263   :  { %v514_v23 = vadd.f32 %v510_v20, %v501_v19  ;;  %v513_v24 = vadd.f32 %v506_v22, %v500_v18  ;;  %v1348_v18 = vld [vmem:[#allocation8 + $0x460] sm:$0xff]  ;;  %v7146_v19 = vcombine.low %v1216_v13, %v1220_v14 }
 0x264   :  { %v7274_v20 = vcombine.low %v1344_v15, %v1348_v18  ;;  %v7275_v22 = vcombine.high %v1344_v15, %v1348_v18  ;;  %v1288_v8 = vld [vmem:[#allocation8 + $0x280] sm:$0xff] }
 0x265   :  { %v516_v25 = vpack.c.bf16 %v514_v23, %v514_v23  ;;  %v515_v26 = vpack.c.bf16 %v513_v24, %v513_v24  ;;  %v1208_v23 = vld [vmem:[#allocation8] sm:$0xff] }
 0x266   :  { %v1212_v24 = vld [vmem:[#allocation8 + $0x20] sm:$0xff] }
 0x267   :  { %955 = vmatprep.mubr.bf16.mxu0 %v516_v25  ;;  %996 = vmatprep.mubr.bf16.mxu1 %v516_v25  ;;  %v1336_v25 = vld [vmem:[#allocation8 + $0x400] sm:$0xff]  ;;  %v7138_v28 = vcombine.low %v1208_v23, %v1212_v24 }
 0x268   :  { %956 = vmatmul.mubr.bf16.vlgmr.msra.gmra.mxu0 %v515_v26  ;;  %997 = vmatmul.mubr.bf16.vlgmr.msra.gmra.mxu1 %v515_v26  ;;  %v7139_v26 = vcombine.high %v1208_v23, %v1212_v24  ;;  %v7266_v29 = vcombine.low %v1336_v25, %v1340_v27  ;;  %v7267_v30 = vcombine.high %v1336_v25, %v1340_v27  ;;  %v1420_v13 = vld [vmem:[#allocation8 + $0x6a0] sm:$0xff] }
 0x269   :  { %2786 = vmatpush1.bf16.msra.mxu0 %v7194_v32  ;;  %2827 = vmatpush1.bf16.msra.mxu1 %v7322_v16  ;;  %v1332_v32 = vld [vmem:[#allocation8 + $0x3e0] sm:$0xff] }
 0x26a   :  { %2787 = vmatprep.subr.bf16.mxu0 %v7187_v36  ;;  %2828 = vmatprep.subr.bf16.mxu1 %v7315_v40  ;;  %v1456_v16 = vld [vmem:[#allocation8 + $0x7c0] sm:$0xff]  ;;  %v7259_v21 = vcombine.high %v1328_v31, %v1332_v32  ;;  %v7258_v34 = vcombine.low %v1328_v31, %v1332_v32 }
 0x26b   :  { %v7386_v35 = vcombine.low %v1456_v16, %v1460_v33  ;;  %v7387_v36 = vcombine.high %v1456_v16, %v1460_v33  ;;  %v1280_v18 = vld [vmem:[#allocation8 + $0x240] sm:$0xff]  ;;  %v9054_v33 = vld [vmem:[#allocation8 + $0x1c8] sm:$0xff] }
 0x26c   :  { %v1412_v24 = vld [vmem:[#allocation8 + $0x660] sm:$0xff] }
 0x26d   :  { %2788 = vmatpush1.bf16.msra.mxu0 %v7186_v38  ;;  %2829 = vmatpush1.bf16.msra.mxu1 %v7314_v39  ;;  %v1324_v38 = vld [vmem:[#allocation8 + $0x3a0] sm:$0xff] }
 0x26e   :  { %2789 = vmatprep.subr.bf16.mxu0 %v7179_v44  ;;  %2830 = vmatprep.subr.bf16.mxu1 %v7307_v48  ;;  %v1448_v39 = vld [vmem:[#allocation8 + $0x780] sm:$0xff]  ;;  %v7251_v40 = vcombine.high %v1320_v37, %v1324_v38  ;;  %v7250_v42 = vcombine.low %v1320_v37, %v1324_v38  ;;  %v9062_v37 = vld [vmem:[#allocation8 + $0x5e8] sm:$0xff] }
 0x26f   :  { %v7378_v43 = vcombine.low %v1448_v39, %v1452_v41  ;;  %v7379_v44 = vcombine.high %v1448_v39, %v1452_v41  ;;  %v1272_v25 = vld [vmem:[#allocation8 + $0x200] sm:$0xff]  ;;  %v9071_v41 = vsub.s32 2, %v9024_v58 }
 0x270   :  { %v1404_v31 = vld [vmem:[#allocation8 + $0x620] sm:$0xff] }
 0x271   :  { %2790 = vmatpush1.bf16.msra.mxu0 %v7178_v46  ;;  %2831 = vmatpush1.bf16.msra.mxu1 %v7306_v47  ;;  %v1316_v46 = vld [vmem:[#allocation8 + $0x360] sm:$0xff] }
 0x272   :  { %2791 = vmatprep.subr.bf16.mxu0 %v7171_v52  ;;  %2832 = vmatprep.subr.bf16.mxu1 %v7299_v56  ;;  %v1440_v47 = vld [vmem:[#allocation8 + $0x740] sm:$0xff]  ;;  %v7243_v48 = vcombine.high %v1312_v45, %v1316_v46  ;;  %v7242_v50 = vcombine.low %v1312_v45, %v1316_v46 }
 0x273   :  { %v7370_v51 = vcombine.low %v1440_v47, %v1444_v49  ;;  %v7371_v52 = vcombine.high %v1440_v47, %v1444_v49 }
 0x275   :  { %2792 = vmatpush1.bf16.msra.mxu0 %v7170_v54  ;;  %2833 = vmatpush1.bf16.msra.mxu1 %v7298_v55  ;;  %v1308_v54 = vld [vmem:[#allocation8 + $0x320] sm:$0xff] }
 0x276   :  { %2793 = vmatprep.subr.bf16.mxu0 %v7163_v62  ;;  %2834 = vmatprep.subr.bf16.mxu1 %v7291_v2  ;;  %v1432_v55 = vld [vmem:[#allocation8 + $0x700] sm:$0xff]  ;;  %v7235_v56 = vcombine.high %v1304_v53, %v1308_v54  ;;  %v7234_v59 = vcombine.low %v1304_v53, %v1308_v54 }
 0x277   :  { %v7362_v61 = vcombine.low %v1432_v55, %v1436_v57  ;;  %v7363_v62 = vcombine.high %v1432_v55, %v1436_v57 }
 0x279   :  { %2794 = vmatpush1.bf16.msra.mxu0 %v7162_v0  ;;  %2835 = vmatpush1.bf16.msra.mxu1 %v7290_v1  ;;  %v1300_v0 = vld [vmem:[#allocation8 + $0x2e0] sm:$0xff] }
 0x27a   :  { %2795 = vmatprep.subr.bf16.mxu0 %v7155_v6  ;;  %2836 = vmatprep.subr.bf16.mxu1 %v7283_v12  ;;  %v1424_v1 = vld [vmem:[#allocation8 + $0x6c0] sm:$0xff]  ;;  %v7227_v2 = vcombine.high %v1296_v63, %v1300_v0  ;;  %v7226_v4 = vcombine.low %v1296_v63, %v1300_v0 }
 0x27b   :  { %v7354_v5 = vcombine.low %v1424_v1, %v1428_v3  ;;  %v7355_v6 = vcombine.high %v1424_v1, %v1428_v3 }
 0x27d   :  { %2796 = vmatpush1.bf16.msra.mxu0 %v7154_v10  ;;  %2837 = vmatpush1.bf16.msra.mxu1 %v7282_v11  ;;  %v1292_v10 = vld [vmem:[#allocation8 + $0x2a0] sm:$0xff] }
 0x27e   :  { %2797 = vmatprep.subr.bf16.mxu0 %v7147_v17  ;;  %2838 = vmatprep.subr.bf16.mxu1 %v7275_v22  ;;  %v1416_v11 = vld [vmem:[#allocation8 + $0x680] sm:$0xff]  ;;  %v7219_v12 = vcombine.high %v1288_v8, %v1292_v10  ;;  %v7218_v14 = vcombine.low %v1288_v8, %v1292_v10 }
 0x27f   :  { %v7346_v15 = vcombine.low %v1416_v11, %v1420_v13  ;;  %v7347_v17 = vcombine.high %v1416_v11, %v1420_v13 }
 0x281   :  { %2798 = vmatpush1.bf16.msra.mxu0 %v7146_v19  ;;  %2839 = vmatpush1.bf16.msra.mxu1 %v7274_v20  ;;  %v1284_v19 = vld [vmem:[#allocation8 + $0x260] sm:$0xff] }
 0x282   :  { %2799 = vmatprep.subr.bf16.mxu0 %v7139_v26  ;;  %2840 = vmatprep.subr.bf16.mxu1 %v7267_v30  ;;  %v1408_v20 = vld [vmem:[#allocation8 + $0x640] sm:$0xff]  ;;  %v7210_v22 = vcombine.low %v1280_v18, %v1284_v19  ;;  %v7211_v23 = vcombine.high %v1280_v18, %v1284_v19 }
 0x283   :  { %v1276_v26 = vld [vmem:[#allocation8 + $0x220] sm:$0xff]  ;;  %v7338_v27 = vcombine.low %v1408_v20, %v1412_v24 }
 0x284   :  { %v1400_v30 = vld [vmem:[#allocation8 + $0x600] sm:$0xff]  ;;  %v7202_v16 = vcombine.low %v1272_v25, %v1276_v26 }
 0x285   :  { %2800 = vmatpush1.bf16.msra.mxu0 %v7138_v28  ;;  %2841 = vmatpush1.bf16.msra.mxu1 %v7266_v29  ;;  %v7339_v28 = vcombine.high %v1408_v20, %v1412_v24  ;;  %v7203_v29 = vcombine.high %v1272_v25, %v1276_v26  ;;  %v7331_v32 = vcombine.high %v1400_v30, %v1404_v31 }
 0x286   :  { %2801 = vmatprep.subr.bf16.mxu0 %v7259_v21  ;;  %2842 = vmatprep.subr.bf16.mxu1 %v7387_v36  ;;  %v7330_v21 = vcombine.low %v1400_v30, %v1404_v31 }
 0x289   :  { %2802 = vmatpush2.bf16.msra.mxu0 %v7258_v34  ;;  %2843 = vmatpush2.bf16.msra.mxu1 %v7386_v35  ;;  %v9056_v34 = vld [vmem:[#allocation8 + $0x1e8] sm:$0xff] }
 0x28a   :  { %2803 = vmatprep.subr.bf16.mxu0 %v7251_v40  ;;  %2844 = vmatprep.subr.bf16.mxu1 %v7379_v44  ;;  %v9058_v35 = vld [vmem:[#allocation8 + $0x5c8] sm:$0xff]  ;;  %v7197_v36 = vcombine.high %v9054_v33, %v9056_v34  ;;  %v7196_v38 = vcombine.low %v9054_v33, %v9056_v34 }
 0x28b   :  { %v7324_v39 = vcombine.low %v9058_v35, %v9062_v37  ;;  %v7325_v40 = vcombine.high %v9058_v35, %v9062_v37 }
 0x28d   :  { %2804 = vmatpush2.bf16.msra.mxu0 %v7250_v42  ;;  %2845 = vmatpush2.bf16.msra.mxu1 %v7378_v43  ;;  %v517_v42 = vld [vmem:[#allocation11 + $0x9] sm:$0xf]  ;;  %v9074_v43 = vsub.s32 3, %v9024_v58 }
 0x28e   :  { %2805 = vmatprep.subr.bf16.mxu0 %v7243_v48  ;;  %2846 = vmatprep.subr.bf16.mxu1 %v7371_v52  ;;  %v586_v44 = vrot.slane %v517_v42, %v9027_v60  ;;  %v594_v45 = vrot.slane %v517_v42, %v9071_v41  ;;  %v590_v48 = vrot.slane %v517_v42, %v9032_v7 }
 0x28f   :  { %v598_v49 = vrot.slane %v517_v42, %v9074_v43 }
 0x291   :  { %2806 = vmatpush2.bf16.msra.mxu0 %v7242_v50  ;;  %2847 = vmatpush2.bf16.msra.mxu1 %v7370_v51 }
 0x292   :  { %2807 = vmatprep.subr.bf16.mxu0 %v7235_v56  ;;  %2848 = vmatprep.subr.bf16.mxu1 %v7363_v62 }
 0x295   :  { %2808 = vmatpush2.bf16.msra.mxu0 %v7234_v59  ;;  %2849 = vmatpush2.bf16.msra.mxu1 %v7362_v61 }
 0x296   :  { %2809 = vmatprep.subr.bf16.mxu0 %v7227_v2  ;;  %2850 = vmatprep.subr.bf16.mxu1 %v7355_v6 }
 0x299   :  { %2810 = vmatpush2.bf16.msra.mxu0 %v7226_v4  ;;  %2851 = vmatpush2.bf16.msra.mxu1 %v7354_v5 }
 0x29a   :  { %2811 = vmatprep.subr.bf16.mxu0 %v7219_v12  ;;  %2852 = vmatprep.subr.bf16.mxu1 %v7347_v17 }
 0x29d   :  { %2812 = vmatpush2.bf16.msra.mxu0 %v7218_v14  ;;  %2853 = vmatpush2.bf16.msra.mxu1 %v7346_v15 }
 0x29e   :  { %2813 = vmatprep.subr.bf16.mxu0 %v7211_v23  ;;  %2854 = vmatprep.subr.bf16.mxu1 %v7339_v28 }
 0x2a1   :  { %2814 = vmatpush2.bf16.msra.mxu0 %v7210_v22  ;;  %2855 = vmatpush2.bf16.msra.mxu1 %v7338_v27 }
 0x2a2   :  { %2815 = vmatprep.subr.bf16.mxu0 %v7203_v29  ;;  %2856 = vmatprep.subr.bf16.mxu1 %v7331_v32 }
 0x2a5   :  { %2816 = vmatpush2.bf16.msra.mxu0 %v7202_v16  ;;  %2857 = vmatpush2.bf16.msra.mxu1 %v7330_v21 }
 0x2a6   :  { %2867 = vmatprep.subr.bf16.mxu0 %v7197_v36  ;;  %2908 = vmatprep.subr.bf16.mxu1 %v7325_v40 }
 0x328   :  { %v957_v46 = vpop.f32.mrf.mxu0  ;;  %v998_v47 = vpop.f32.mrf.mxu1 }
 0x329   :  { %v958_v50 = vadd.f32 %v957_v46, %v586_v44  ;;  %v999_v51 = vadd.f32 %v998_v47, %v594_v45 }
 0x32a   :  { %v959_v52 = vpop.f32.mrf.mxu0  ;;  %v1000_v53 = vpop.f32.mrf.mxu1 }
 0x32b   :  { %vm1007_vm4 = vcmp.gt.f32.partialorder %v958_v50, 0.0  ;;  %v1011_v54 = vmul.f32 0.2, %v958_v50  ;;  %vm1009_vm5 = vcmp.gt.f32.partialorder %v999_v51, 0.0  ;;  %v1013_v55 = vmul.f32 0.2, %v999_v51 }
 0x32c   :  { %v960_v56 = vadd.f32 %v959_v52, %v590_v48  ;;  %v1001_v57 = vadd.f32 %v1000_v53, %v598_v49  ;;  %v961_v59 = vpop.f32.mrf.mxu0  ;;  %v1002_v61 = vpop.f32.mrf.mxu1 }
 0x32d   :  { %v9080_v62 = vsel %vm1007_vm4, %v958_v50, %v1011_v54  ;;  %v9082_v63 = vsel %vm1009_vm5, %v999_v51, %v1013_v55 }
 0x32e   :  { %v1019_v0 = vrot.slane %v9080_v62, 4  ;;  %v1043_v1 = vmul.f32 %v9080_v62, %v9080_v62  ;;  %v1031_v2 = vrot.slane %v9082_v63, 4  ;;  %v1045_v3 = vmul.f32 %v9082_v63, %v9082_v63  ;;  %v962_v4 = vpop.f32.mrf.mxu0  ;;  %v1003_v5 = vpop.f32.mrf.mxu1 }
 0x32f   :  { %vm1008_vm6 = vcmp.gt.f32.partialorder %v960_v56, 0.0  ;;  %v1012_v6 = vmul.f32 0.2, %v960_v56  ;;  %vm1010_vm7 = vcmp.gt.f32.partialorder %v1001_v57, 0.0  ;;  %v1014_v8 = vmul.f32 0.2, %v1001_v57 }
 0x330   :  { %v1020_v10 = vadd.f32 %v1019_v0, %v9080_v62  ;;  %v1047_v11 = vrot.slane %v1043_v1, 4  ;;  %v1032_v12 = vadd.f32 %v1031_v2, %v9082_v63  ;;  %v1059_v13 = vrot.slane %v1045_v3, 4 }
 0x331   :  { %v9092_v14 = vsel %vm1008_vm6, %v960_v56, %v1012_v6  ;;  %v9094_v15 = vsel %vm1010_vm7, %v1001_v57, %v1014_v8 }
 0x332   :  { %v1021_v17 = vrot.slane %v1020_v10, 2  ;;  %v1048_v18 = vadd.f32 %v1047_v11, %v1043_v1  ;;  %v1033_v19 = vrot.slane %v1032_v12, 2  ;;  %v1060_v20 = vadd.f32 %v1059_v13, %v1045_v3 }
 0x333   :  { %v1025_v22 = vrot.slane %v9092_v14, 4  ;;  %v1044_v23 = vmul.f32 %v9092_v14, %v9092_v14  ;;  %v1037_v24 = vrot.slane %v9094_v15, 4  ;;  %v1046_v25 = vmul.f32 %v9094_v15, %v9094_v15 }
 0x334   :  { %v1022_v26 = vadd.f32 %v1021_v17, %v1020_v10  ;;  %v1049_v27 = vrot.slane %v1048_v18, 2  ;;  %v1034_v28 = vadd.f32 %v1033_v19, %v1032_v12  ;;  %v1061_v29 = vrot.slane %v1060_v20, 2 }
 0x335   :  { %v1026_v30 = vadd.f32 %v1025_v22, %v9092_v14  ;;  %v1053_v31 = vrot.slane %v1044_v23, 4  ;;  %v1038_v32 = vadd.f32 %v1037_v24, %v9094_v15  ;;  %v1065_v16 = vrot.slane %v1046_v25, 4 }
 0x336   :  { %v1023_v21 = vrot.slane %v1022_v26, 1  ;;  %v1050_v36 = vadd.f32 %v1049_v27, %v1048_v18  ;;  %v1035_v40 = vrot.slane %v1034_v28, 1  ;;  %v1062_v42 = vadd.f32 %v1061_v29, %v1060_v20 }
 0x337   :  { %v1027_v44 = vrot.slane %v1026_v30, 2  ;;  %v1054_v45 = vadd.f32 %v1053_v31, %v1044_v23  ;;  %v1039_v46 = vrot.slane %v1038_v32, 2  ;;  %v1066_v47 = vadd.f32 %v1065_v16, %v1046_v25 }
 0x338   :  { %v1024_v48 = vadd.f32 %v1023_v21, %v1022_v26  ;;  %v1051_v49 = vrot.slane %v1050_v36, 1  ;;  %v1036_v50 = vadd.f32 %v1035_v40, %v1034_v28  ;;  %v1063_v51 = vrot.slane %v1062_v42, 1 }
 0x339   :  { %v1028_v52 = vadd.f32 %v1027_v44, %v1026_v30  ;;  %v1055_v53 = vrot.slane %v1054_v45, 2  ;;  %v1040_v54 = vadd.f32 %v1039_v46, %v1038_v32  ;;  %v1067_v55 = vrot.slane %v1066_v47, 2  ;;  %v1005_v44 = vld [vmem:[#allocation11 + $0xd] sm:$0xf] }
 0x33a   :  { %v1052_v56 = vadd.f32 %v1051_v49, %v1050_v36  ;;  %v1071_v57 = vmul.f32 0.125, %v1024_v48  ;;  %v1064_v59 = vadd.f32 %v1063_v51, %v1062_v42  ;;  %v1073_v61 = vmul.f32 0.125, %v1036_v50 }
 0x33b   :  { %v1029_v0 = vrot.slane %v1028_v52, 1  ;;  %v1056_v1 = vadd.f32 %v1055_v53, %v1054_v45  ;;  %v1041_v2 = vrot.slane %v1040_v54, 1  ;;  %v1068_v3 = vadd.f32 %v1067_v55, %v1066_v47 }
 0x33c   :  { %v1075_v4 = vmul.f32 0.125, %v1052_v56  ;;  %v1079_v5 = vmul.f32 %v1071_v57, %v1071_v57  ;;  %v1077_v6 = vmul.f32 0.125, %v1064_v59  ;;  %v1081_v8 = vmul.f32 %v1073_v61, %v1073_v61 }
 0x33d   :  { %v1030_v10 = vadd.f32 %v1029_v0, %v1028_v52  ;;  %v1057_v11 = vrot.slane %v1056_v1, 1  ;;  %v1042_v12 = vadd.f32 %v1041_v2, %v1040_v54  ;;  %v1069_v13 = vrot.slane %v1068_v3, 1 }
 0x33e   :  { %v1083_v17 = vsub.f32 %v1075_v4, %v1079_v5  ;;  %v1085_v18 = vsub.f32 %v1077_v6, %v1081_v8  ;;  %v1103_v45 = vrot.slane %v1005_v44, %v9027_v60  ;;  %v1111_v47 = vrot.slane %v1005_v44, %v9071_v41 }
 0x33f   :  { %v1058_v19 = vadd.f32 %v1057_v11, %v1056_v1  ;;  %v1072_v20 = vmul.f32 0.125, %v1030_v10  ;;  %v1070_v22 = vadd.f32 %v1069_v13, %v1068_v3  ;;  %v1074_v23 = vmul.f32 0.125, %v1042_v12 }
 0x340   :  { %v1087_v24 = vmax.f32 %v1083_v17, 0.0  ;;  %v1089_v25 = vmax.f32 %v1085_v18, 0.0  ;;  %v1107_v49 = vrot.slane %v1005_v44, %v9032_v7  ;;  %v1115_v50 = vrot.slane %v1005_v44, %v9074_v43  ;;  %v1006_v17 = vld [vmem:[#allocation11 + $0x11] sm:$0xf]  ;;  %v1253_v44 = vld [vmem:[#allocation8 + $0x168] sm:$0xff] }
 0x341   :  { %v1076_v26 = vmul.f32 0.125, %v1058_v19  ;;  %v1080_v27 = vmul.f32 %v1072_v20, %v1072_v20  ;;  %v1078_v28 = vmul.f32 0.125, %v1070_v22  ;;  %v1082_v29 = vmul.f32 %v1074_v23, %v1074_v23 }
 0x342   :  { %v1091_v30 = vadd.f32 1e-05, %v1087_v24  ;;  %v1093_v31 = vadd.f32 1e-05, %v1089_v25 }
 0x343   :  { %v1084_v32 = vsub.f32 %v1076_v26, %v1080_v27  ;;  %v1086_v16 = vsub.f32 %v1078_v28, %v1082_v29 }
 0x344   :  { %8754 = vrsqrt.f32 %v1091_v30 }
 0x345   :  { %v1088_v21 = vmax.f32 %v1084_v32, 0.0  ;;  %v1090_v36 = vmax.f32 %v1086_v16, 0.0  ;;  %8756 = vrsqrt.f32 %v1093_v31  ;;  %v1257_v31 = vld [vmem:[#allocation8 + $0x188] sm:$0xff] }
 0x346   :  { %v1385_v32 = vld [vmem:[#allocation8 + $0x588] sm:$0xff] }
 0x347   :  { %v1092_v40 = vadd.f32 1e-05, %v1088_v21  ;;  %v1094_v42 = vadd.f32 1e-05, %v1090_v36  ;;  %v1249_v36 = vld [vmem:[#allocation8 + $0x148] sm:$0xff] }
 0x348   :  { %v7180_v33 = vcombine.low %v1249_v36, %v1253_v44 }
 0x349   :  { %8758 = vrsqrt.f32 %v1092_v40 }
 0x34a   :  { %8760 = vrsqrt.f32 %v1094_v42 }
 0x351   :  { %v8755_v46 = vpop.eup %8754 }
 0x352   :  { %v8757_v48 = vpop.eup %8756  ;;  %v1120_v51 = vmul.f32 %v8755_v46, %v1103_v45  ;;  %v1377_v45 = vld [vmem:[#allocation8 + $0x548] sm:$0xff] }
 0x353   :  { %v1122_v53 = vmul.f32 %v8757_v48, %v1111_v47  ;;  %v1381_v46 = vld [vmem:[#allocation8 + $0x568] sm:$0xff] }
 0x354   :  { %v1124_v59 = vmul.f32 %v1120_v51, %v1071_v57  ;;  %v1161_v10 = vrot.slane %v1120_v51, %v9027_v60  ;;  %v1241_v51 = vld [vmem:[#allocation8 + $0x108] sm:$0xff]  ;;  %v7308_v34 = vcombine.low %v1377_v45, %v1381_v46 }
 0x355   :  { %v1126_v1 = vmul.f32 %v1122_v53, %v1073_v61  ;;  %v1169_v11 = vrot.slane %v1122_v53, %v9027_v60  ;;  %v1369_v53 = vld [vmem:[#allocation8 + $0x508] sm:$0xff] }
 0x356   :  { %v8759_v52 = vpop.eup %8758  ;;  %v1174_v18 = vmul.f32 %v1161_v10, %v9080_v62  ;;  %v1261_v62 = vld [vmem:[#allocation8 + $0x1a8] sm:$0xff] }
 0x357   :  { %v8761_v54 = vpop.eup %8760  ;;  %v1121_v55 = vmul.f32 %v8759_v52, %v1107_v49  ;;  %v1176_v19 = vmul.f32 %v1169_v11, %v9082_v63  ;;  %v1389_v63 = vld [vmem:[#allocation8 + $0x5a8] sm:$0xff]  ;;  %v7189_v40 = vcombine.high %v1257_v31, %v1261_v62  ;;  %v7188_v47 = vcombine.low %v1257_v31, %v1261_v62 }
 0x358   :  { %v1123_v56 = vmul.f32 %v8761_v54, %v1115_v50  ;;  %v7317_v42 = vcombine.high %v1385_v32, %v1389_v63  ;;  %v7316_v48 = vcombine.low %v1385_v32, %v1389_v63  ;;  %v7181_v49 = vcombine.high %v1249_v36, %v1253_v44  ;;  %v1245_v52 = vld [vmem:[#allocation8 + $0x128] sm:$0xff] }
 0x359   :  { %v1125_v0 = vmul.f32 %v1121_v55, %v1072_v20  ;;  %v1165_v12 = vrot.slane %v1121_v55, %v9027_v60  ;;  %v7309_v50 = vcombine.high %v1377_v45, %v1381_v46  ;;  %v1373_v54 = vld [vmem:[#allocation8 + $0x528] sm:$0xff]  ;;  %v7173_v35 = vcombine.high %v1241_v51, %v1245_v52 }
 0x35a   :  { %v1127_v2 = vmul.f32 %v1123_v56, %v1074_v23  ;;  %v1173_v13 = vrot.slane %v1123_v56, %v9027_v60  ;;  %v7301_v37 = vcombine.high %v1369_v53, %v1373_v54  ;;  %v1361_v55 = vld [vmem:[#allocation8 + $0x4c8] sm:$0xff] }
 0x35b   :  { %v1132_v3 = vcombine.low %v1124_v59, %v1125_v0  ;;  %v1175_v20 = vmul.f32 %v1165_v12, %v9092_v14  ;;  %v1365_v56 = vld [vmem:[#allocation8 + $0x4e8] sm:$0xff]  ;;  %v7172_v59 = vcombine.low %v1241_v51, %v1245_v52  ;;  %v7300_v0 = vcombine.low %v1369_v53, %v1373_v54 }
 0x35c   :  { %v1133_v4 = vcombine.low %v1126_v1, %v1127_v2  ;;  %v1177_v22 = vmul.f32 %v1173_v13, %v9094_v15  ;;  %v7293_v2 = vcombine.high %v1361_v55, %v1365_v56  ;;  %v7292_v10 = vcombine.low %v1361_v55, %v1365_v56  ;;  %v1217_v13 = vld [vmem:[#allocation8 + $0x48] sm:$0xff] }
 0x35d   :  { %v1140_v5 = vrot.slane %v1132_v3, %v9045_v9  ;;  %v1225_v3 = vld [vmem:[#allocation8 + $0x88] sm:$0xff] }
 0x35e   :  { %v1147_v6 = vrot.slane %v1133_v4, %v9045_v9  ;;  %v1229_v4 = vld [vmem:[#allocation8 + $0xa8] sm:$0xff] }
 0x35f   :  { %v7157_v11 = vcombine.high %v1225_v3, %v1229_v4  ;;  %v1329_v31 = vld [vmem:[#allocation8 + $0x3c8] sm:$0xff] }
 0x360   :  { %v1148_v8 = vcombine.low %v1140_v5, %v1147_v6  ;;  %v1353_v5 = vld [vmem:[#allocation8 + $0x488] sm:$0xff] }
 0x361   :  { %v1357_v6 = vld [vmem:[#allocation8 + $0x4a8] sm:$0xff] }
 0x362   :  { %v1155_v57 = vrot.slane %v1148_v8, %v9045_v9  ;;  %v7285_v12 = vcombine.high %v1353_v5, %v1357_v6  ;;  %v1333_v62 = vld [vmem:[#allocation8 + $0x3e8] sm:$0xff] }
 0x363   :  { %v1457_v32 = vld [vmem:[#allocation8 + $0x7c8] sm:$0xff] }
 0x364   :  { %v1157_v61 = vsub.f32 %v1006_v17, %v1155_v57  ;;  %v1221_v17 = vld [vmem:[#allocation8 + $0x68] sm:$0xff] }
 0x365   :  { %v1345_v57 = vld [vmem:[#allocation8 + $0x448] sm:$0xff] }
 0x366   :  { %v1186_v23 = vrot.slane %v1157_v61, %v9032_v7  ;;  %v1194_v24 = vrot.slane %v1157_v61, %v9074_v43  ;;  %v1182_v25 = vrot.slane %v1157_v61, %v9027_v60  ;;  %v1190_v26 = vrot.slane %v1157_v61, %v9071_v41  ;;  %v1349_v61 = vld [vmem:[#allocation8 + $0x468] sm:$0xff] }
 0x367   :  { %v1461_v63 = vld [vmem:[#allocation8 + $0x7e8] sm:$0xff] }
 0x368   :  { %v1200_v27 = vadd.f32 %v1186_v23, %v1175_v20  ;;  %v1202_v28 = vadd.f32 %v1194_v24, %v1177_v22  ;;  %v1199_v29 = vadd.f32 %v1182_v25, %v1174_v18  ;;  %v1201_v30 = vadd.f32 %v1190_v26, %v1176_v19  ;;  %v1209_v23 = vld [vmem:[#allocation8 + $0x8] sm:$0xff] }
 0x369   :  { %v7156_v18 = vcombine.low %v1225_v3, %v1229_v4  ;;  %v7284_v19 = vcombine.low %v1353_v5, %v1357_v6  ;;  %v7149_v20 = vcombine.high %v1217_v13, %v1221_v17  ;;  %v7277_v22 = vcombine.high %v1345_v57, %v1349_v61  ;;  %v1213_v24 = vld [vmem:[#allocation8 + $0x28] sm:$0xff] }
 0x36a   :  { %v9123_v16 = vpack.c.bf16 %v1200_v27, %v1200_v27  ;;  %v9125_v14 = vpack.c.bf16 %v1202_v28, %v1202_v28  ;;  %v9127_v15 = vpack.c.bf16 %v1199_v29, %v1199_v29  ;;  %v9129_v21 = vpack.c.bf16 %v1201_v30, %v1201_v30  ;;  %v1337_v25 = vld [vmem:[#allocation8 + $0x408] sm:$0xff] }
 0x36b   :  { %v1341_v26 = vld [vmem:[#allocation8 + $0x428] sm:$0xff]  ;;  %v7148_v27 = vcombine.low %v1217_v13, %v1221_v17  ;;  %v7276_v28 = vcombine.low %v1345_v57, %v1349_v61  ;;  %v7141_v29 = vcombine.high %v1209_v23, %v1213_v24  ;;  %v7140_v36 = vcombine.low %v1209_v23, %v1213_v24 }
 0x36c   :  { %2817 = vmatprep.mubr.bf16.mxu0 %v9123_v16  ;;  %2858 = vmatprep.mubr.bf16.mxu1 %v9125_v14  ;;  %v7269_v30 = vcombine.high %v1337_v25, %v1341_v26  ;;  %v7389_v44 = vcombine.high %v1457_v32, %v1461_v63  ;;  %v1321_v45 = vld [vmem:[#allocation8 + $0x388] sm:$0xff] }
 0x36d   :  { %2818 = vmatmul.mubr.bf16.vlgmr.msra.gmra.mxu0 %v9127_v15  ;;  %2859 = vmatmul.mubr.bf16.vlgmr.msra.gmra.mxu1 %v9129_v21  ;;  %v1325_v46 = vld [vmem:[#allocation8 + $0x3a8] sm:$0xff] }
 0x36e   :  { %2868 = vmatpush1.bf16.msra.mxu0 %v7196_v38  ;;  %2909 = vmatpush1.bf16.msra.mxu1 %v7324_v39  ;;  %v1233_v38 = vld [vmem:[#allocation8 + $0xc8] sm:$0xff]  ;;  %v7253_v51 = vcombine.high %v1321_v45, %v1325_v46 }
 0x36f   :  { %2899 = vmatprep.mubr.bf16.mxu0 %v9123_v16  ;;  %2940 = vmatprep.mubr.bf16.mxu1 %v9125_v14  ;;  %v1237_v39 = vld [vmem:[#allocation8 + $0xe8] sm:$0xff] }
 0x370   :  { %2869 = vmatprep.subr.bf16.mxu0 %v7189_v40  ;;  %2910 = vmatprep.subr.bf16.mxu1 %v7317_v42  ;;  %v7165_v1 = vcombine.high %v1233_v38, %v1237_v39  ;;  %v7164_v8 = vcombine.low %v1233_v38, %v1237_v39  ;;  %v7268_v40 = vcombine.low %v1337_v25, %v1341_v26  ;;  %v1313_v53 = vld [vmem:[#allocation8 + $0x348] sm:$0xff] }
 0x371   :  { %v7261_v42 = vcombine.high %v1329_v31, %v1333_v62  ;;  %v1317_v54 = vld [vmem:[#allocation8 + $0x368] sm:$0xff] }
 0x372   :  { %2870 = vmatpush1.bf16.msra.mxu0 %v7188_v47  ;;  %2911 = vmatpush1.bf16.msra.mxu1 %v7316_v48  ;;  %v1449_v47 = vld [vmem:[#allocation8 + $0x788] sm:$0xff]  ;;  %v7245_v38 = vcombine.high %v1313_v53, %v1317_v54 }
 0x373   :  { %2871 = vmatprep.subr.bf16.mxu0 %v7181_v49  ;;  %2912 = vmatprep.subr.bf16.mxu1 %v7309_v50  ;;  %v1453_v48 = vld [vmem:[#allocation8 + $0x7a8] sm:$0xff]  ;;  %v7260_v49 = vcombine.low %v1329_v31, %v1333_v62  ;;  %v7388_v50 = vcombine.low %v1457_v32, %v1461_v63 }
 0x374   :  { %v7381_v52 = vcombine.high %v1449_v47, %v1453_v48  ;;  %v1305_v55 = vld [vmem:[#allocation8 + $0x308] sm:$0xff] }
 0x375   :  { %v1309_v56 = vld [vmem:[#allocation8 + $0x328] sm:$0xff] }
 0x376   :  { %2872 = vmatpush1.bf16.msra.mxu0 %v7180_v33  ;;  %2913 = vmatpush1.bf16.msra.mxu1 %v7308_v34  ;;  %v1441_v33 = vld [vmem:[#allocation8 + $0x748] sm:$0xff]  ;;  %v7237_v3 = vcombine.high %v1305_v55, %v1309_v56 }
 0x377   :  { %2873 = vmatprep.subr.bf16.mxu0 %v7173_v35  ;;  %2914 = vmatprep.subr.bf16.mxu1 %v7301_v37  ;;  %v1445_v34 = vld [vmem:[#allocation8 + $0x768] sm:$0xff]  ;;  %v7252_v35 = vcombine.low %v1321_v45, %v1325_v46  ;;  %v7380_v37 = vcombine.low %v1449_v47, %v1453_v48  ;;  %v1266_v47 = vld [vmem:[#allocation8 + $0x1d0] sm:$0xff] }
 0x378   :  { %v7373_v39 = vcombine.high %v1441_v33, %v1445_v34  ;;  %v1297_v5 = vld [vmem:[#allocation8 + $0x2c8] sm:$0xff]  ;;  %v1270_v48 = vld [vmem:[#allocation8 + $0x1f0] sm:$0xff] }
 0x379   :  { %v1301_v6 = vld [vmem:[#allocation8 + $0x2e8] sm:$0xff] }
 0x37a   :  { %2874 = vmatpush1.bf16.msra.mxu0 %v7172_v59  ;;  %2915 = vmatpush1.bf16.msra.mxu1 %v7300_v0  ;;  %v1433_v59 = vld [vmem:[#allocation8 + $0x708] sm:$0xff]  ;;  %v7229_v13 = vcombine.high %v1297_v5, %v1301_v6 }
 0x37b   :  { %2875 = vmatprep.subr.bf16.mxu0 %v7165_v1  ;;  %2916 = vmatprep.subr.bf16.mxu1 %v7293_v2  ;;  %v1437_v0 = vld [vmem:[#allocation8 + $0x728] sm:$0xff]  ;;  %v7244_v1 = vcombine.low %v1313_v53, %v1317_v54  ;;  %v7372_v2 = vcombine.low %v1441_v33, %v1445_v34  ;;  %v7199_v53 = vcombine.high %v1266_v47, %v1270_v48  ;;  %v1258_v33 = vld [vmem:[#allocation8 + $0x190] sm:$0xff] }
 0x37c   :  { %v7365_v4 = vcombine.high %v1433_v59, %v1437_v0  ;;  %v1289_v57 = vld [vmem:[#allocation8 + $0x288] sm:$0xff]  ;;  %v1262_v34 = vld [vmem:[#allocation8 + $0x1b0] sm:$0xff] }
 0x37d   :  { %v1293_v61 = vld [vmem:[#allocation8 + $0x2a8] sm:$0xff] }
 0x37e   :  { %2876 = vmatpush1.bf16.msra.mxu0 %v7164_v8  ;;  %2917 = vmatpush1.bf16.msra.mxu1 %v7292_v10  ;;  %v1425_v8 = vld [vmem:[#allocation8 + $0x6c8] sm:$0xff]  ;;  %v7221_v23 = vcombine.high %v1289_v57, %v1293_v61 }
 0x37f   :  { %2877 = vmatprep.subr.bf16.mxu0 %v7157_v11  ;;  %2918 = vmatprep.subr.bf16.mxu1 %v7285_v12  ;;  %v1429_v10 = vld [vmem:[#allocation8 + $0x6e8] sm:$0xff]  ;;  %v7236_v11 = vcombine.low %v1305_v55, %v1309_v56  ;;  %v7364_v12 = vcombine.low %v1433_v59, %v1437_v0  ;;  %v7191_v55 = vcombine.high %v1258_v33, %v1262_v34  ;;  %v1250_v59 = vld [vmem:[#allocation8 + $0x150] sm:$0xff] }
 0x380   :  { %v7357_v17 = vcombine.high %v1425_v8, %v1429_v10  ;;  %v1281_v25 = vld [vmem:[#allocation8 + $0x248] sm:$0xff]  ;;  %v1254_v0 = vld [vmem:[#allocation8 + $0x170] sm:$0xff] }
 0x381   :  { %v1285_v26 = vld [vmem:[#allocation8 + $0x268] sm:$0xff] }
 0x382   :  { %2878 = vmatpush1.bf16.msra.mxu0 %v7156_v18  ;;  %2919 = vmatpush1.bf16.msra.mxu1 %v7284_v19  ;;  %v1417_v18 = vld [vmem:[#allocation8 + $0x688] sm:$0xff]  ;;  %v7213_v31 = vcombine.high %v1281_v25, %v1285_v26 }
 0x383   :  { %2879 = vmatprep.subr.bf16.mxu0 %v7149_v20  ;;  %2920 = vmatprep.subr.bf16.mxu1 %v7277_v22  ;;  %v1421_v19 = vld [vmem:[#allocation8 + $0x6a8] sm:$0xff]  ;;  %v7228_v20 = vcombine.low %v1297_v5, %v1301_v6  ;;  %v7356_v22 = vcombine.low %v1425_v8, %v1429_v10  ;;  %v7183_v5 = vcombine.high %v1250_v59, %v1254_v0  ;;  %v1242_v8 = vld [vmem:[#allocation8 + $0x110] sm:$0xff] }
 0x384   :  { %v7349_v24 = vcombine.high %v1417_v18, %v1421_v19  ;;  %v1273_v32 = vld [vmem:[#allocation8 + $0x208] sm:$0xff]  ;;  %v1246_v10 = vld [vmem:[#allocation8 + $0x130] sm:$0xff] }
 0x385   :  { %v1277_v63 = vld [vmem:[#allocation8 + $0x228] sm:$0xff] }
 0x386   :  { %2880 = vmatpush1.bf16.msra.mxu0 %v7148_v27  ;;  %2921 = vmatpush1.bf16.msra.mxu1 %v7276_v28  ;;  %v1409_v27 = vld [vmem:[#allocation8 + $0x648] sm:$0xff]  ;;  %v7205_v45 = vcombine.high %v1273_v32, %v1277_v63 }
 0x387   :  { %2881 = vmatprep.subr.bf16.mxu0 %v7141_v29  ;;  %2922 = vmatprep.subr.bf16.mxu1 %v7269_v30  ;;  %v1413_v28 = vld [vmem:[#allocation8 + $0x668] sm:$0xff]  ;;  %v7220_v29 = vcombine.low %v1289_v57, %v1293_v61  ;;  %v7348_v30 = vcombine.low %v1417_v18, %v1421_v19  ;;  %v7175_v57 = vcombine.high %v1242_v8, %v1246_v10  ;;  %v1234_v18 = vld [vmem:[#allocation8 + $0xd0] sm:$0xff] }
 0x388   :  { %v7341_v62 = vcombine.high %v1409_v27, %v1413_v28  ;;  %v1238_v19 = vld [vmem:[#allocation8 + $0xf0] sm:$0xff] }
 0x38a   :  { %2882 = vmatpush1.bf16.msra.mxu0 %v7140_v36  ;;  %2923 = vmatpush1.bf16.msra.mxu1 %v7268_v40  ;;  %v1401_v36 = vld [vmem:[#allocation8 + $0x608] sm:$0xff] }
 0x38b   :  { %2883 = vmatprep.subr.bf16.mxu0 %v7261_v42  ;;  %2924 = vmatprep.subr.bf16.mxu1 %v7389_v44  ;;  %v1405_v40 = vld [vmem:[#allocation8 + $0x628] sm:$0xff]  ;;  %v7212_v42 = vcombine.low %v1281_v25, %v1285_v26  ;;  %v7340_v44 = vcombine.low %v1409_v27, %v1413_v28  ;;  %v7167_v25 = vcombine.high %v1234_v18, %v1238_v19  ;;  %v1226_v27 = vld [vmem:[#allocation8 + $0x90] sm:$0xff] }
 0x38c   :  { %v7333_v46 = vcombine.high %v1401_v36, %v1405_v40  ;;  %v1230_v28 = vld [vmem:[#allocation8 + $0xb0] sm:$0xff] }
 0x38e   :  { %2884 = vmatpush2.bf16.msra.mxu0 %v7260_v49  ;;  %2925 = vmatpush2.bf16.msra.mxu1 %v7388_v50  ;;  %v1394_v49 = vld [vmem:[#allocation8 + $0x5d0] sm:$0xff] }
 0x38f   :  { %2885 = vmatprep.subr.bf16.mxu0 %v7253_v51  ;;  %2926 = vmatprep.subr.bf16.mxu1 %v7381_v52  ;;  %v1398_v50 = vld [vmem:[#allocation8 + $0x5f0] sm:$0xff]  ;;  %v7204_v51 = vcombine.low %v1273_v32, %v1277_v63  ;;  %v7332_v52 = vcombine.low %v1401_v36, %v1405_v40  ;;  %v7159_v32 = vcombine.high %v1226_v27, %v1230_v28 }
 0x390   :  { %v7327_v54 = vcombine.high %v1394_v49, %v1398_v50  ;;  %v1218_v36 = vld [vmem:[#allocation8 + $0x50] sm:$0xff] }
 0x391   :  { %v1222_v40 = vld [vmem:[#allocation8 + $0x70] sm:$0xff] }
 0x392   :  { %2886 = vmatpush2.bf16.msra.mxu0 %v7252_v35  ;;  %2927 = vmatpush2.bf16.msra.mxu1 %v7380_v37  ;;  %v1386_v35 = vld [vmem:[#allocation8 + $0x590] sm:$0xff] }
 0x393   :  { %2887 = vmatprep.subr.bf16.mxu0 %v7245_v38  ;;  %2928 = vmatprep.subr.bf16.mxu1 %v7373_v39  ;;  %v1390_v37 = vld [vmem:[#allocation8 + $0x5b0] sm:$0xff]  ;;  %v7198_v38 = vcombine.low %v1266_v47, %v1270_v48  ;;  %v7326_v39 = vcombine.low %v1394_v49, %v1398_v50  ;;  %v7151_v47 = vcombine.high %v1218_v36, %v1222_v40 }
 0x394   :  { %v7319_v56 = vcombine.high %v1386_v35, %v1390_v37  ;;  %v1210_v49 = vld [vmem:[#allocation8 + $0x10] sm:$0xff] }
 0x395   :  { %v1214_v50 = vld [vmem:[#allocation8 + $0x30] sm:$0xff] }
 0x396   :  { %2888 = vmatpush2.bf16.msra.mxu0 %v7244_v1  ;;  %2929 = vmatpush2.bf16.msra.mxu1 %v7372_v2  ;;  %v1378_v1 = vld [vmem:[#allocation8 + $0x550] sm:$0xff] }
 0x397   :  { %2889 = vmatprep.subr.bf16.mxu0 %v7237_v3  ;;  %2930 = vmatprep.subr.bf16.mxu1 %v7365_v4  ;;  %v1382_v2 = vld [vmem:[#allocation8 + $0x570] sm:$0xff]  ;;  %v7190_v3 = vcombine.low %v1258_v33, %v1262_v34  ;;  %v7318_v4 = vcombine.low %v1386_v35, %v1390_v37  ;;  %v7143_v33 = vcombine.high %v1210_v49, %v1214_v50 }
 0x398   :  { %v7311_v6 = vcombine.high %v1378_v1, %v1382_v2  ;;  %v1330_v35 = vld [vmem:[#allocation8 + $0x3d0] sm:$0xff] }
 0x399   :  { %v1334_v37 = vld [vmem:[#allocation8 + $0x3f0] sm:$0xff] }
 0x39a   :  { %2890 = vmatpush2.bf16.msra.mxu0 %v7236_v11  ;;  %2931 = vmatpush2.bf16.msra.mxu1 %v7364_v12  ;;  %v1370_v11 = vld [vmem:[#allocation8 + $0x510] sm:$0xff] }
 0x39b   :  { %2891 = vmatprep.subr.bf16.mxu0 %v7229_v13  ;;  %2932 = vmatprep.subr.bf16.mxu1 %v7357_v17  ;;  %v1374_v12 = vld [vmem:[#allocation8 + $0x530] sm:$0xff]  ;;  %v7182_v13 = vcombine.low %v1250_v59, %v1254_v0  ;;  %v7310_v17 = vcombine.low %v1378_v1, %v1382_v2  ;;  %v7263_v59 = vcombine.high %v1330_v35, %v1334_v37 }
 0x39c   :  { %v7303_v61 = vcombine.high %v1370_v11, %v1374_v12  ;;  %v1322_v1 = vld [vmem:[#allocation8 + $0x390] sm:$0xff] }
 0x39d   :  { %v1326_v2 = vld [vmem:[#allocation8 + $0x3b0] sm:$0xff] }
 0x39e   :  { %2892 = vmatpush2.bf16.msra.mxu0 %v7228_v20  ;;  %2933 = vmatpush2.bf16.msra.mxu1 %v7356_v22  ;;  %v1362_v20 = vld [vmem:[#allocation8 + $0x4d0] sm:$0xff] }
 0x39f   :  { %2893 = vmatprep.subr.bf16.mxu0 %v7221_v23  ;;  %2934 = vmatprep.subr.bf16.mxu1 %v7349_v24  ;;  %v1366_v22 = vld [vmem:[#allocation8 + $0x4f0] sm:$0xff]  ;;  %v7174_v23 = vcombine.low %v1242_v8, %v1246_v10  ;;  %v7302_v24 = vcombine.low %v1370_v11, %v1374_v12  ;;  %v7255_v8 = vcombine.high %v1322_v1, %v1326_v2 }
 0x3a0   :  { %v7295_v26 = vcombine.high %v1362_v20, %v1366_v22  ;;  %v1314_v11 = vld [vmem:[#allocation8 + $0x350] sm:$0xff] }
 0x3a1   :  { %v1318_v12 = vld [vmem:[#allocation8 + $0x370] sm:$0xff] }
 0x3a2   :  { %2894 = vmatpush2.bf16.msra.mxu0 %v7220_v29  ;;  %2935 = vmatpush2.bf16.msra.mxu1 %v7348_v30  ;;  %v1354_v29 = vld [vmem:[#allocation8 + $0x490] sm:$0xff] }
 0x3a3   :  { %2895 = vmatprep.subr.bf16.mxu0 %v7213_v31  ;;  %2936 = vmatprep.subr.bf16.mxu1 %v7341_v62  ;;  %v1358_v30 = vld [vmem:[#allocation8 + $0x4b0] sm:$0xff]  ;;  %v7166_v31 = vcombine.low %v1234_v18, %v1238_v19  ;;  %v7294_v62 = vcombine.low %v1362_v20, %v1366_v22  ;;  %v7247_v18 = vcombine.high %v1314_v11, %v1318_v12 }
 0x3a4   :  { %v7287_v63 = vcombine.high %v1354_v29, %v1358_v30  ;;  %v1306_v20 = vld [vmem:[#allocation8 + $0x310] sm:$0xff] }
 0x3a5   :  { %v1310_v22 = vld [vmem:[#allocation8 + $0x330] sm:$0xff] }
 0x3a6   :  { %2896 = vmatpush2.bf16.msra.mxu0 %v7212_v42  ;;  %2937 = vmatpush2.bf16.msra.mxu1 %v7340_v44  ;;  %v1346_v42 = vld [vmem:[#allocation8 + $0x450] sm:$0xff] }
 0x3a7   :  { %2897 = vmatprep.subr.bf16.mxu0 %v7205_v45  ;;  %2938 = vmatprep.subr.bf16.mxu1 %v7333_v46  ;;  %v1350_v44 = vld [vmem:[#allocation8 + $0x470] sm:$0xff]  ;;  %v7158_v45 = vcombine.low %v1226_v27, %v1230_v28  ;;  %v7286_v46 = vcombine.low %v1354_v29, %v1358_v30  ;;  %v7239_v27 = vcombine.high %v1306_v20, %v1310_v22 }
 0x3a8   :  { %v7279_v48 = vcombine.high %v1346_v42, %v1350_v44  ;;  %v1298_v29 = vld [vmem:[#allocation8 + $0x2d0] sm:$0xff] }
 0x3a9   :  { %v1302_v30 = vld [vmem:[#allocation8 + $0x2f0] sm:$0xff] }
 0x3aa   :  { %2898 = vmatpush2.bf16.msra.mxu0 %v7204_v51  ;;  %2939 = vmatpush2.bf16.msra.mxu1 %v7332_v52  ;;  %v1338_v51 = vld [vmem:[#allocation8 + $0x410] sm:$0xff] }
 0x3ab   :  { %2949 = vmatprep.subr.bf16.mxu0 %v7199_v53  ;;  %2990 = vmatprep.subr.bf16.mxu1 %v7327_v54  ;;  %v1342_v52 = vld [vmem:[#allocation8 + $0x430] sm:$0xff]  ;;  %v7150_v53 = vcombine.low %v1218_v36, %v1222_v40  ;;  %v7278_v54 = vcombine.low %v1346_v42, %v1350_v44  ;;  %v7231_v36 = vcombine.high %v1298_v29, %v1302_v30 }
 0x3ac   :  { %v7271_v34 = vcombine.high %v1338_v51, %v1342_v52  ;;  %v1290_v42 = vld [vmem:[#allocation8 + $0x290] sm:$0xff] }
 0x3ad   :  { %2900 = vmatmul.mubr.bf16.vlgmr.msra.gmra.mxu0 %v9127_v15  ;;  %2941 = vmatmul.mubr.bf16.vlgmr.msra.gmra.mxu1 %v9129_v21  ;;  %v1294_v44 = vld [vmem:[#allocation8 + $0x2b0] sm:$0xff] }
 0x3ae   :  { %2950 = vmatpush1.bf16.msra.mxu0 %v7198_v38  ;;  %2981 = vmatprep.mubr.bf16.mxu0 %v9123_v16  ;;  %v1458_v38 = vld [vmem:[#allocation8 + $0x7d0] sm:$0xff] }
 0x3af   :  { %2991 = vmatpush1.bf16.msra.mxu1 %v7326_v39  ;;  %3022 = vmatprep.mubr.bf16.mxu1 %v9125_v14  ;;  %v1462_v39 = vld [vmem:[#allocation8 + $0x7f0] sm:$0xff] }
 0x3b0   :  { %2951 = vmatprep.subr.bf16.mxu0 %v7191_v55  ;;  %2992 = vmatprep.subr.bf16.mxu1 %v7319_v56  ;;  %v7142_v55 = vcombine.low %v1210_v49, %v1214_v50  ;;  %v7270_v56 = vcombine.low %v1338_v51, %v1342_v52  ;;  %v7391_v0 = vcombine.high %v1458_v38, %v1462_v39  ;;  %v1282_v51 = vld [vmem:[#allocation8 + $0x250] sm:$0xff] }
 0x3b1   :  { %v7223_v49 = vcombine.high %v1290_v42, %v1294_v44  ;;  %v1286_v52 = vld [vmem:[#allocation8 + $0x270] sm:$0xff] }
 0x3b2   :  { %2952 = vmatpush1.bf16.msra.mxu0 %v7190_v3  ;;  %v1450_v3 = vld [vmem:[#allocation8 + $0x790] sm:$0xff] }
 0x3b3   :  { %2993 = vmatpush1.bf16.msra.mxu1 %v7318_v4  ;;  %2953 = vmatprep.subr.bf16.mxu0 %v7183_v5  ;;  %v1454_v4 = vld [vmem:[#allocation8 + $0x7b0] sm:$0xff]  ;;  %v7262_v5 = vcombine.low %v1330_v35, %v1334_v37  ;;  %v7215_v35 = vcombine.high %v1282_v51, %v1286_v52 }
 0x3b4   :  { %2994 = vmatprep.subr.bf16.mxu1 %v7311_v6  ;;  %v7390_v6 = vcombine.low %v1458_v38, %v1462_v39  ;;  %v7383_v10 = vcombine.high %v1450_v3, %v1454_v4  ;;  %v1274_v38 = vld [vmem:[#allocation8 + $0x210] sm:$0xff] }
 0x3b5   :  { %v1278_v39 = vld [vmem:[#allocation8 + $0x230] sm:$0xff] }
 0x3b6   :  { %2954 = vmatpush1.bf16.msra.mxu0 %v7182_v13  ;;  %v1442_v13 = vld [vmem:[#allocation8 + $0x750] sm:$0xff] }
 0x3b7   :  { %2995 = vmatpush1.bf16.msra.mxu1 %v7310_v17  ;;  %2955 = vmatprep.subr.bf16.mxu0 %v7175_v57  ;;  %v1446_v17 = vld [vmem:[#allocation8 + $0x770] sm:$0xff]  ;;  %v7254_v57 = vcombine.low %v1322_v1, %v1326_v2  ;;  %v7207_v1 = vcombine.high %v1274_v38, %v1278_v39 }
 0x3b8   :  { %2996 = vmatprep.subr.bf16.mxu1 %v7303_v61  ;;  %v7382_v61 = vcombine.low %v1450_v3, %v1454_v4  ;;  %v7375_v19 = vcombine.high %v1442_v13, %v1446_v17  ;;  %v1267_v3 = vld [vmem:[#allocation8 + $0x1d8] sm:$0xff] }
 0x3b9   :  { %v1271_v4 = vld [vmem:[#allocation8 + $0x1f8] sm:$0xff] }
 0x3ba   :  { %2956 = vmatpush1.bf16.msra.mxu0 %v7174_v23  ;;  %v1434_v23 = vld [vmem:[#allocation8 + $0x710] sm:$0xff] }
 0x3bb   :  { %2997 = vmatpush1.bf16.msra.mxu1 %v7302_v24  ;;  %2957 = vmatprep.subr.bf16.mxu0 %v7167_v25  ;;  %v1438_v24 = vld [vmem:[#allocation8 + $0x730] sm:$0xff]  ;;  %v7246_v25 = vcombine.low %v1314_v11, %v1318_v12  ;;  %v7201_v11 = vcombine.high %v1267_v3, %v1271_v4 }
 0x3bc   :  { %2998 = vmatprep.subr.bf16.mxu1 %v7295_v26  ;;  %v7374_v26 = vcombine.low %v1442_v13, %v1446_v17  ;;  %v7367_v28 = vcombine.high %v1434_v23, %v1438_v24  ;;  %v1259_v13 = vld [vmem:[#allocation8 + $0x198] sm:$0xff] }
 0x3bd   :  { %v1263_v17 = vld [vmem:[#allocation8 + $0x1b8] sm:$0xff] }
 0x3be   :  { %2958 = vmatpush1.bf16.msra.mxu0 %v7166_v31  ;;  %v1426_v31 = vld [vmem:[#allocation8 + $0x6d0] sm:$0xff] }
 0x3bf   :  { %2999 = vmatpush1.bf16.msra.mxu1 %v7294_v62  ;;  %2959 = vmatprep.subr.bf16.mxu0 %v7159_v32  ;;  %v1430_v62 = vld [vmem:[#allocation8 + $0x6f0] sm:$0xff]  ;;  %v7238_v32 = vcombine.low %v1306_v20, %v1310_v22  ;;  %v7193_v20 = vcombine.high %v1259_v13, %v1263_v17  ;;  %v1251_v22 = vld [vmem:[#allocation8 + $0x158] sm:$0xff] }
 0x3c0   :  { %3000 = vmatprep.subr.bf16.mxu1 %v7287_v63  ;;  %v7366_v63 = vcombine.low %v1434_v23, %v1438_v24  ;;  %v7359_v40 = vcombine.high %v1426_v31, %v1430_v62  ;;  %v1255_v23 = vld [vmem:[#allocation8 + $0x178] sm:$0xff] }
 0x3c2   :  { %2960 = vmatpush1.bf16.msra.mxu0 %v7158_v45  ;;  %v1418_v45 = vld [vmem:[#allocation8 + $0x690] sm:$0xff] }
 0x3c3   :  { %3001 = vmatpush1.bf16.msra.mxu1 %v7286_v46  ;;  %2961 = vmatprep.subr.bf16.mxu0 %v7151_v47  ;;  %v1422_v46 = vld [vmem:[#allocation8 + $0x6b0] sm:$0xff]  ;;  %v7230_v47 = vcombine.low %v1298_v29, %v1302_v30  ;;  %v7185_v29 = vcombine.high %v1251_v22, %v1255_v23 }
 0x3c4   :  { %3002 = vmatprep.subr.bf16.mxu1 %v7279_v48  ;;  %v7358_v48 = vcombine.low %v1426_v31, %v1430_v62  ;;  %v7351_v50 = vcombine.high %v1418_v45, %v1422_v46  ;;  %v1243_v31 = vld [vmem:[#allocation8 + $0x118] sm:$0xff] }
 0x3c5   :  { %v1247_v62 = vld [vmem:[#allocation8 + $0x138] sm:$0xff] }
 0x3c6   :  { %2962 = vmatpush1.bf16.msra.mxu0 %v7150_v53  ;;  %v1410_v53 = vld [vmem:[#allocation8 + $0x650] sm:$0xff] }
 0x3c7   :  { %3003 = vmatpush1.bf16.msra.mxu1 %v7278_v54  ;;  %2963 = vmatprep.subr.bf16.mxu0 %v7143_v33  ;;  %v1414_v54 = vld [vmem:[#allocation8 + $0x670] sm:$0xff]  ;;  %v7222_v33 = vcombine.low %v1290_v42, %v1294_v44  ;;  %v7177_v42 = vcombine.high %v1243_v31, %v1247_v62  ;;  %v1235_v44 = vld [vmem:[#allocation8 + $0xd8] sm:$0xff] }
 0x3c8   :  { %3004 = vmatprep.subr.bf16.mxu1 %v7271_v34  ;;  %v7350_v34 = vcombine.low %v1418_v45, %v1422_v46  ;;  %v7343_v37 = vcombine.high %v1410_v53, %v1414_v54  ;;  %v1239_v45 = vld [vmem:[#allocation8 + $0xf8] sm:$0xff] }
 0x3c9   :  { %v1363_v46 = vld [vmem:[#allocation8 + $0x4d8] sm:$0xff] }
 0x3ca   :  { %2964 = vmatpush1.bf16.msra.mxu0 %v7142_v55  ;;  %v1402_v55 = vld [vmem:[#allocation8 + $0x610] sm:$0xff] }
 0x3cb   :  { %3005 = vmatpush1.bf16.msra.mxu1 %v7270_v56  ;;  %2965 = vmatprep.subr.bf16.mxu0 %v7263_v59  ;;  %v1406_v56 = vld [vmem:[#allocation8 + $0x630] sm:$0xff]  ;;  %v7214_v59 = vcombine.low %v1282_v51, %v1286_v52  ;;  %v1227_v51 = vld [vmem:[#allocation8 + $0x98] sm:$0xff] }
 0x3cc   :  { %3006 = vmatprep.subr.bf16.mxu1 %v7391_v0  ;;  %v7342_v0 = vcombine.low %v1410_v53, %v1414_v54  ;;  %v7335_v2 = vcombine.high %v1402_v55, %v1406_v56  ;;  %v1231_v52 = vld [vmem:[#allocation8 + $0xb8] sm:$0xff] }
 0x3cd   :  { %v1355_v53 = vld [vmem:[#allocation8 + $0x498] sm:$0xff] }
 0x3ce   :  { %2966 = vmatpush2.bf16.msra.mxu0 %v7262_v5  ;;  %v1395_v5 = vld [vmem:[#allocation8 + $0x5d8] sm:$0xff] }
 0x3cf   :  { %3007 = vmatpush2.bf16.msra.mxu1 %v7390_v6  ;;  %2967 = vmatprep.subr.bf16.mxu0 %v7255_v8  ;;  %v1399_v6 = vld [vmem:[#allocation8 + $0x5f8] sm:$0xff]  ;;  %v7206_v8 = vcombine.low %v1274_v38, %v1278_v39 }
 0x3d0   :  { %3008 = vmatprep.subr.bf16.mxu1 %v7383_v10  ;;  %v7334_v10 = vcombine.low %v1402_v55, %v1406_v56  ;;  %v7329_v12 = vcombine.high %v1395_v5, %v1399_v6  ;;  %v1359_v54 = vld [vmem:[#allocation8 + $0x4b8] sm:$0xff] }
 0x3d1   :  { %v1219_v38 = vld [vmem:[#allocation8 + $0x58] sm:$0xff] }
 0x3d2   :  { %2968 = vmatpush2.bf16.msra.mxu0 %v7254_v57  ;;  %v7200_v57 = vcombine.low %v1267_v3, %v1271_v4  ;;  %v1223_v39 = vld [vmem:[#allocation8 + $0x78] sm:$0xff] }
 0x3d3   :  { %3009 = vmatpush2.bf16.msra.mxu1 %v7382_v61  ;;  %2969 = vmatprep.subr.bf16.mxu0 %v7247_v18  ;;  %v1387_v61 = vld [vmem:[#allocation8 + $0x598] sm:$0xff] }
 0x3d4   :  { %3010 = vmatprep.subr.bf16.mxu1 %v7375_v19  ;;  %v1391_v18 = vld [vmem:[#allocation8 + $0x5b8] sm:$0xff]  ;;  %v7328_v19 = vcombine.low %v1395_v5, %v1399_v6 }
 0x3d5   :  { %v7321_v24 = vcombine.high %v1387_v61, %v1391_v18  ;;  %v1347_v55 = vld [vmem:[#allocation8 + $0x458] sm:$0xff] }
 0x3d6   :  { %2970 = vmatpush2.bf16.msra.mxu0 %v7246_v25  ;;  %v1379_v25 = vld [vmem:[#allocation8 + $0x558] sm:$0xff] }
 0x3d7   :  { %3011 = vmatpush2.bf16.msra.mxu1 %v7374_v26  ;;  %2971 = vmatprep.subr.bf16.mxu0 %v7239_v27  ;;  %v1383_v26 = vld [vmem:[#allocation8 + $0x578] sm:$0xff]  ;;  %v7192_v27 = vcombine.low %v1259_v13, %v1263_v17 }
 0x3d8   :  { %3012 = vmatprep.subr.bf16.mxu1 %v7367_v28  ;;  %v7320_v28 = vcombine.low %v1387_v61, %v1391_v18  ;;  %v7313_v30 = vcombine.high %v1379_v25, %v1383_v26  ;;  %v1351_v56 = vld [vmem:[#allocation8 + $0x478] sm:$0xff] }
 0x3d9   :  { %v1211_v3 = vld [vmem:[#allocation8 + $0x18] sm:$0xff] }
 0x3da   :  { %2972 = vmatpush2.bf16.msra.mxu0 %v7238_v32  ;;  %v1371_v32 = vld [vmem:[#allocation8 + $0x518] sm:$0xff] }
 0x3db   :  { %3013 = vmatpush2.bf16.msra.mxu1 %v7366_v63  ;;  %2973 = vmatprep.subr.bf16.mxu0 %v7231_v36  ;;  %v1375_v63 = vld [vmem:[#allocation8 + $0x538] sm:$0xff]  ;;  %v7184_v36 = vcombine.low %v1251_v22, %v1255_v23 }
 0x3dc   :  { %3014 = vmatprep.subr.bf16.mxu1 %v7359_v40  ;;  %v7312_v40 = vcombine.low %v1379_v25, %v1383_v26  ;;  %v1215_v4 = vld [vmem:[#allocation8 + $0x38] sm:$0xff] }
 0x3dd   :  { %v1339_v5 = vld [vmem:[#allocation8 + $0x418] sm:$0xff]  ;;  %v7144_v18 = vcombine.low %v1211_v3, %v1215_v4 }
 0x3de   :  { %2974 = vmatpush2.bf16.msra.mxu0 %v7230_v47  ;;  %v1367_v47 = vld [vmem:[#allocation8 + $0x4f8] sm:$0xff] }
 0x3df   :  { %3015 = vmatpush2.bf16.msra.mxu1 %v7358_v48  ;;  %2975 = vmatprep.subr.bf16.mxu0 %v7223_v49  ;;  %v7304_v48 = vcombine.low %v1371_v32, %v1375_v63  ;;  %v7169_v49 = vcombine.high %v1235_v44, %v1239_v45  ;;  %v1343_v6 = vld [vmem:[#allocation8 + $0x438] sm:$0xff] }
 0x3e0   :  { %3016 = vmatprep.subr.bf16.mxu1 %v7351_v50  ;;  %v7297_v50 = vcombine.high %v1363_v46, %v1367_v47  ;;  %v1331_v13 = vld [vmem:[#allocation8 + $0x3d8] sm:$0xff] }
 0x3e1   :  { %v1335_v17 = vld [vmem:[#allocation8 + $0x3f8] sm:$0xff] }
 0x3e2   :  { %2976 = vmatpush2.bf16.msra.mxu0 %v7222_v33  ;;  %v7168_v33 = vcombine.low %v1235_v44, %v1239_v45  ;;  %v1463_v61 = vld [vmem:[#allocation8 + $0x7f8] sm:$0xff] }
 0x3e3   :  { %3017 = vmatpush2.bf16.msra.mxu1 %v7350_v34  ;;  %2977 = vmatprep.subr.bf16.mxu0 %v7215_v35  ;;  %v7296_v34 = vcombine.low %v1363_v46, %v1367_v47  ;;  %v7161_v35 = vcombine.high %v1227_v51, %v1231_v52  ;;  %v1323_v23 = vld [vmem:[#allocation8 + $0x398] sm:$0xff] }
 0x3e4   :  { %3018 = vmatprep.subr.bf16.mxu1 %v7343_v37  ;;  %v7289_v37 = vcombine.high %v1355_v53, %v1359_v54  ;;  %v1451_v25 = vld [vmem:[#allocation8 + $0x798] sm:$0xff] }
 0x3e5   :  { %v1455_v26 = vld [vmem:[#allocation8 + $0x7b8] sm:$0xff] }
 0x3e6   :  { %2978 = vmatpush2.bf16.msra.mxu0 %v7214_v59  ;;  %v7160_v59 = vcombine.low %v1227_v51, %v1231_v52  ;;  %v1307_v44 = vld [vmem:[#allocation8 + $0x318] sm:$0xff] }
 0x3e7   :  { %3019 = vmatpush2.bf16.msra.mxu1 %v7342_v0  ;;  %2979 = vmatprep.subr.bf16.mxu0 %v7207_v1  ;;  %v7288_v0 = vcombine.low %v1355_v53, %v1359_v54  ;;  %v7153_v1 = vcombine.high %v1219_v38, %v1223_v39  ;;  %v1311_v45 = vld [vmem:[#allocation8 + $0x338] sm:$0xff] }
 0x3e8   :  { %3020 = vmatprep.subr.bf16.mxu1 %v7335_v2  ;;  %v7281_v2 = vcombine.high %v1347_v55, %v1351_v56  ;;  %v1435_v46 = vld [vmem:[#allocation8 + $0x718] sm:$0xff] }
 0x3e9   :  { %v1439_v47 = vld [vmem:[#allocation8 + $0x738] sm:$0xff] }
 0x3ea   :  { %2980 = vmatpush2.bf16.msra.mxu0 %v7206_v8  ;;  %v7152_v8 = vcombine.low %v1219_v38, %v1223_v39  ;;  %v1299_v51 = vld [vmem:[#allocation8 + $0x2d8] sm:$0xff] }
 0x3eb   :  { %3021 = vmatpush2.bf16.msra.mxu1 %v7334_v10  ;;  %3031 = vmatprep.subr.bf16.mxu0 %v7201_v11  ;;  %v7280_v10 = vcombine.low %v1347_v55, %v1351_v56  ;;  %v7145_v11 = vcombine.high %v1211_v3, %v1215_v4  ;;  %v1303_v52 = vld [vmem:[#allocation8 + $0x2f8] sm:$0xff] }
 0x3ec   :  { %3072 = vmatprep.subr.bf16.mxu1 %v7329_v12  ;;  %v7273_v12 = vcombine.high %v1339_v5, %v1343_v6  ;;  %v1427_v53 = vld [vmem:[#allocation8 + $0x6d8] sm:$0xff] }
 0x3ed   :  { %2982 = vmatmul.mubr.bf16.vlgmr.msra.gmra.mxu0 %v9127_v15  ;;  %v1431_v54 = vld [vmem:[#allocation8 + $0x6f8] sm:$0xff] }
 0x3ee   :  { %3023 = vmatmul.mubr.bf16.vlgmr.msra.gmra.mxu1 %v9129_v21  ;;  %3032 = vmatpush1.bf16.msra.mxu0 %v7200_v57  ;;  %v1459_v57 = vld [vmem:[#allocation8 + $0x7d8] sm:$0xff] }
 0x3ef   :  { %3063 = vmatprep.mubr.bf16.mxu0 %v9123_v16  ;;  %3073 = vmatpush1.bf16.msra.mxu1 %v7328_v19  ;;  %v7305_v16 = vcombine.high %v1371_v32, %v1375_v63  ;;  %v7272_v19 = vcombine.low %v1339_v5, %v1343_v6  ;;  %v7393_v22 = vcombine.high %v1459_v57, %v1463_v61  ;;  %v1443_v32 = vld [vmem:[#allocation8 + $0x758] sm:$0xff] }
 0x3f0   :  { %3104 = vmatprep.mubr.bf16.mxu1 %v9125_v14  ;;  %3033 = vmatprep.subr.bf16.mxu0 %v7193_v20  ;;  %v7176_v14 = vcombine.low %v1243_v31, %v1247_v62  ;;  %v7265_v20 = vcombine.high %v1331_v13, %v1335_v17  ;;  %v1315_v31 = vld [vmem:[#allocation8 + $0x358] sm:$0xff] }
 0x3f1   :  { %3074 = vmatprep.subr.bf16.mxu1 %v7321_v24  ;;  %v1327_v24 = vld [vmem:[#allocation8 + $0x3b8] sm:$0xff] }
 0x3f2   :  { %3034 = vmatpush1.bf16.msra.mxu0 %v7192_v27  ;;  %v7264_v27 = vcombine.low %v1331_v13, %v1335_v17  ;;  %v1319_v62 = vld [vmem:[#allocation8 + $0x378] sm:$0xff] }
 0x3f3   :  { %3075 = vmatpush1.bf16.msra.mxu1 %v7320_v28  ;;  %3035 = vmatprep.subr.bf16.mxu0 %v7185_v29  ;;  %v7392_v28 = vcombine.low %v1459_v57, %v1463_v61  ;;  %v7257_v29 = vcombine.high %v1323_v23, %v1327_v24  ;;  %v1447_v63 = vld [vmem:[#allocation8 + $0x778] sm:$0xff] }
 0x3f4   :  { %3076 = vmatprep.subr.bf16.mxu1 %v7313_v30  ;;  %v7385_v30 = vcombine.high %v1451_v25, %v1455_v26  ;;  %v1291_v38 = vld [vmem:[#allocation8 + $0x298] sm:$0xff] }
 0x3f5   :  { %v1295_v39 = vld [vmem:[#allocation8 + $0x2b8] sm:$0xff] }
 0x3f6   :  { %3036 = vmatpush1.bf16.msra.mxu0 %v7184_v36  ;;  %v7256_v36 = vcombine.low %v1323_v23, %v1327_v24  ;;  %v1419_v55 = vld [vmem:[#allocation8 + $0x698] sm:$0xff] }
 0x3f7   :  { %3077 = vmatpush1.bf16.msra.mxu1 %v7312_v40  ;;  %3037 = vmatprep.subr.bf16.mxu0 %v7177_v42  ;;  %v7384_v40 = vcombine.low %v1451_v25, %v1455_v26  ;;  %v7249_v42 = vcombine.high %v1315_v31, %v1319_v62  ;;  %v1423_v56 = vld [vmem:[#allocation8 + $0x6b8] sm:$0xff] }
 0x3f8   :  { %3078 = vmatprep.subr.bf16.mxu1 %v7305_v16  ;;  %v7377_v16 = vcombine.high %v1443_v32, %v1447_v63  ;;  %v1283_v3 = vld [vmem:[#allocation8 + $0x258] sm:$0xff] }
 0x3f9   :  { %v1287_v4 = vld [vmem:[#allocation8 + $0x278] sm:$0xff] }
 0x3fa   :  { %3038 = vmatpush1.bf16.msra.mxu0 %v7176_v14  ;;  %v7248_v14 = vcombine.low %v1315_v31, %v1319_v62  ;;  %v1411_v5 = vld [vmem:[#allocation8 + $0x658] sm:$0xff] }
 0x3fb   :  { %3079 = vmatpush1.bf16.msra.mxu1 %v7304_v48  ;;  %3039 = vmatprep.subr.bf16.mxu0 %v7169_v49  ;;  %v7376_v48 = vcombine.low %v1443_v32, %v1447_v63  ;;  %v7241_v49 = vcombine.high %v1307_v44, %v1311_v45  ;;  %v1415_v6 = vld [vmem:[#allocation8 + $0x678] sm:$0xff] }
 0x3fc   :  { %3080 = vmatprep.subr.bf16.mxu1 %v7297_v50  ;;  %v7369_v50 = vcombine.high %v1435_v46, %v1439_v47  ;;  %v1275_v13 = vld [vmem:[#allocation8 + $0x218] sm:$0xff] }
 0x3fd   :  { %v1279_v17 = vld [vmem:[#allocation8 + $0x238] sm:$0xff] }
 0x3fe   :  { %3040 = vmatpush1.bf16.msra.mxu0 %v7168_v33  ;;  %v7240_v33 = vcombine.low %v1307_v44, %v1311_v45  ;;  %v1403_v57 = vld [vmem:[#allocation8 + $0x618] sm:$0xff]  ;;  %v7208_v23 = vcombine.low %v1275_v13, %v1279_v17 }
 0x3ff   :  { %3081 = vmatpush1.bf16.msra.mxu1 %v7296_v34  ;;  %3041 = vmatprep.subr.bf16.mxu0 %v7161_v35  ;;  %v7368_v34 = vcombine.low %v1435_v46, %v1439_v47  ;;  %v7233_v35 = vcombine.high %v1299_v51, %v1303_v52  ;;  %v1407_v61 = vld [vmem:[#allocation8 + $0x638] sm:$0xff] }
 0x400   :  { %3082 = vmatprep.subr.bf16.mxu1 %v7289_v37  ;;  %v7361_v37 = vcombine.high %v1427_v53, %v1431_v54  ;;  %v7336_v24 = vcombine.low %v1403_v57, %v1407_v61  ;;  %v9151_v25 = vld [vmem:[#allocation11 + $0x15] sm:$0xff] }
 0x401   :  { %v1468_v26 = vrot.slane %v9151_v25, %v9027_v60 }
 0x402   :  { %3042 = vmatpush1.bf16.msra.mxu0 %v7160_v59  ;;  %v7232_v59 = vcombine.low %v1299_v51, %v1303_v52 }
 0x403   :  { %3083 = vmatpush1.bf16.msra.mxu1 %v7288_v0  ;;  %3043 = vmatprep.subr.bf16.mxu0 %v7153_v1  ;;  %v7360_v0 = vcombine.low %v1427_v53, %v1431_v54  ;;  %v7225_v1 = vcombine.high %v1291_v38, %v1295_v39 }
 0x404   :  { %3084 = vmatprep.subr.bf16.mxu1 %v7281_v2  ;;  %v7353_v2 = vcombine.high %v1419_v55, %v1423_v56 }
 0x406   :  { %3044 = vmatpush1.bf16.msra.mxu0 %v7152_v8  ;;  %v7224_v8 = vcombine.low %v1291_v38, %v1295_v39 }
 0x407   :  { %3085 = vmatpush1.bf16.msra.mxu1 %v7280_v10  ;;  %3045 = vmatprep.subr.bf16.mxu0 %v7145_v11  ;;  %v7352_v10 = vcombine.low %v1419_v55, %v1423_v56  ;;  %v7217_v11 = vcombine.high %v1283_v3, %v1287_v4 }
 0x408   :  { %3086 = vmatprep.subr.bf16.mxu1 %v7273_v12  ;;  %v7345_v12 = vcombine.high %v1411_v5, %v1415_v6 }
 0x40a   :  { %3046 = vmatpush1.bf16.msra.mxu0 %v7144_v18  ;;  %v7216_v18 = vcombine.low %v1283_v3, %v1287_v4 }
 0x40b   :  { %3087 = vmatpush1.bf16.msra.mxu1 %v7272_v19  ;;  %3047 = vmatprep.subr.bf16.mxu0 %v7265_v20  ;;  %v7344_v19 = vcombine.low %v1411_v5, %v1415_v6  ;;  %v7209_v20 = vcombine.high %v1275_v13, %v1279_v17 }
 0x40c   :  { %3088 = vmatprep.subr.bf16.mxu1 %v7393_v22  ;;  %v7337_v22 = vcombine.high %v1403_v57, %v1407_v61 }
 0x40e   :  { %3048 = vmatpush2.bf16.msra.mxu0 %v7264_v27  ;;  %v1472_v27 = vrot.slane %v9151_v25, %v9032_v7 }
 0x40f   :  { %3089 = vmatpush2.bf16.msra.mxu1 %v7392_v28  ;;  %3049 = vmatprep.subr.bf16.mxu0 %v7257_v29 }
 0x410   :  { %3090 = vmatprep.subr.bf16.mxu1 %v7385_v30 }
 0x412   :  { %3050 = vmatpush2.bf16.msra.mxu0 %v7256_v36 }
 0x413   :  { %3091 = vmatpush2.bf16.msra.mxu1 %v7384_v40  ;;  %3051 = vmatprep.subr.bf16.mxu0 %v7249_v42 }
 0x414   :  { %3092 = vmatprep.subr.bf16.mxu1 %v7377_v16 }
 0x416   :  { %3052 = vmatpush2.bf16.msra.mxu0 %v7248_v14 }
 0x417   :  { %3093 = vmatpush2.bf16.msra.mxu1 %v7376_v48  ;;  %3053 = vmatprep.subr.bf16.mxu0 %v7241_v49 }
 0x418   :  { %3094 = vmatprep.subr.bf16.mxu1 %v7369_v50 }
 0x41a   :  { %3054 = vmatpush2.bf16.msra.mxu0 %v7240_v33 }
 0x41b   :  { %3095 = vmatpush2.bf16.msra.mxu1 %v7368_v34  ;;  %3055 = vmatprep.subr.bf16.mxu0 %v7233_v35 }
 0x41c   :  { %3096 = vmatprep.subr.bf16.mxu1 %v7361_v37 }
 0x41e   :  { %3056 = vmatpush2.bf16.msra.mxu0 %v7232_v59 }
 0x41f   :  { %3097 = vmatpush2.bf16.msra.mxu1 %v7360_v0  ;;  %3057 = vmatprep.subr.bf16.mxu0 %v7225_v1 }
 0x420   :  { %3098 = vmatprep.subr.bf16.mxu1 %v7353_v2 }
 0x422   :  { %3058 = vmatpush2.bf16.msra.mxu0 %v7224_v8 }
 0x423   :  { %3099 = vmatpush2.bf16.msra.mxu1 %v7352_v10  ;;  %3059 = vmatprep.subr.bf16.mxu0 %v7217_v11 }
 0x424   :  { %3100 = vmatprep.subr.bf16.mxu1 %v7345_v12 }
 0x426   :  { %3060 = vmatpush2.bf16.msra.mxu0 %v7216_v18 }
 0x427   :  { %3101 = vmatpush2.bf16.msra.mxu1 %v7344_v19  ;;  %3061 = vmatprep.subr.bf16.mxu0 %v7209_v20 }
 0x428   :  { %3102 = vmatprep.subr.bf16.mxu1 %v7337_v22 }
 0x42a   :  { %3062 = vmatpush2.bf16.msra.mxu0 %v7208_v23 }
 0x42b   :  { %3103 = vmatpush2.bf16.msra.mxu1 %v7336_v24  ;;  %v9171_v24 = vld [vmem:[#allocation11 + $0x1d] sm:$0xff] }
 0x42d   :  { %3064 = vmatmul.mubr.bf16.vlgmr.msra.gmra.mxu0 %v9127_v15  ;;  %v2819_v28 = vpop.f32.mrf.mxu0  ;;  %v2860_v29 = vpop.f32.mrf.mxu1 }
 0x42e   :  { %3105 = vmatmul.mubr.bf16.vlgmr.msra.gmra.mxu1 %v9129_v21  ;;  %v2820_v30 = vadd.f32 %v2819_v28, %v1468_v26  ;;  %v3303_v26 = vrot.slane %v9171_v24, %v9027_v60 }
 0x42f   :  { %v2821_v31 = vpop.f32.mrf.mxu0  ;;  %v2862_v62 = vpop.f32.mrf.mxu1 }
 0x430   :  { %v2861_v32 = vadd.f32 %v2860_v29, %v2820_v30  ;;  %v2822_v63 = vadd.f32 %v2821_v31, %v1472_v27  ;;  %v3307_v27 = vrot.slane %v9171_v24, %v9032_v7 }
 0x431   :  { %v2823_v36 = vpop.f32.mrf.mxu0  ;;  %v2864_v40 = vpop.f32.mrf.mxu1 }
 0x432   :  { %vm3115_vm8 = vcmp.gt.f32.partialorder %v2861_v32, 0.0  ;;  %v3123_v42 = vmul.f32 0.2, %v2861_v32  ;;  %v2863_v16 = vadd.f32 %v2862_v62, %v2822_v63  ;;  %v1476_v36 = vrot.slane %v9151_v25, %v9071_v41 }
 0x433   :  { %v2824_v44 = vpop.f32.mrf.mxu0  ;;  %v2865_v45 = vpop.f32.mrf.mxu1  ;;  %v1480_v40 = vrot.slane %v9151_v25, %v9074_v43 }
 0x434   :  { %v9159_v46 = vsel %vm3115_vm8, %v2861_v32, %v3123_v42  ;;  %vm3116_vm9 = vcmp.gt.f32.partialorder %v2863_v16, 0.0  ;;  %v3124_v15 = vmul.f32 0.2, %v2863_v16 }
 0x435   :  { %v3139_v47 = vrot.slane %v9159_v46, 4  ;;  %v3187_v21 = vmul.f32 %v9159_v46, %v9159_v46 }
 0x436   :  { %v9164_v14 = vsel %vm3116_vm9, %v2863_v16, %v3124_v15 }
 0x437   :  { %v3140_v48 = vadd.f32 %v3139_v47, %v9159_v46  ;;  %v3195_v49 = vrot.slane %v3187_v21, 4  ;;  %v3145_v50 = vrot.slane %v9164_v14, 4  ;;  %v3188_v51 = vmul.f32 %v9164_v14, %v9164_v14 }
 0x439   :  { %v3141_v52 = vrot.slane %v3140_v48, 2  ;;  %v3196_v53 = vadd.f32 %v3195_v49, %v3187_v21  ;;  %v3146_v54 = vadd.f32 %v3145_v50, %v9164_v14  ;;  %v3201_v33 = vrot.slane %v3188_v51, 4  ;;  %v8110_v50 = vld [vmem:[#allocation10 + $0x18c] ss:$28 sps:$4 sm:$0xff]  }
 0x43a   :  { %6365 = vmatprep.subr.bf16.mxu0 %v8110_v50  ;;  %v8134_v50 = vld [vmem:[#allocation10 + $0xac] ss:$28 sps:$4 sm:$0xff]  }
 0x43b   :  { %v3142_v34 = vadd.f32 %v3141_v52, %v3140_v48  ;;  %v3197_v35 = vrot.slane %v3196_v53, 2  ;;  %v3147_v37 = vrot.slane %v3146_v54, 2  ;;  %v3202_v38 = vadd.f32 %v3201_v33, %v3188_v51  ;;  %v8113_v51 = vld [vmem:[#allocation10 + $0x50c] ss:$28 sps:$4 sm:$0xff]  }
 0x43c   :  { %6406 = vmatprep.subr.bf16.mxu1 %v8113_v51  ;;  %v8137_v51 = vld [vmem:[#allocation10 + $0x42c] ss:$28 sps:$4 sm:$0xff]  }
 0x43d   :  { %v3143_v39 = vrot.slane %v3142_v34, 1  ;;  %v3198_v55 = vadd.f32 %v3197_v35, %v3196_v53  ;;  %v3148_v56 = vadd.f32 %v3147_v37, %v3146_v54  ;;  %v3203_v59 = vrot.slane %v3202_v38, 2  ;;  %v8108_v54 = vld [vmem:[#allocation10 + $0x188] ss:$28 sps:$4 sm:$0xff]  }
 0x43e   :  { %v8111_v35 = vld [vmem:[#allocation10 + $0x508] ss:$28 sps:$4 sm:$0xff]   ;;  %6366 = vmatpush1.bf16.msra.mxu0 %v8108_v54 }
 0x43f   :  { %v3144_v0 = vadd.f32 %v3143_v39, %v3142_v34  ;;  %v3199_v1 = vrot.slane %v3198_v55, 1  ;;  %v3149_v2 = vrot.slane %v3148_v56, 1  ;;  %v3204_v3 = vadd.f32 %v3203_v59, %v3202_v38  ;;  %6407 = vmatpush1.bf16.msra.mxu1 %v8111_v35  ;;  %v8119_v59 = vld [vmem:[#allocation10 + $0x4d4] ss:$28 sps:$4 sm:$0xff]  }
 0x440   :  { %6408 = vmatprep.subr.bf16.mxu1 %v8119_v59  ;;  %v8143_v59 = vld [vmem:[#allocation10 + $0x3f4] ss:$28 sps:$4 sm:$0xff]  }
 0x441   :  { %v3200_v4 = vadd.f32 %v3199_v1, %v3198_v55  ;;  %v3243_v5 = vmul.f32 0.125, %v3144_v0  ;;  %v3150_v6 = vadd.f32 %v3149_v2, %v3148_v56  ;;  %v3205_v8 = vrot.slane %v3204_v3, 1  ;;  %v8116_v56 = vld [vmem:[#allocation10 + $0x154] ss:$28 sps:$4 sm:$0xff]  }
 0x442   :  { %v8114_v1 = vld [vmem:[#allocation10 + $0x150] ss:$28 sps:$4 sm:$0xff]   ;;  %6367 = vmatprep.subr.bf16.mxu0 %v8116_v56 }
 0x443   :  { %v3251_v10 = vmul.f32 0.125, %v3200_v4  ;;  %v3259_v11 = vmul.f32 %v3243_v5, %v3243_v5  ;;  %v3206_v12 = vadd.f32 %v3205_v8, %v3204_v3  ;;  %v3244_v13 = vmul.f32 0.125, %v3150_v6  ;;  %v8117_v2 = vld [vmem:[#allocation10 + $0x4d0] ss:$28 sps:$4 sm:$0xff]   ;;  %6368 = vmatpush1.bf16.msra.mxu0 %v8114_v1 }
 0x444   :  { %6409 = vmatpush1.bf16.msra.mxu1 %v8117_v2  ;;  %v8140_v56 = vld [vmem:[#allocation10 + $0x74] ss:$28 sps:$4 sm:$0xff]  }
 0x445   :  { %v3267_v17 = vsub.f32 %v3251_v10, %v3259_v11  ;;  %v3252_v57 = vmul.f32 0.125, %v3206_v12  ;;  %v3260_v61 = vmul.f32 %v3244_v13, %v3244_v13  ;;  %v8138_v1 = vld [vmem:[#allocation10 + $0x70] ss:$28 sps:$4 sm:$0xff]  }
 0x446   :  { %v8141_v2 = vld [vmem:[#allocation10 + $0x3f0] ss:$28 sps:$4 sm:$0xff]  }
 0x447   :  { %v3275_v18 = vmax.f32 %v3267_v17, 0.0  ;;  %v3268_v19 = vsub.f32 %v3252_v57, %v3260_v61  ;;  %v8125_v17 = vld [vmem:[#allocation10 + $0x49c] ss:$28 sps:$4 sm:$0xff]  }
 0x448   :  { %v8120_v57 = vld [vmem:[#allocation10 + $0x118] ss:$28 sps:$4 sm:$0xff]   ;;  %6410 = vmatprep.subr.bf16.mxu1 %v8125_v17  ;;  %v8152_v17 = vld [vmem:[#allocation10 + $0x4] ss:$28 sps:$4 sm:$0xff]  }
 0x449   :  { %v3283_v20 = vadd.f32 1e-05, %v3275_v18  ;;  %v3276_v22 = vmax.f32 %v3268_v19, 0.0  ;;  %v8123_v61 = vld [vmem:[#allocation10 + $0x498] ss:$28 sps:$4 sm:$0xff]  }
 0x44a   :  { %6411 = vmatpush1.bf16.msra.mxu1 %v8123_v61  ;;  %v8150_v61 = vld [vmem:[#allocation10] ss:$28 sps:$4 sm:$0xff]  }
 0x44b   :  { %8762 = vrsqrt.f32 %v3283_v20  ;;  %v3284_v23 = vadd.f32 1e-05, %v3276_v22 }
 0x44d   :  { %8764 = vrsqrt.f32 %v3284_v23 }
 0x458   :  { %v8763_v28 = vpop.eup %8762 }
 0x459   :  { %v9177_v29 = vmul.f32 %v8763_v28, %v3303_v26 }
 0x45a   :  { %v8765_v30 = vpop.eup %8764 }
 0x45b   :  { %v9179_v31 = vmul.f32 %v8765_v30, %v3307_v27  ;;  %v9182_v62 = vmul.f32 %v9177_v29, %v3243_v5  ;;  %v8128_v30 = vld [vmem:[#allocation10 + $0xe4] ss:$28 sps:$4 sm:$0xff]  }
 0x45d   :  { %v9185_v32 = vmul.f32 %v9179_v31, %v3244_v13  ;;  %v8122_v13 = vld [vmem:[#allocation10 + $0x11c] ss:$28 sps:$4 sm:$0xff]  }
 0x45e   :  { %6369 = vmatprep.subr.bf16.mxu0 %v8122_v13 }
 0x45f   :  { %v3364_v63 = vcombine.low %v9182_v62, %v9185_v32  ;;  %6370 = vmatpush1.bf16.msra.mxu0 %v8120_v57  ;;  %v8155_v57 = vld [vmem:[#allocation10 + $0x384] ss:$28 sps:$4 sm:$0xff]   ;;  %v9237_v62 = vsub.s32 4, %v9024_v58  ;;  %v8186_v32 = vld [vmem:[#allocation10 + $0x230] ss:$28 sps:$4 sm:$0xff]  }
 0x460   :  { %6371 = vmatprep.subr.bf16.mxu0 %v8128_v30  ;;  %v8162_v30 = vld [vmem:[#allocation10 + $0x310] ss:$28 sps:$4 sm:$0xff]  }
 0x46d   :  { %v2901_v42 = vpop.f32.mrf.mxu0  ;;  %v2942_v16 = vpop.f32.mrf.mxu1 }
 0x46e   :  { %v2902_v44 = vadd.f32 %v2901_v42, %v1476_v36  ;;  %v8131_v36 = vld [vmem:[#allocation10 + $0x464] ss:$28 sps:$4 sm:$0xff]  }
 0x46f   :  { %v2903_v45 = vpop.f32.mrf.mxu0  ;;  %v2944_v15 = vpop.f32.mrf.mxu1  ;;  %v8129_v42 = vld [vmem:[#allocation10 + $0x460] ss:$28 sps:$4 sm:$0xff]   ;;  %6412 = vmatprep.subr.bf16.mxu1 %v8131_v36  ;;  %v8165_v36 = vld [vmem:[#allocation10 + $0x690] ss:$28 sps:$4 sm:$0xff]  }
 0x470   :  { %v2943_v47 = vadd.f32 %v2942_v16, %v2902_v44  ;;  %v2904_v21 = vadd.f32 %v2903_v45, %v1480_v40  ;;  %v8126_v40 = vld [vmem:[#allocation10 + $0xe0] ss:$28 sps:$4 sm:$0xff]   ;;  %6413 = vmatpush1.bf16.msra.mxu1 %v8129_v42 }
 0x471   :  { %v2905_v48 = vpop.f32.mrf.mxu0  ;;  %v2946_v49 = vpop.f32.mrf.mxu1  ;;  %6372 = vmatpush1.bf16.msra.mxu0 %v8126_v40  ;;  %6414 = vmatprep.subr.bf16.mxu1 %v8137_v51  ;;  %v3315_v40 = vrot.slane %v9171_v24, %v9074_v43 }
 0x472   :  { %vm3117_vm10 = vcmp.gt.f32.partialorder %v2943_v47, 0.0  ;;  %v3125_v52 = vmul.f32 0.2, %v2943_v47  ;;  %v2945_v53 = vadd.f32 %v2944_v15, %v2904_v21  ;;  %6373 = vmatprep.subr.bf16.mxu0 %v8134_v50 }
 0x473   :  { %v2906_v33 = vpop.f32.mrf.mxu0  ;;  %v2947_v34 = vpop.f32.mrf.mxu1 }
 0x474   :  { %v9193_v37 = vsel %vm3117_vm10, %v2943_v47, %v3125_v52  ;;  %vm3118_vm11 = vcmp.gt.f32.partialorder %v2945_v53, 0.0  ;;  %v3126_v38 = vmul.f32 0.2, %v2945_v53  ;;  %v8132_v52 = vld [vmem:[#allocation10 + $0xa8] ss:$28 sps:$4 sm:$0xff]  }
 0x475   :  { %v3151_v39 = vrot.slane %v9193_v37, 4  ;;  %v3189_v55 = vmul.f32 %v9193_v37, %v9193_v37  ;;  %6374 = vmatpush1.bf16.msra.mxu0 %v8132_v52  ;;  %v8176_v52 = vld [vmem:[#allocation10 + $0x2a4] ss:$28 sps:$4 sm:$0xff]  }
 0x476   :  { %v9198_v0 = vsel %vm3118_vm11, %v2945_v53, %v3126_v38  ;;  %v8135_v53 = vld [vmem:[#allocation10 + $0x428] ss:$28 sps:$4 sm:$0xff]   ;;  %6375 = vmatprep.subr.bf16.mxu0 %v8140_v56 }
 0x477   :  { %v3152_v3 = vadd.f32 %v3151_v39, %v9193_v37  ;;  %v3207_v4 = vrot.slane %v3189_v55, 4  ;;  %v3157_v5 = vrot.slane %v9198_v0, 4  ;;  %v3190_v6 = vmul.f32 %v9198_v0, %v9198_v0  ;;  %6415 = vmatpush1.bf16.msra.mxu1 %v8135_v53  ;;  %v8179_v53 = vld [vmem:[#allocation10 + $0x624] ss:$28 sps:$4 sm:$0xff]  }
 0x478   :  { %6416 = vmatprep.subr.bf16.mxu1 %v8143_v59  ;;  %v8183_v56 = vld [vmem:[#allocation10 + $0x5e8] ss:$28 sps:$4 sm:$0xff]  }
 0x479   :  { %v3153_v8 = vrot.slane %v3152_v3, 2  ;;  %v3208_v10 = vadd.f32 %v3207_v4, %v3189_v55  ;;  %v3158_v11 = vadd.f32 %v3157_v5, %v9198_v0  ;;  %v3213_v12 = vrot.slane %v3190_v6, 4  ;;  %6376 = vmatpush1.bf16.msra.mxu0 %v8138_v1  ;;  %v8188_v1 = vld [vmem:[#allocation10 + $0x234] ss:$28 sps:$4 sm:$0xff]  }
 0x47b   :  { %v3154_v18 = vadd.f32 %v3153_v8, %v3152_v3  ;;  %v3209_v19 = vrot.slane %v3208_v10, 2  ;;  %v3159_v20 = vrot.slane %v3158_v11, 2  ;;  %v3214_v22 = vadd.f32 %v3213_v12, %v3190_v6  ;;  %6417 = vmatpush1.bf16.msra.mxu1 %v8141_v2  ;;  %v8146_v8 = vld [vmem:[#allocation10 + $0x3c] ss:$28 sps:$4 sm:$0xff]   ;;  %v8191_v2 = vld [vmem:[#allocation10 + $0x5b4] ss:$28 sps:$4 sm:$0xff]  }
 0x47c   :  { %v8149_v12 = vld [vmem:[#allocation10 + $0x3bc] ss:$28 sps:$4 sm:$0xff]   ;;  %6377 = vmatprep.subr.bf16.mxu0 %v8146_v8  ;;  %v1484_v8 = vrot.slane %v9151_v25, %v9237_v62 }
 0x47d   :  { %v3155_v23 = vrot.slane %v3154_v18, 1  ;;  %v3210_v26 = vadd.f32 %v3209_v19, %v3208_v10  ;;  %v3160_v27 = vadd.f32 %v3159_v20, %v3158_v11  ;;  %v3215_v28 = vrot.slane %v3214_v22, 2  ;;  %v8144_v10 = vld [vmem:[#allocation10 + $0x38] ss:$28 sps:$4 sm:$0xff]   ;;  %6418 = vmatprep.subr.bf16.mxu1 %v8149_v12  ;;  %v8158_v19 = vld [vmem:[#allocation10 + $0x34c] ss:$28 sps:$4 sm:$0xff]  }
 0x47e   :  { %v8147_v11 = vld [vmem:[#allocation10 + $0x3b8] ss:$28 sps:$4 sm:$0xff]   ;;  %6378 = vmatpush1.bf16.msra.mxu0 %v8144_v10  ;;  %v8161_v20 = vld [vmem:[#allocation10 + $0x6cc] ss:$28 sps:$4 sm:$0xff]   ;;  %v8203_v12 = vld [vmem:[#allocation10 + $0x544] ss:$28 sps:$4 sm:$0xff]  }
 0x47f   :  { %v3156_v16 = vadd.f32 %v3155_v23, %v3154_v18  ;;  %v3211_v44 = vrot.slane %v3210_v26, 1  ;;  %v3161_v45 = vrot.slane %v3160_v27, 1  ;;  %v3216_v15 = vadd.f32 %v3215_v28, %v3214_v22  ;;  %6419 = vmatpush1.bf16.msra.mxu1 %v8147_v11  ;;  %v8153_v18 = vld [vmem:[#allocation10 + $0x380] ss:$28 sps:$4 sm:$0xff]   ;;  %6379 = vmatprep.subr.bf16.mxu0 %v8152_v17  ;;  %v8156_v22 = vld [vmem:[#allocation10 + $0x348] ss:$28 sps:$4 sm:$0xff]  }
 0x480   :  { %6420 = vmatprep.subr.bf16.mxu1 %v8155_v57  ;;  %v8159_v23 = vld [vmem:[#allocation10 + $0x6c8] ss:$28 sps:$4 sm:$0xff]   ;;  %v8167_v28 = vld [vmem:[#allocation10 + $0x694] ss:$28 sps:$4 sm:$0xff]   ;;  %v8197_v10 = vld [vmem:[#allocation10 + $0x57c] ss:$28 sps:$4 sm:$0xff]  }
 0x481   :  { %v3212_v47 = vadd.f32 %v3211_v44, %v3210_v26  ;;  %v9205_v21 = vmul.f32 0.125, %v3156_v16  ;;  %v3162_v48 = vadd.f32 %v3161_v45, %v3160_v27  ;;  %v3217_v49 = vrot.slane %v3216_v15, 1  ;;  %v8164_v27 = vld [vmem:[#allocation10 + $0x314] ss:$28 sps:$4 sm:$0xff]   ;;  %v8170_v44 = vld [vmem:[#allocation10 + $0x2dc] ss:$28 sps:$4 sm:$0xff]  }
 0x482   :  { %6380 = vmatpush1.bf16.msra.mxu0 %v8150_v61  ;;  %v3311_v26 = vrot.slane %v9171_v24, %v9071_v41  ;;  %v8173_v45 = vld [vmem:[#allocation10 + $0x65c] ss:$28 sps:$4 sm:$0xff]   ;;  %v8200_v11 = vld [vmem:[#allocation10 + $0x1c4] ss:$28 sps:$4 sm:$0xff]  }
 0x483   :  { %v3253_v54 = vmul.f32 0.125, %v3212_v47  ;;  %v3261_v33 = vmul.f32 %v9205_v21, %v9205_v21  ;;  %v3218_v34 = vadd.f32 %v3217_v49, %v3216_v15  ;;  %v9209_v35 = vmul.f32 0.125, %v3162_v48  ;;  %6421 = vmatpush1.bf16.msra.mxu1 %v8153_v18  ;;  %6381 = vmatprep.subr.bf16.mxu0 %v8158_v19  ;;  %v8168_v47 = vld [vmem:[#allocation10 + $0x2d8] ss:$28 sps:$4 sm:$0xff]   ;;  %v8198_v17 = vld [vmem:[#allocation10 + $0x1c0] ss:$28 sps:$4 sm:$0xff]  }
 0x484   :  { %6422 = vmatprep.subr.bf16.mxu1 %v8161_v20  ;;  %v8171_v48 = vld [vmem:[#allocation10 + $0x658] ss:$28 sps:$4 sm:$0xff]   ;;  %v8201_v61 = vld [vmem:[#allocation10 + $0x540] ss:$28 sps:$4 sm:$0xff]  }
 0x485   :  { %v3269_v38 = vsub.f32 %v3253_v54, %v3261_v33  ;;  %v3254_v39 = vmul.f32 0.125, %v3218_v34  ;;  %v3262_v55 = vmul.f32 %v9209_v35, %v9209_v35  ;;  %v8174_v54 = vld [vmem:[#allocation10 + $0x2a0] ss:$28 sps:$4 sm:$0xff]  }
 0x486   :  { %6382 = vmatpush2.bf16.msra.mxu0 %v8156_v22  ;;  %v8177_v33 = vld [vmem:[#allocation10 + $0x620] ss:$28 sps:$4 sm:$0xff]  }
 0x487   :  { %v3277_v3 = vmax.f32 %v3269_v38, 0.0  ;;  %v3270_v4 = vsub.f32 %v3254_v39, %v3262_v55  ;;  %6423 = vmatpush2.bf16.msra.mxu1 %v8159_v23  ;;  %6383 = vmatprep.subr.bf16.mxu0 %v8164_v27  ;;  %v9229_v38 = vrot.slane %v3364_v63, %v9045_v9  ;;  %v8185_v39 = vld [vmem:[#allocation10 + $0x5ec] ss:$28 sps:$4 sm:$0xff]  }
 0x488   :  { %6424 = vmatprep.subr.bf16.mxu1 %v8167_v28  ;;  %v8180_v55 = vld [vmem:[#allocation10 + $0x268] ss:$28 sps:$4 sm:$0xff]   ;;  %v8189_v63 = vld [vmem:[#allocation10 + $0x5b0] ss:$28 sps:$4 sm:$0xff]  }
 0x489   :  { %v3285_v5 = vadd.f32 1e-05, %v3277_v3  ;;  %v3278_v6 = vmax.f32 %v3270_v4, 0.0  ;;  %v9240_v3 = vsub.s32 5, %v9024_v58  ;;  %v8192_v4 = vld [vmem:[#allocation10 + $0x1f8] ss:$28 sps:$4 sm:$0xff]  }
 0x48a   :  { %6384 = vmatpush2.bf16.msra.mxu0 %v8162_v30  ;;  %v8206_v28 = vld [vmem:[#allocation10 + $0x88c] ss:$28 sps:$4 sm:$0xff]  }
 0x48b   :  { %8766 = vrsqrt.f32 %v3285_v5  ;;  %v3286_v13 = vadd.f32 1e-05, %v3278_v6  ;;  %6425 = vmatpush2.bf16.msra.mxu1 %v8165_v36  ;;  %6385 = vmatprep.subr.bf16.mxu0 %v8170_v44  ;;  %v8194_v5 = vld [vmem:[#allocation10 + $0x1fc] ss:$28 sps:$4 sm:$0xff]  }
 0x48c   :  { %6426 = vmatprep.subr.bf16.mxu1 %v8173_v45  ;;  %v8195_v6 = vld [vmem:[#allocation10 + $0x578] ss:$28 sps:$4 sm:$0xff]  }
 0x48d   :  { %8768 = vrsqrt.f32 %v3286_v13  ;;  %v1488_v13 = vrot.slane %v9151_v25, %v9240_v3 }
 0x48e   :  { %6386 = vmatpush2.bf16.msra.mxu0 %v8168_v47 }
 0x48f   :  { %6427 = vmatpush2.bf16.msra.mxu1 %v8171_v48  ;;  %6387 = vmatprep.subr.bf16.mxu0 %v8176_v52 }
 0x490   :  { %6428 = vmatprep.subr.bf16.mxu1 %v8179_v53 }
 0x492   :  { %6388 = vmatpush2.bf16.msra.mxu0 %v8174_v54 }
 0x493   :  { %6429 = vmatpush2.bf16.msra.mxu1 %v8177_v33 }
 0x494   :  { %6430 = vmatprep.subr.bf16.mxu1 %v8185_v39 }
 0x497   :  { %6431 = vmatpush2.bf16.msra.mxu1 %v8183_v56 }
 0x498   :  { %v8767_v42 = vpop.eup %8766  ;;  %6432 = vmatprep.subr.bf16.mxu1 %v8191_v2 }
 0x499   :  { %v9217_v16 = vmul.f32 %v8767_v42, %v3311_v26  ;;  %v8209_v42 = vld [vmem:[#allocation10 + $0xc0c] ss:$28 sps:$4 sm:$0xff]  }
 0x49a   :  { %v8769_v15 = vpop.eup %8768 }
 0x49b   :  { %v9219_v49 = vmul.f32 %v8769_v15, %v3315_v40  ;;  %v3350_v50 = vmul.f32 %v9217_v16, %v9205_v21  ;;  %6433 = vmatpush2.bf16.msra.mxu1 %v8189_v63 }
 0x49c   :  { %6434 = vmatprep.subr.bf16.mxu1 %v8197_v10 }
 0x49d   :  { %v3351_v51 = vmul.f32 %v9219_v49, %v9209_v35  ;;  %v8182_v35 = vld [vmem:[#allocation10 + $0x26c] ss:$28 sps:$4 sm:$0xff]  }
 0x49e   :  { %6389 = vmatprep.subr.bf16.mxu0 %v8182_v35 }
 0x49f   :  { %v3365_v34 = vcombine.low %v3350_v50, %v3351_v51  ;;  %6390 = vmatpush2.bf16.msra.mxu0 %v8180_v55  ;;  %6435 = vmatpush2.bf16.msra.mxu1 %v8195_v6 }
 0x4a0   :  { %6391 = vmatprep.subr.bf16.mxu0 %v8188_v1  ;;  %6436 = vmatprep.subr.bf16.mxu1 %v8203_v12 }
 0x4a1   :  { %v9232_v21 = vrot.slane %v3365_v34, %v9045_v9 }
 0x4a3   :  { %v3396_v59 = vcombine.low %v9229_v38, %v9232_v21  ;;  %6392 = vmatpush2.bf16.msra.mxu0 %v8186_v32  ;;  %6437 = vmatpush2.bf16.msra.mxu1 %v8201_v61 }
 0x4a4   :  { %6393 = vmatprep.subr.bf16.mxu0 %v8194_v5  ;;  %6488 = vmatprep.subr.bf16.mxu1 %v8209_v42 }
 0x4a7   :  { %6394 = vmatpush2.bf16.msra.mxu0 %v8192_v4 }
 0x4a8   :  { %6395 = vmatprep.subr.bf16.mxu0 %v8200_v11 }
 0x4ab   :  { %6396 = vmatpush2.bf16.msra.mxu0 %v8198_v17 }
 0x4ac   :  { %6447 = vmatprep.subr.bf16.mxu0 %v8206_v28 }
 0x4ad   :  { %v2983_v57 = vpop.f32.mrf.mxu0 }
 0x4ae   :  { %v2984_v18 = vadd.f32 %v2983_v57, %v1484_v8  ;;  %v3024_v19 = vpop.f32.mrf.mxu1 }
 0x4af   :  { %v2985_v20 = vpop.f32.mrf.mxu0 }
 0x4b0   :  { %v3025_v22 = vadd.f32 %v3024_v19, %v2984_v18  ;;  %v2986_v23 = vadd.f32 %v2985_v20, %v1488_v13  ;;  %v3026_v26 = vpop.f32.mrf.mxu1 }
 0x4b1   :  { %v2987_v27 = vpop.f32.mrf.mxu0 }
 0x4b2   :  { %vm3119_vm12 = vcmp.gt.f32.partialorder %v3025_v22, 0.0  ;;  %v3127_v30 = vmul.f32 0.2, %v3025_v22  ;;  %v3027_v36 = vadd.f32 %v3026_v26, %v2986_v23  ;;  %v3028_v40 = vpop.f32.mrf.mxu1 }
 0x4b3   :  { %v2988_v44 = vpop.f32.mrf.mxu0 }
 0x4b4   :  { %v3135_v45 = vsel %vm3119_vm12, %v3025_v22, %v3127_v30  ;;  %vm3120_vm13 = vcmp.gt.f32.partialorder %v3027_v36, 0.0  ;;  %v3128_v15 = vmul.f32 0.2, %v3027_v36  ;;  %v3029_v47 = vpop.f32.mrf.mxu1  ;;  %v3319_v44 = vrot.slane %v9171_v24, %v9237_v62 }
 0x4b5   :  { %v3163_v48 = vrot.slane %v3135_v45, 4  ;;  %v3191_v50 = vmul.f32 %v3135_v45, %v3135_v45 }
 0x4b6   :  { %v9246_v51 = vsel %vm3120_vm13, %v3027_v36, %v3128_v15  ;;  %v3323_v15 = vrot.slane %v9171_v24, %v9240_v3 }
 0x4b7   :  { %v3164_v52 = vadd.f32 %v3163_v48, %v3135_v45  ;;  %v3219_v53 = vrot.slane %v3191_v50, 4  ;;  %v3169_v54 = vrot.slane %v9246_v51, 4  ;;  %v3192_v33 = vmul.f32 %v9246_v51, %v9246_v51 }
 0x4b9   :  { %v3165_v34 = vrot.slane %v3164_v52, 2  ;;  %v3220_v35 = vadd.f32 %v3219_v53, %v3191_v50  ;;  %v3170_v39 = vadd.f32 %v3169_v54, %v9246_v51  ;;  %v3225_v55 = vrot.slane %v3192_v33, 4 }
 0x4bb   :  { %v3166_v56 = vadd.f32 %v3165_v34, %v3164_v52  ;;  %v3221_v1 = vrot.slane %v3220_v35, 2  ;;  %v3171_v2 = vrot.slane %v3170_v39, 2  ;;  %v3226_v32 = vadd.f32 %v3225_v55, %v3192_v33 }
 0x4bc   :  { %v9272_v55 = vsub.s32 7, %v9024_v58 }
 0x4bd   :  { %v3167_v63 = vrot.slane %v3166_v56, 1  ;;  %v3222_v4 = vadd.f32 %v3221_v1, %v3220_v35  ;;  %v3172_v5 = vadd.f32 %v3171_v2, %v3170_v39  ;;  %v3227_v6 = vrot.slane %v3226_v32, 2 }
 0x4be   :  { %v9269_v39 = vsub.s32 6, %v9024_v58  ;;  %v1496_v1 = vrot.slane %v9151_v25, %v9272_v55 }
 0x4bf   :  { %v3168_v8 = vadd.f32 %v3167_v63, %v3166_v56  ;;  %v3223_v10 = vrot.slane %v3222_v4, 1  ;;  %v3173_v11 = vrot.slane %v3172_v5, 1  ;;  %v3228_v12 = vadd.f32 %v3227_v6, %v3226_v32 }
 0x4c0   :  { %v1492_v56 = vrot.slane %v9151_v25, %v9269_v39 }
 0x4c1   :  { %v3224_v13 = vadd.f32 %v3223_v10, %v3222_v4  ;;  %v3247_v17 = vmul.f32 0.125, %v3168_v8  ;;  %v3174_v57 = vadd.f32 %v3173_v11, %v3172_v5  ;;  %v3229_v61 = vrot.slane %v3228_v12, 1 }
 0x4c3   :  { %v3255_v18 = vmul.f32 0.125, %v3224_v13  ;;  %v3263_v19 = vmul.f32 %v3247_v17, %v3247_v17  ;;  %v3230_v20 = vadd.f32 %v3229_v61, %v3228_v12  ;;  %v3248_v22 = vmul.f32 0.125, %v3174_v57 }
 0x4c5   :  { %v3271_v23 = vsub.f32 %v3255_v18, %v3263_v19  ;;  %v3256_v26 = vmul.f32 0.125, %v3230_v20  ;;  %v3264_v27 = vmul.f32 %v3248_v22, %v3248_v22 }
 0x4c7   :  { %v3279_v28 = vmax.f32 %v3271_v23, 0.0  ;;  %v3272_v30 = vsub.f32 %v3256_v26, %v3264_v27 }
 0x4c9   :  { %v3287_v36 = vadd.f32 1e-05, %v3279_v28  ;;  %v3280_v40 = vmax.f32 %v3272_v30, 0.0 }
 0x4cb   :  { %8770 = vrsqrt.f32 %v3287_v36  ;;  %v3288_v42 = vadd.f32 1e-05, %v3280_v40 }
 0x4cd   :  { %8772 = vrsqrt.f32 %v3288_v42 }
 0x4d8   :  { %v8771_v47 = vpop.eup %8770 }
 0x4d9   :  { %v3344_v48 = vmul.f32 %v8771_v47, %v3319_v44 }
 0x4da   :  { %v8773_v50 = vpop.eup %8772 }
 0x4db   :  { %v3434_v52 = vrot.slane %v3344_v48, %v9027_v60  ;;  %v9257_v53 = vmul.f32 %v8773_v50, %v3323_v15  ;;  %v9259_v54 = vmul.f32 %v3344_v48, %v3247_v17 }
 0x4dd   :  { %v9261_v33 = vmul.f32 %v3434_v52, %v3135_v45  ;;  %v9264_v34 = vmul.f32 %v9257_v53, %v3248_v22 }
 0x4df   :  { %v3366_v35 = vcombine.low %v9259_v54, %v9264_v34  ;;  %v3426_v54 = vrot.slane %v9217_v16, %v9027_v60  ;;  %v3430_v34 = vrot.slane %v9219_v49, %v9027_v60 }
 0x4ed   :  { %v3065_v45 = vpop.f32.mrf.mxu0 }
 0x4ee   :  { %v3066_v2 = vadd.f32 %v3065_v45, %v1492_v56  ;;  %v3106_v32 = vpop.f32.mrf.mxu1 }
 0x4ef   :  { %v3067_v63 = vpop.f32.mrf.mxu0 }
 0x4f0   :  { %v3107_v4 = vadd.f32 %v3106_v32, %v3066_v2  ;;  %v3068_v5 = vadd.f32 %v3067_v63, %v1496_v1  ;;  %v3108_v6 = vpop.f32.mrf.mxu1 }
 0x4f1   :  { %v3069_v8 = vpop.f32.mrf.mxu0 }
 0x4f2   :  { %vm3121_vm14 = vcmp.gt.f32.partialorder %v3107_v4, 0.0  ;;  %v3129_v10 = vmul.f32 0.2, %v3107_v4  ;;  %v3109_v11 = vadd.f32 %v3108_v6, %v3068_v5  ;;  %v3110_v12 = vpop.f32.mrf.mxu1 }
 0x4f3   :  { %v3070_v58 = vpop.f32.mrf.mxu0 }
 0x4f4   :  { %v3137_v13 = vsel %vm3121_vm14, %v3107_v4, %v3129_v10  ;;  %vm3122_vm15 = vcmp.gt.f32.partialorder %v3109_v11, 0.0  ;;  %v3130_v17 = vmul.f32 0.2, %v3109_v11  ;;  %v3111_v57 = vpop.f32.mrf.mxu1 }
 0x4f5   :  { %v3175_v61 = vrot.slane %v3137_v13, 4  ;;  %v3193_v18 = vmul.f32 %v3137_v13, %v3137_v13 }
 0x4f6   :  { %v9278_v25 = vsel %vm3122_vm15, %v3109_v11, %v3130_v17 }
 0x4f7   :  { %v3176_v19 = vadd.f32 %v3175_v61, %v3137_v13  ;;  %v3231_v20 = vrot.slane %v3193_v18, 4  ;;  %v3181_v22 = vrot.slane %v9278_v25, 4  ;;  %v3194_v23 = vmul.f32 %v9278_v25, %v9278_v25 }
 0x4f9   :  { %v3177_v26 = vrot.slane %v3176_v19, 2  ;;  %v3232_v27 = vadd.f32 %v3231_v20, %v3193_v18  ;;  %v3182_v28 = vadd.f32 %v3181_v22, %v9278_v25  ;;  %v3237_v30 = vrot.slane %v3194_v23, 4 }
 0x4fa   :  { %v3327_v20 = vrot.slane %v9171_v24, %v9269_v39  ;;  %v3331_v22 = vrot.slane %v9171_v24, %v9272_v55  ;;  %v3418_v24 = vrot.slane %v9177_v29, %v9027_v60  ;;  %v3114_v29 = vld [vmem:[#allocation11 + $0x25] sm:$0xff] }
 0x4fb   :  { %v3178_v36 = vadd.f32 %v3177_v26, %v3176_v19  ;;  %v3233_v40 = vrot.slane %v3232_v27, 2  ;;  %v3183_v42 = vrot.slane %v3182_v28, 2  ;;  %v3238_v44 = vadd.f32 %v3237_v30, %v3194_v23 }
 0x4fd   :  { %v3179_v15 = vrot.slane %v3178_v36, 1  ;;  %v3234_v47 = vadd.f32 %v3233_v40, %v3232_v27  ;;  %v3184_v48 = vadd.f32 %v3183_v42, %v3182_v28  ;;  %v3239_v50 = vrot.slane %v3238_v44, 2 }
 0x4ff   :  { %v3180_v52 = vadd.f32 %v3179_v15, %v3178_v36  ;;  %v3235_v56 = vrot.slane %v3234_v47, 1  ;;  %v3185_v1 = vrot.slane %v3184_v48, 1  ;;  %v3240_v45 = vadd.f32 %v3239_v50, %v3238_v44 }
 0x500   :  { %v3388_v15 = vrot.slane %v3366_v35, %v9045_v9  ;;  %v3422_v50 = vrot.slane %v9179_v31, %v9027_v60  ;;  %v3438_v35 = vrot.slane %v9257_v53, %v9027_v60 }
 0x501   :  { %v3236_v2 = vadd.f32 %v3235_v56, %v3234_v47  ;;  %v3249_v32 = vmul.f32 0.125, %v3180_v52  ;;  %v3186_v63 = vadd.f32 %v3185_v1, %v3184_v48  ;;  %v3241_v4 = vrot.slane %v3240_v45, 1 }
 0x502   :  { %v3447_v1 = vmul.f32 %v3418_v24, %v9159_v46  ;;  %v3448_v38 = vmul.f32 %v3422_v50, %v9164_v14  ;;  %v3452_v16 = vmul.f32 %v3438_v35, %v9246_v51  ;;  %v8236_v24 = vld [vmem:[#allocation10 + $0x774] ss:$28 sps:$4 sm:$0xff]  }
 0x503   :  { %v3257_v5 = vmul.f32 0.125, %v3236_v2  ;;  %v3265_v6 = vmul.f32 %v3249_v32, %v3249_v32  ;;  %v3242_v8 = vadd.f32 %v3241_v4, %v3240_v45  ;;  %v3250_v10 = vmul.f32 0.125, %v3186_v63  ;;  %v8239_v50 = vld [vmem:[#allocation10 + $0xaf4] ss:$28 sps:$4 sm:$0xff]  }
 0x504   :  { %v8240_v35 = vld [vmem:[#allocation10 + $0x738] ss:$28 sps:$4 sm:$0xff]  }
 0x505   :  { %v3273_v11 = vsub.f32 %v3257_v5, %v3265_v6  ;;  %v3258_v12 = vmul.f32 0.125, %v3242_v8  ;;  %v3266_v58 = vmul.f32 %v3250_v10, %v3250_v10 }
 0x507   :  { %v3281_v17 = vmax.f32 %v3273_v11, 0.0  ;;  %v3274_v57 = vsub.f32 %v3258_v12, %v3266_v58  ;;  %v8207_v58 = vld [vmem:[#allocation10 + $0xc08] ss:$28 sps:$4 sm:$0xff]  }
 0x509   :  { %v3289_v61 = vadd.f32 1e-05, %v3281_v17  ;;  %v3282_v18 = vmax.f32 %v3274_v57, 0.0 }
 0x50b   :  { %8774 = vrsqrt.f32 %v3289_v61  ;;  %v3290_v19 = vadd.f32 1e-05, %v3282_v18  ;;  %v8212_v61 = vld [vmem:[#allocation10 + $0x854] ss:$28 sps:$4 sm:$0xff]  }
 0x50c   :  { %v8215_v18 = vld [vmem:[#allocation10 + $0xbd4] ss:$28 sps:$4 sm:$0xff]  }
 0x50d   :  { %8776 = vrsqrt.f32 %v3290_v19 }
 0x518   :  { %v8775_v23 = vpop.eup %8774 }
 0x519   :  { %v3346_v26 = vmul.f32 %v8775_v23, %v3327_v20  ;;  %v8210_v20 = vld [vmem:[#allocation10 + $0x850] ss:$28 sps:$4 sm:$0xff]   ;;  %v8218_v23 = vld [vmem:[#allocation10 + $0x81c] ss:$28 sps:$4 sm:$0xff]  }
 0x51a   :  { %v8777_v27 = vpop.eup %8776 }
 0x51b   :  { %v3442_v28 = vrot.slane %v3346_v26, %v9027_v60  ;;  %v3347_v30 = vmul.f32 %v8777_v27, %v3331_v22  ;;  %v3354_v36 = vmul.f32 %v3346_v26, %v3249_v32  ;;  %v8213_v22 = vld [vmem:[#allocation10 + $0xbd0] ss:$28 sps:$4 sm:$0xff]   ;;  %v8221_v26 = vld [vmem:[#allocation10 + $0xb9c] ss:$28 sps:$4 sm:$0xff]  }
 0x51c   :  { %v8216_v27 = vld [vmem:[#allocation10 + $0x818] ss:$28 sps:$4 sm:$0xff]  }
 0x51d   :  { %v3453_v40 = vmul.f32 %v3442_v28, %v3137_v13  ;;  %v3355_v42 = vmul.f32 %v3347_v30, %v3250_v10  ;;  %v3404_v13 = vrot.slane %v3396_v59, %v9045_v9  ;;  %v3446_v56 = vrot.slane %v3347_v30, %v9027_v60  ;;  %v8219_v28 = vld [vmem:[#allocation10 + $0xb98] ss:$28 sps:$4 sm:$0xff]   ;;  %v8224_v30 = vld [vmem:[#allocation10 + $0x7e4] ss:$28 sps:$4 sm:$0xff]  }
 0x51e   :  { %v3450_v59 = vmul.f32 %v3430_v34, %v9198_v0  ;;  %v8245_v34 = vld [vmem:[#allocation10 + $0xabc] ss:$28 sps:$4 sm:$0xff]  }
 0x51f   :  { %v3367_v44 = vcombine.low %v3354_v36, %v3355_v42  ;;  %v3454_v49 = vmul.f32 %v3446_v56, %v9278_v25  ;;  %v8227_v36 = vld [vmem:[#allocation10 + $0xb64] ss:$28 sps:$4 sm:$0xff]  }
 0x520   :  { %v8225_v42 = vld [vmem:[#allocation10 + $0xb60] ss:$28 sps:$4 sm:$0xff]  }
 0x521   :  { %v3395_v47 = vrot.slane %v3367_v44, %v9045_v9  ;;  %v8230_v44 = vld [vmem:[#allocation10 + $0x7ac] ss:$28 sps:$4 sm:$0xff]   ;;  %v8248_v56 = vld [vmem:[#allocation10 + $0x704] ss:$28 sps:$4 sm:$0xff]  }
 0x523   :  { %v3397_v48 = vcombine.low %v3388_v15, %v3395_v47  ;;  %v8233_v15 = vld [vmem:[#allocation10 + $0xb2c] ss:$28 sps:$4 sm:$0xff]  }
 0x524   :  { %v8228_v47 = vld [vmem:[#allocation10 + $0x7a8] ss:$28 sps:$4 sm:$0xff]  }
 0x525   :  { %v3411_v52 = vrot.slane %v3397_v48, %v9045_v9  ;;  %v3449_v9 = vmul.f32 %v3426_v54, %v9193_v37  ;;  %v8231_v48 = vld [vmem:[#allocation10 + $0xb28] ss:$28 sps:$4 sm:$0xff]   ;;  %v8242_v54 = vld [vmem:[#allocation10 + $0x73c] ss:$28 sps:$4 sm:$0xff]  }
 0x527   :  { %v3412_v31 = vcombine.low %v3404_v13, %v3411_v52  ;;  %v8234_v13 = vld [vmem:[#allocation10 + $0x770] ss:$28 sps:$4 sm:$0xff]  }
 0x528   :  { %v8237_v52 = vld [vmem:[#allocation10 + $0xaf0] ss:$28 sps:$4 sm:$0xff]  }
 0x529   :  { %v3414_v21 = vsub.f32 %v3114_v29, %v3412_v31  ;;  %v8243_v29 = vld [vmem:[#allocation10 + $0xab8] ss:$28 sps:$4 sm:$0xff]   ;;  %v8251_v31 = vld [vmem:[#allocation10 + $0xa84] ss:$28 sps:$4 sm:$0xff]  }
 0x52b   :  { %v3463_v45 = vrot.slane %v3414_v21, %v9032_v7  ;;  %v3471_v53 = vrot.slane %v3414_v21, %v9074_v43  ;;  %v3459_v2 = vrot.slane %v3414_v21, %v9027_v60  ;;  %v3467_v32 = vrot.slane %v3414_v21, %v9071_v41 }
 0x52c   :  { %v3479_v46 = vrot.slane %v3414_v21, %v9240_v3  ;;  %v3487_v14 = vrot.slane %v3414_v21, %v9272_v55  ;;  %v3475_v37 = vrot.slane %v3414_v21, %v9237_v62  ;;  %v3483_v0 = vrot.slane %v3414_v21, %v9269_v39  ;;  %v8204_v55 = vld [vmem:[#allocation10 + $0x888] ss:$28 sps:$4 sm:$0xff]  }
 0x52d   :  { %v3497_v63 = vadd.f32 %v3463_v45, %v3448_v38  ;;  %v3499_v51 = vadd.f32 %v3471_v53, %v3450_v59  ;;  %v3496_v4 = vadd.f32 %v3459_v2, %v3447_v1  ;;  %v3498_v25 = vadd.f32 %v3467_v32, %v3449_v9  ;;  %v8246_v1 = vld [vmem:[#allocation10 + $0x700] ss:$28 sps:$4 sm:$0xff]   ;;  %v8254_v21 = vld [vmem:[#allocation10 + $0xa4c] ss:$28 sps:$4 sm:$0xff]   ;;  %v8263_v45 = vld [vmem:[#allocation10 + $0xd94] ss:$28 sps:$4 sm:$0xff]  }
 0x52e   :  { %v3501_v5 = vadd.f32 %v3479_v46, %v3452_v16  ;;  %v3503_v6 = vadd.f32 %v3487_v14, %v3454_v49  ;;  %v9325_v8 = vadd.f32 %v3475_v37, %v9261_v33  ;;  %v9327_v10 = vadd.f32 %v3483_v0, %v3453_v40  ;;  %v8222_v40 = vld [vmem:[#allocation10 + $0x7e0] ss:$28 sps:$4 sm:$0xff]   ;;  %v8257_v9 = vld [vmem:[#allocation10 + $0xdcc] ss:$28 sps:$4 sm:$0xff]   ;;  %v8260_v49 = vld [vmem:[#allocation10 + $0xa14] ss:$28 sps:$4 sm:$0xff]  }
 0x52f   :  { %v9329_v11 = vpack.c.bf16 %v3497_v63, %v3497_v63  ;;  %v9331_v12 = vpack.c.bf16 %v3499_v51, %v3499_v51  ;;  %v9333_v17 = vpack.c.bf16 %v3496_v4, %v3496_v4  ;;  %v9335_v57 = vpack.c.bf16 %v3498_v25, %v3498_v25  ;;  %v8249_v38 = vld [vmem:[#allocation10 + $0xa80] ss:$28 sps:$4 sm:$0xff]   ;;  %v8252_v59 = vld [vmem:[#allocation10 + $0xa48] ss:$28 sps:$4 sm:$0xff]   ;;  %v8258_v53 = vld [vmem:[#allocation10 + $0xa10] ss:$28 sps:$4 sm:$0xff]  }
 0x530   :  { %v9341_v33 = vpack.c.bf16 %v3501_v5, %v3501_v5  ;;  %v9343_v19 = vpack.c.bf16 %v3503_v6, %v3503_v6  ;;  %v8255_v16 = vld [vmem:[#allocation10 + $0xdc8] ss:$28 sps:$4 sm:$0xff]   ;;  %v8261_v2 = vld [vmem:[#allocation10 + $0xd90] ss:$28 sps:$4 sm:$0xff]   ;;  %v8266_v32 = vld [vmem:[#allocation10 + $0x9dc] ss:$28 sps:$4 sm:$0xff]  }
 0x531   :  { %6397 = vmatprep.mubr.bf16.mxu0 %v9329_v11  ;;  %6438 = vmatprep.mubr.bf16.mxu1 %v9331_v12  ;;  %v8269_v46 = vld [vmem:[#allocation10 + $0xd5c] ss:$28 sps:$4 sm:$0xff]   ;;  %v8272_v0 = vld [vmem:[#allocation10 + $0x9a4] ss:$28 sps:$4 sm:$0xff]   ;;  %v8278_v25 = vld [vmem:[#allocation10 + $0x96c] ss:$28 sps:$4 sm:$0xff]  }
 0x532   :  { %6398 = vmatmul.mubr.bf16.vlgmr.msra.gmra.mxu0 %v9333_v17  ;;  %6439 = vmatmul.mubr.bf16.vlgmr.msra.gmra.mxu1 %v9335_v57  ;;  %v8264_v14 = vld [vmem:[#allocation10 + $0x9d8] ss:$28 sps:$4 sm:$0xff]   ;;  %v8275_v63 = vld [vmem:[#allocation10 + $0xd24] ss:$28 sps:$4 sm:$0xff]   ;;  %v8281_v5 = vld [vmem:[#allocation10 + $0xcec] ss:$28 sps:$4 sm:$0xff]  }
 0x533   :  { %6448 = vmatpush1.bf16.msra.mxu0 %v8204_v55  ;;  %6489 = vmatpush1.bf16.msra.mxu1 %v8207_v58  ;;  %v8267_v37 = vld [vmem:[#allocation10 + $0xd58] ss:$28 sps:$4 sm:$0xff]   ;;  %v8270_v51 = vld [vmem:[#allocation10 + $0x9a0] ss:$28 sps:$4 sm:$0xff]   ;;  %v8276_v6 = vld [vmem:[#allocation10 + $0x968] ss:$28 sps:$4 sm:$0xff]  }
 0x534   :  { %6479 = vmatprep.mubr.bf16.mxu0 %v9341_v33  ;;  %6520 = vmatprep.mubr.bf16.mxu1 %v9343_v19  ;;  %v8273_v4 = vld [vmem:[#allocation10 + $0xd20] ss:$28 sps:$4 sm:$0xff]   ;;  %v8279_v55 = vld [vmem:[#allocation10 + $0xce8] ss:$28 sps:$4 sm:$0xff]   ;;  %v8284_v58 = vld [vmem:[#allocation10 + $0x934] ss:$28 sps:$4 sm:$0xff]  }
 0x535   :  { %6449 = vmatprep.subr.bf16.mxu0 %v8212_v61  ;;  %6490 = vmatprep.subr.bf16.mxu1 %v8215_v18  ;;  %v8287_v61 = vld [vmem:[#allocation10 + $0xcb4] ss:$28 sps:$4 sm:$0xff]  }
 0x536   :  { %v8282_v18 = vld [vmem:[#allocation10 + $0x930] ss:$28 sps:$4 sm:$0xff]  }
 0x537   :  { %6450 = vmatpush1.bf16.msra.mxu0 %v8210_v20  ;;  %6491 = vmatpush1.bf16.msra.mxu1 %v8213_v22  ;;  %v8285_v20 = vld [vmem:[#allocation10 + $0xcb0] ss:$28 sps:$4 sm:$0xff]   ;;  %v8290_v22 = vld [vmem:[#allocation10 + $0x8fc] ss:$28 sps:$4 sm:$0xff]  }
 0x538   :  { %6451 = vmatprep.subr.bf16.mxu0 %v8218_v23  ;;  %6492 = vmatprep.subr.bf16.mxu1 %v8221_v26  ;;  %v8293_v23 = vld [vmem:[#allocation10 + $0xc7c] ss:$28 sps:$4 sm:$0xff]  }
 0x539   :  { %v8288_v26 = vld [vmem:[#allocation10 + $0x8f8] ss:$28 sps:$4 sm:$0xff]  }
 0x53b   :  { %6452 = vmatpush1.bf16.msra.mxu0 %v8216_v27  ;;  %6493 = vmatpush1.bf16.msra.mxu1 %v8219_v28  ;;  %v8291_v27 = vld [vmem:[#allocation10 + $0xc78] ss:$28 sps:$4 sm:$0xff]   ;;  %v8296_v28 = vld [vmem:[#allocation10 + $0x8c4] ss:$28 sps:$4 sm:$0xff]  }
 0x53c   :  { %6453 = vmatprep.subr.bf16.mxu0 %v8224_v30  ;;  %6494 = vmatprep.subr.bf16.mxu1 %v8227_v36  ;;  %v8299_v30 = vld [vmem:[#allocation10 + $0xc44] ss:$28 sps:$4 sm:$0xff]  }
 0x53d   :  { %v8294_v36 = vld [vmem:[#allocation10 + $0x8c0] ss:$28 sps:$4 sm:$0xff]  }
 0x53f   :  { %6454 = vmatpush1.bf16.msra.mxu0 %v8222_v40  ;;  %6495 = vmatpush1.bf16.msra.mxu1 %v8225_v42  ;;  %v8297_v40 = vld [vmem:[#allocation10 + $0xc40] ss:$28 sps:$4 sm:$0xff]   ;;  %v8302_v42 = vld [vmem:[#allocation10 + $0x194] ss:$28 sps:$4 sm:$0xff]  }
 0x540   :  { %6455 = vmatprep.subr.bf16.mxu0 %v8230_v44  ;;  %6496 = vmatprep.subr.bf16.mxu1 %v8233_v15  ;;  %v8305_v44 = vld [vmem:[#allocation10 + $0x514] ss:$28 sps:$4 sm:$0xff]  }
 0x541   :  { %v8300_v15 = vld [vmem:[#allocation10 + $0x190] ss:$28 sps:$4 sm:$0xff]  }
 0x543   :  { %6456 = vmatpush1.bf16.msra.mxu0 %v8228_v47  ;;  %6497 = vmatpush1.bf16.msra.mxu1 %v8231_v48  ;;  %v9349_v47 = vpack.c.bf16 %v9325_v8, %v9325_v8  ;;  %v9353_v48 = vpack.c.bf16 %v9327_v10, %v9327_v10  ;;  %v8309_v8 = vld [vmem:[#allocation10 + $0x4d8] ss:$28 sps:$4 sm:$0xff]   ;;  %v8317_v10 = vld [vmem:[#allocation10 + $0x4a4] ss:$28 sps:$4 sm:$0xff]  }
 0x544   :  { %6457 = vmatprep.subr.bf16.mxu0 %v8236_v24  ;;  %6498 = vmatprep.subr.bf16.mxu1 %v8239_v50  ;;  %v8303_v24 = vld [vmem:[#allocation10 + $0x510] ss:$28 sps:$4 sm:$0xff]   ;;  %v8308_v50 = vld [vmem:[#allocation10 + $0x15c] ss:$28 sps:$4 sm:$0xff]  }
 0x547   :  { %6458 = vmatpush1.bf16.msra.mxu0 %v8234_v13  ;;  %6499 = vmatpush1.bf16.msra.mxu1 %v8237_v52  ;;  %v8311_v13 = vld [vmem:[#allocation10 + $0x4dc] ss:$28 sps:$4 sm:$0xff]  }
 0x548   :  { %6459 = vmatprep.subr.bf16.mxu0 %v8242_v54  ;;  %6500 = vmatprep.subr.bf16.mxu1 %v8245_v34  ;;  %v8306_v52 = vld [vmem:[#allocation10 + $0x158] ss:$28 sps:$4 sm:$0xff]   ;;  %v8314_v54 = vld [vmem:[#allocation10 + $0x124] ss:$28 sps:$4 sm:$0xff]  }
 0x549   :  { %v8312_v34 = vld [vmem:[#allocation10 + $0x120] ss:$28 sps:$4 sm:$0xff]  }
 0x54b   :  { %6460 = vmatpush1.bf16.msra.mxu0 %v8240_v35  ;;  %6501 = vmatpush1.bf16.msra.mxu1 %v8243_v29  ;;  %v8315_v35 = vld [vmem:[#allocation10 + $0x4a0] ss:$28 sps:$4 sm:$0xff]   ;;  %v8320_v29 = vld [vmem:[#allocation10 + $0xec] ss:$28 sps:$4 sm:$0xff]  }
 0x54c   :  { %6461 = vmatprep.subr.bf16.mxu0 %v8248_v56  ;;  %6502 = vmatprep.subr.bf16.mxu1 %v8251_v31  ;;  %v8323_v56 = vld [vmem:[#allocation10 + $0x46c] ss:$28 sps:$4 sm:$0xff]  }
 0x54d   :  { %v8318_v31 = vld [vmem:[#allocation10 + $0xe8] ss:$28 sps:$4 sm:$0xff]  }
 0x54f   :  { %6462 = vmatpush1.bf16.msra.mxu0 %v8246_v1  ;;  %6503 = vmatpush1.bf16.msra.mxu1 %v8249_v38  ;;  %v8321_v1 = vld [vmem:[#allocation10 + $0x468] ss:$28 sps:$4 sm:$0xff]   ;;  %v8326_v38 = vld [vmem:[#allocation10 + $0xb4] ss:$28 sps:$4 sm:$0xff]  }
 0x550   :  { %6463 = vmatprep.subr.bf16.mxu0 %v8254_v21  ;;  %6504 = vmatprep.subr.bf16.mxu1 %v8257_v9  ;;  %v8329_v21 = vld [vmem:[#allocation10 + $0x434] ss:$28 sps:$4 sm:$0xff]  }
 0x551   :  { %v8324_v9 = vld [vmem:[#allocation10 + $0xb0] ss:$28 sps:$4 sm:$0xff]  }
 0x553   :  { %6464 = vmatpush2.bf16.msra.mxu0 %v8252_v59  ;;  %6505 = vmatpush2.bf16.msra.mxu1 %v8255_v16  ;;  %v8327_v59 = vld [vmem:[#allocation10 + $0x430] ss:$28 sps:$4 sm:$0xff]   ;;  %v8332_v16 = vld [vmem:[#allocation10 + $0x7c] ss:$28 sps:$4 sm:$0xff]  }
 0x554   :  { %6465 = vmatprep.subr.bf16.mxu0 %v8260_v49  ;;  %6506 = vmatprep.subr.bf16.mxu1 %v8263_v45  ;;  %v8335_v49 = vld [vmem:[#allocation10 + $0x3fc] ss:$28 sps:$4 sm:$0xff]  }
 0x555   :  { %v8330_v45 = vld [vmem:[#allocation10 + $0x78] ss:$28 sps:$4 sm:$0xff]  }
 0x557   :  { %6466 = vmatpush2.bf16.msra.mxu0 %v8258_v53  ;;  %6507 = vmatpush2.bf16.msra.mxu1 %v8261_v2  ;;  %v8333_v53 = vld [vmem:[#allocation10 + $0x3f8] ss:$28 sps:$4 sm:$0xff]   ;;  %v8338_v2 = vld [vmem:[#allocation10 + $0x44] ss:$28 sps:$4 sm:$0xff]  }
 0x558   :  { %6467 = vmatprep.subr.bf16.mxu0 %v8266_v32  ;;  %6508 = vmatprep.subr.bf16.mxu1 %v8269_v46  ;;  %v8341_v32 = vld [vmem:[#allocation10 + $0x3c4] ss:$28 sps:$4 sm:$0xff]  }
 0x559   :  { %v8336_v46 = vld [vmem:[#allocation10 + $0x40] ss:$28 sps:$4 sm:$0xff]  }
 0x55b   :  { %6468 = vmatpush2.bf16.msra.mxu0 %v8264_v14  ;;  %6509 = vmatpush2.bf16.msra.mxu1 %v8267_v37  ;;  %v8339_v14 = vld [vmem:[#allocation10 + $0x3c0] ss:$28 sps:$4 sm:$0xff]   ;;  %v8344_v37 = vld [vmem:[#allocation10 + $0xc] ss:$28 sps:$4 sm:$0xff]  }
 0x55c   :  { %6469 = vmatprep.subr.bf16.mxu0 %v8272_v0  ;;  %6510 = vmatprep.subr.bf16.mxu1 %v8275_v63  ;;  %v8347_v0 = vld [vmem:[#allocation10 + $0x38c] ss:$28 sps:$4 sm:$0xff]  }
 0x55d   :  { %v8342_v63 = vld [vmem:[#allocation10 + $0x8] ss:$28 sps:$4 sm:$0xff]  }
 0x55f   :  { %6470 = vmatpush2.bf16.msra.mxu0 %v8270_v51  ;;  %6511 = vmatpush2.bf16.msra.mxu1 %v8273_v4  ;;  %v8345_v51 = vld [vmem:[#allocation10 + $0x388] ss:$28 sps:$4 sm:$0xff]   ;;  %v8350_v4 = vld [vmem:[#allocation10 + $0x354] ss:$28 sps:$4 sm:$0xff]  }
 0x560   :  { %6471 = vmatprep.subr.bf16.mxu0 %v8278_v25  ;;  %6512 = vmatprep.subr.bf16.mxu1 %v8281_v5  ;;  %v8353_v25 = vld [vmem:[#allocation10 + $0x6d4] ss:$28 sps:$4 sm:$0xff]  }
 0x561   :  { %v8348_v5 = vld [vmem:[#allocation10 + $0x350] ss:$28 sps:$4 sm:$0xff]  }
 0x563   :  { %6472 = vmatpush2.bf16.msra.mxu0 %v8276_v6  ;;  %6513 = vmatpush2.bf16.msra.mxu1 %v8279_v55  ;;  %v8351_v6 = vld [vmem:[#allocation10 + $0x6d0] ss:$28 sps:$4 sm:$0xff]   ;;  %v8356_v55 = vld [vmem:[#allocation10 + $0x31c] ss:$28 sps:$4 sm:$0xff]  }
 0x564   :  { %6473 = vmatprep.subr.bf16.mxu0 %v8284_v58  ;;  %6514 = vmatprep.subr.bf16.mxu1 %v8287_v61  ;;  %v8359_v58 = vld [vmem:[#allocation10 + $0x69c] ss:$28 sps:$4 sm:$0xff]  }
 0x565   :  { %v8354_v61 = vld [vmem:[#allocation10 + $0x318] ss:$28 sps:$4 sm:$0xff]  }
 0x567   :  { %6474 = vmatpush2.bf16.msra.mxu0 %v8282_v18  ;;  %6515 = vmatpush2.bf16.msra.mxu1 %v8285_v20  ;;  %v8357_v18 = vld [vmem:[#allocation10 + $0x698] ss:$28 sps:$4 sm:$0xff]   ;;  %v8362_v20 = vld [vmem:[#allocation10 + $0x2e4] ss:$28 sps:$4 sm:$0xff]  }
 0x568   :  { %6475 = vmatprep.subr.bf16.mxu0 %v8290_v22  ;;  %6516 = vmatprep.subr.bf16.mxu1 %v8293_v23  ;;  %v8365_v22 = vld [vmem:[#allocation10 + $0x664] ss:$28 sps:$4 sm:$0xff]  }
 0x569   :  { %v8360_v23 = vld [vmem:[#allocation10 + $0x2e0] ss:$28 sps:$4 sm:$0xff]  }
 0x56b   :  { %6476 = vmatpush2.bf16.msra.mxu0 %v8288_v26  ;;  %6517 = vmatpush2.bf16.msra.mxu1 %v8291_v27  ;;  %v8363_v26 = vld [vmem:[#allocation10 + $0x660] ss:$28 sps:$4 sm:$0xff]   ;;  %v8368_v27 = vld [vmem:[#allocation10 + $0x2ac] ss:$28 sps:$4 sm:$0xff]  }
 0x56c   :  { %6477 = vmatprep.subr.bf16.mxu0 %v8296_v28  ;;  %6518 = vmatprep.subr.bf16.mxu1 %v8299_v30  ;;  %v8371_v28 = vld [vmem:[#allocation10 + $0x62c] ss:$28 sps:$4 sm:$0xff]  }
 0x56d   :  { %v8366_v30 = vld [vmem:[#allocation10 + $0x2a8] ss:$28 sps:$4 sm:$0xff]  }
 0x56f   :  { %6478 = vmatpush2.bf16.msra.mxu0 %v8294_v36  ;;  %6519 = vmatpush2.bf16.msra.mxu1 %v8297_v40  ;;  %v8369_v36 = vld [vmem:[#allocation10 + $0x628] ss:$28 sps:$4 sm:$0xff]   ;;  %v8374_v40 = vld [vmem:[#allocation10 + $0x274] ss:$28 sps:$4 sm:$0xff]  }
 0x570   :  { %6529 = vmatprep.subr.bf16.mxu0 %v8302_v42  ;;  %6570 = vmatprep.subr.bf16.mxu1 %v8305_v44  ;;  %v8377_v42 = vld [vmem:[#allocation10 + $0x5f4] ss:$28 sps:$4 sm:$0xff]  }
 0x571   :  { %v8372_v44 = vld [vmem:[#allocation10 + $0x270] ss:$28 sps:$4 sm:$0xff]  }
 0x572   :  { %6480 = vmatmul.mubr.bf16.vlgmr.msra.gmra.mxu0 %v9349_v47  ;;  %6521 = vmatmul.mubr.bf16.vlgmr.msra.gmra.mxu1 %v9353_v48 }
 0x573   :  { %6530 = vmatpush1.bf16.msra.mxu0 %v8300_v15  ;;  %6561 = vmatprep.mubr.bf16.mxu0 %v9329_v11  ;;  %v8375_v15 = vld [vmem:[#allocation10 + $0x5f0] ss:$28 sps:$4 sm:$0xff]  }
 0x574   :  { %6571 = vmatpush1.bf16.msra.mxu1 %v8303_v24  ;;  %6602 = vmatprep.mubr.bf16.mxu1 %v9331_v12  ;;  %v8380_v24 = vld [vmem:[#allocation10 + $0x23c] ss:$28 sps:$4 sm:$0xff]  }
 0x575   :  { %6531 = vmatprep.subr.bf16.mxu0 %v8308_v50  ;;  %6572 = vmatprep.subr.bf16.mxu1 %v8311_v13  ;;  %v8383_v50 = vld [vmem:[#allocation10 + $0x5bc] ss:$28 sps:$4 sm:$0xff]  }
 0x576   :  { %v8378_v13 = vld [vmem:[#allocation10 + $0x238] ss:$28 sps:$4 sm:$0xff]  }
 0x577   :  { %6532 = vmatpush1.bf16.msra.mxu0 %v8306_v52  ;;  %v8381_v52 = vld [vmem:[#allocation10 + $0x5b8] ss:$28 sps:$4 sm:$0xff]  }
 0x578   :  { %6573 = vmatpush1.bf16.msra.mxu1 %v8309_v8  ;;  %6533 = vmatprep.subr.bf16.mxu0 %v8314_v54  ;;  %v8386_v8 = vld [vmem:[#allocation10 + $0x204] ss:$28 sps:$4 sm:$0xff]  }
 0x579   :  { %6574 = vmatprep.subr.bf16.mxu1 %v8317_v10  ;;  %v8389_v54 = vld [vmem:[#allocation10 + $0x584] ss:$28 sps:$4 sm:$0xff]  }
 0x57a   :  { %v8384_v10 = vld [vmem:[#allocation10 + $0x200] ss:$28 sps:$4 sm:$0xff]  }
 0x57b   :  { %6534 = vmatpush1.bf16.msra.mxu0 %v8312_v34  ;;  %v8387_v34 = vld [vmem:[#allocation10 + $0x580] ss:$28 sps:$4 sm:$0xff]  }
 0x57c   :  { %6575 = vmatpush1.bf16.msra.mxu1 %v8315_v35  ;;  %6535 = vmatprep.subr.bf16.mxu0 %v8320_v29  ;;  %v8392_v35 = vld [vmem:[#allocation10 + $0x1cc] ss:$28 sps:$4 sm:$0xff]  }
 0x57d   :  { %6576 = vmatprep.subr.bf16.mxu1 %v8323_v56  ;;  %v8395_v29 = vld [vmem:[#allocation10 + $0x54c] ss:$28 sps:$4 sm:$0xff]  }
 0x57e   :  { %v8390_v56 = vld [vmem:[#allocation10 + $0x1c8] ss:$28 sps:$4 sm:$0xff]  }
 0x57f   :  { %6536 = vmatpush1.bf16.msra.mxu0 %v8318_v31  ;;  %v8393_v31 = vld [vmem:[#allocation10 + $0x548] ss:$28 sps:$4 sm:$0xff]  }
 0x580   :  { %6577 = vmatpush1.bf16.msra.mxu1 %v8321_v1  ;;  %6537 = vmatprep.subr.bf16.mxu0 %v8326_v38  ;;  %v8398_v1 = vld [vmem:[#allocation10 + $0x894] ss:$28 sps:$4 sm:$0xff]  }
 0x581   :  { %6578 = vmatprep.subr.bf16.mxu1 %v8329_v21  ;;  %v8401_v38 = vld [vmem:[#allocation10 + $0xc14] ss:$28 sps:$4 sm:$0xff]  }
 0x582   :  { %v8396_v21 = vld [vmem:[#allocation10 + $0x890] ss:$28 sps:$4 sm:$0xff]  }
 0x583   :  { %6538 = vmatpush1.bf16.msra.mxu0 %v8324_v9  ;;  %v8399_v9 = vld [vmem:[#allocation10 + $0xc10] ss:$28 sps:$4 sm:$0xff]  }
 0x584   :  { %6579 = vmatpush1.bf16.msra.mxu1 %v8327_v59  ;;  %6539 = vmatprep.subr.bf16.mxu0 %v8332_v16  ;;  %v8404_v59 = vld [vmem:[#allocation10 + $0x85c] ss:$28 sps:$4 sm:$0xff]  }
 0x585   :  { %6580 = vmatprep.subr.bf16.mxu1 %v8335_v49  ;;  %v8407_v16 = vld [vmem:[#allocation10 + $0xbdc] ss:$28 sps:$4 sm:$0xff]  }
 0x586   :  { %v8402_v49 = vld [vmem:[#allocation10 + $0x858] ss:$28 sps:$4 sm:$0xff]  }
 0x587   :  { %6540 = vmatpush1.bf16.msra.mxu0 %v8330_v45  ;;  %v8405_v45 = vld [vmem:[#allocation10 + $0xbd8] ss:$28 sps:$4 sm:$0xff]  }
 0x588   :  { %6581 = vmatpush1.bf16.msra.mxu1 %v8333_v53  ;;  %6541 = vmatprep.subr.bf16.mxu0 %v8338_v2  ;;  %v8410_v53 = vld [vmem:[#allocation10 + $0x824] ss:$28 sps:$4 sm:$0xff]  }
 0x589   :  { %6582 = vmatprep.subr.bf16.mxu1 %v8341_v32  ;;  %v8413_v2 = vld [vmem:[#allocation10 + $0xba4] ss:$28 sps:$4 sm:$0xff]  }
 0x58a   :  { %v8408_v32 = vld [vmem:[#allocation10 + $0x820] ss:$28 sps:$4 sm:$0xff]  }
 0x58b   :  { %6542 = vmatpush1.bf16.msra.mxu0 %v8336_v46  ;;  %v8411_v46 = vld [vmem:[#allocation10 + $0xba0] ss:$28 sps:$4 sm:$0xff]  }
 0x58c   :  { %6583 = vmatpush1.bf16.msra.mxu1 %v8339_v14  ;;  %6543 = vmatprep.subr.bf16.mxu0 %v8344_v37  ;;  %v8416_v14 = vld [vmem:[#allocation10 + $0x7ec] ss:$28 sps:$4 sm:$0xff]  }
 0x58d   :  { %6584 = vmatprep.subr.bf16.mxu1 %v8347_v0  ;;  %v8419_v37 = vld [vmem:[#allocation10 + $0xb6c] ss:$28 sps:$4 sm:$0xff]  }
 0x58e   :  { %v8414_v0 = vld [vmem:[#allocation10 + $0x7e8] ss:$28 sps:$4 sm:$0xff]  }
 0x58f   :  { %6544 = vmatpush1.bf16.msra.mxu0 %v8342_v63  ;;  %v8417_v63 = vld [vmem:[#allocation10 + $0xb68] ss:$28 sps:$4 sm:$0xff]  }
 0x590   :  { %6585 = vmatpush1.bf16.msra.mxu1 %v8345_v51  ;;  %6545 = vmatprep.subr.bf16.mxu0 %v8350_v4  ;;  %v8422_v51 = vld [vmem:[#allocation10 + $0x7b4] ss:$28 sps:$4 sm:$0xff]  }
 0x591   :  { %6586 = vmatprep.subr.bf16.mxu1 %v8353_v25  ;;  %v8425_v4 = vld [vmem:[#allocation10 + $0xb34] ss:$28 sps:$4 sm:$0xff]  }
 0x592   :  { %v8420_v25 = vld [vmem:[#allocation10 + $0x7b0] ss:$28 sps:$4 sm:$0xff]  }
 0x593   :  { %6546 = vmatpush2.bf16.msra.mxu0 %v8348_v5  ;;  %v8423_v5 = vld [vmem:[#allocation10 + $0xb30] ss:$28 sps:$4 sm:$0xff]  }
 0x594   :  { %6587 = vmatpush2.bf16.msra.mxu1 %v8351_v6  ;;  %6547 = vmatprep.subr.bf16.mxu0 %v8356_v55  ;;  %v8428_v6 = vld [vmem:[#allocation10 + $0x77c] ss:$28 sps:$4 sm:$0xff]  }
 0x595   :  { %6588 = vmatprep.subr.bf16.mxu1 %v8359_v58  ;;  %v8431_v55 = vld [vmem:[#allocation10 + $0xafc] ss:$28 sps:$4 sm:$0xff]  }
 0x596   :  { %v8426_v58 = vld [vmem:[#allocation10 + $0x778] ss:$28 sps:$4 sm:$0xff]  }
 0x597   :  { %6548 = vmatpush2.bf16.msra.mxu0 %v8354_v61  ;;  %v8429_v61 = vld [vmem:[#allocation10 + $0xaf8] ss:$28 sps:$4 sm:$0xff]  }
 0x598   :  { %6589 = vmatpush2.bf16.msra.mxu1 %v8357_v18  ;;  %6549 = vmatprep.subr.bf16.mxu0 %v8362_v20  ;;  %v8434_v18 = vld [vmem:[#allocation10 + $0x744] ss:$28 sps:$4 sm:$0xff]  }
 0x599   :  { %6590 = vmatprep.subr.bf16.mxu1 %v8365_v22  ;;  %v8437_v20 = vld [vmem:[#allocation10 + $0xac4] ss:$28 sps:$4 sm:$0xff]  }
 0x59a   :  { %v8432_v22 = vld [vmem:[#allocation10 + $0x740] ss:$28 sps:$4 sm:$0xff]  }
 0x59b   :  { %6550 = vmatpush2.bf16.msra.mxu0 %v8360_v23  ;;  %v8435_v23 = vld [vmem:[#allocation10 + $0xac0] ss:$28 sps:$4 sm:$0xff]  }
 0x59c   :  { %6591 = vmatpush2.bf16.msra.mxu1 %v8363_v26  ;;  %6551 = vmatprep.subr.bf16.mxu0 %v8368_v27  ;;  %v8440_v26 = vld [vmem:[#allocation10 + $0x70c] ss:$28 sps:$4 sm:$0xff]  }
 0x59d   :  { %6592 = vmatprep.subr.bf16.mxu1 %v8371_v28  ;;  %v8443_v27 = vld [vmem:[#allocation10 + $0xa8c] ss:$28 sps:$4 sm:$0xff]  }
 0x59e   :  { %v8438_v28 = vld [vmem:[#allocation10 + $0x708] ss:$28 sps:$4 sm:$0xff]  }
 0x59f   :  { %6552 = vmatpush2.bf16.msra.mxu0 %v8366_v30  ;;  %v8441_v30 = vld [vmem:[#allocation10 + $0xa88] ss:$28 sps:$4 sm:$0xff]  }
 0x5a0   :  { %6593 = vmatpush2.bf16.msra.mxu1 %v8369_v36  ;;  %6553 = vmatprep.subr.bf16.mxu0 %v8374_v40  ;;  %v8446_v36 = vld [vmem:[#allocation10 + $0xa54] ss:$28 sps:$4 sm:$0xff]  }
 0x5a1   :  { %6594 = vmatprep.subr.bf16.mxu1 %v8377_v42  ;;  %v8449_v40 = vld [vmem:[#allocation10 + $0xdd4] ss:$28 sps:$4 sm:$0xff]  }
 0x5a2   :  { %v8444_v42 = vld [vmem:[#allocation10 + $0xa50] ss:$28 sps:$4 sm:$0xff]  }
 0x5a3   :  { %6554 = vmatpush2.bf16.msra.mxu0 %v8372_v44  ;;  %v8447_v44 = vld [vmem:[#allocation10 + $0xdd0] ss:$28 sps:$4 sm:$0xff]  }
 0x5a4   :  { %6595 = vmatpush2.bf16.msra.mxu1 %v8375_v15  ;;  %6555 = vmatprep.subr.bf16.mxu0 %v8380_v24  ;;  %v8452_v15 = vld [vmem:[#allocation10 + $0xa1c] ss:$28 sps:$4 sm:$0xff]  }
 0x5a5   :  { %6596 = vmatprep.subr.bf16.mxu1 %v8383_v50  ;;  %v8455_v24 = vld [vmem:[#allocation10 + $0xd9c] ss:$28 sps:$4 sm:$0xff]  }
 0x5a6   :  { %v8450_v50 = vld [vmem:[#allocation10 + $0xa18] ss:$28 sps:$4 sm:$0xff]  }
 0x5a7   :  { %6556 = vmatpush2.bf16.msra.mxu0 %v8378_v13  ;;  %v8453_v13 = vld [vmem:[#allocation10 + $0xd98] ss:$28 sps:$4 sm:$0xff]  }
 0x5a8   :  { %6597 = vmatpush2.bf16.msra.mxu1 %v8381_v52  ;;  %6557 = vmatprep.subr.bf16.mxu0 %v8386_v8  ;;  %v8458_v52 = vld [vmem:[#allocation10 + $0x9e4] ss:$28 sps:$4 sm:$0xff]  }
 0x5a9   :  { %6598 = vmatprep.subr.bf16.mxu1 %v8389_v54  ;;  %v8461_v8 = vld [vmem:[#allocation10 + $0xd64] ss:$28 sps:$4 sm:$0xff]  }
 0x5aa   :  { %v8456_v54 = vld [vmem:[#allocation10 + $0x9e0] ss:$28 sps:$4 sm:$0xff]  }
 0x5ab   :  { %6558 = vmatpush2.bf16.msra.mxu0 %v8384_v10  ;;  %v8459_v10 = vld [vmem:[#allocation10 + $0xd60] ss:$28 sps:$4 sm:$0xff]  }
 0x5ac   :  { %6599 = vmatpush2.bf16.msra.mxu1 %v8387_v34  ;;  %6559 = vmatprep.subr.bf16.mxu0 %v8392_v35  ;;  %v8464_v34 = vld [vmem:[#allocation10 + $0x9ac] ss:$28 sps:$4 sm:$0xff]  }
 0x5ad   :  { %6600 = vmatprep.subr.bf16.mxu1 %v8395_v29  ;;  %v8467_v35 = vld [vmem:[#allocation10 + $0xd2c] ss:$28 sps:$4 sm:$0xff]  }
 0x5ae   :  { %v8462_v29 = vld [vmem:[#allocation10 + $0x9a8] ss:$28 sps:$4 sm:$0xff]  }
 0x5af   :  { %6560 = vmatpush2.bf16.msra.mxu0 %v8390_v56  ;;  %v8465_v56 = vld [vmem:[#allocation10 + $0xd28] ss:$28 sps:$4 sm:$0xff]  }
 0x5b0   :  { %6601 = vmatpush2.bf16.msra.mxu1 %v8393_v31  ;;  %6611 = vmatprep.subr.bf16.mxu0 %v8398_v1  ;;  %v8470_v31 = vld [vmem:[#allocation10 + $0x974] ss:$28 sps:$4 sm:$0xff]  }
 0x5b1   :  { %6652 = vmatprep.subr.bf16.mxu1 %v8401_v38  ;;  %v8473_v1 = vld [vmem:[#allocation10 + $0xcf4] ss:$28 sps:$4 sm:$0xff]  }
 0x5b2   :  { %6562 = vmatmul.mubr.bf16.vlgmr.msra.gmra.mxu0 %v9333_v17  ;;  %v8468_v38 = vld [vmem:[#allocation10 + $0x970] ss:$28 sps:$4 sm:$0xff]  }
 0x5b3   :  { %6603 = vmatmul.mubr.bf16.vlgmr.msra.gmra.mxu1 %v9335_v57  ;;  %6612 = vmatpush1.bf16.msra.mxu0 %v8396_v21  ;;  %v8471_v21 = vld [vmem:[#allocation10 + $0xcf0] ss:$28 sps:$4 sm:$0xff]  }
 0x5b4   :  { %6643 = vmatprep.mubr.bf16.mxu0 %v9341_v33  ;;  %6653 = vmatpush1.bf16.msra.mxu1 %v8399_v9  ;;  %v8476_v9 = vld [vmem:[#allocation10 + $0x93c] ss:$28 sps:$4 sm:$0xff]  }
 0x5b5   :  { %6684 = vmatprep.mubr.bf16.mxu1 %v9343_v19  ;;  %6613 = vmatprep.subr.bf16.mxu0 %v8404_v59  ;;  %v8479_v59 = vld [vmem:[#allocation10 + $0xcbc] ss:$28 sps:$4 sm:$0xff]  }
 0x5b6   :  { %6654 = vmatprep.subr.bf16.mxu1 %v8407_v16  ;;  %v8474_v16 = vld [vmem:[#allocation10 + $0x938] ss:$28 sps:$4 sm:$0xff]  }
 0x5b7   :  { %6614 = vmatpush1.bf16.msra.mxu0 %v8402_v49  ;;  %v8477_v49 = vld [vmem:[#allocation10 + $0xcb8] ss:$28 sps:$4 sm:$0xff]  }
 0x5b8   :  { %6655 = vmatpush1.bf16.msra.mxu1 %v8405_v45  ;;  %6615 = vmatprep.subr.bf16.mxu0 %v8410_v53  ;;  %v8482_v45 = vld [vmem:[#allocation10 + $0x904] ss:$28 sps:$4 sm:$0xff]  }
 0x5b9   :  { %6656 = vmatprep.subr.bf16.mxu1 %v8413_v2  ;;  %v8485_v53 = vld [vmem:[#allocation10 + $0xc84] ss:$28 sps:$4 sm:$0xff]  }
 0x5ba   :  { %v8480_v2 = vld [vmem:[#allocation10 + $0x900] ss:$28 sps:$4 sm:$0xff]  }
 0x5bb   :  { %6616 = vmatpush1.bf16.msra.mxu0 %v8408_v32  ;;  %v8483_v32 = vld [vmem:[#allocation10 + $0xc80] ss:$28 sps:$4 sm:$0xff]  }
 0x5bc   :  { %6657 = vmatpush1.bf16.msra.mxu1 %v8411_v46  ;;  %6617 = vmatprep.subr.bf16.mxu0 %v8416_v14  ;;  %v8488_v46 = vld [vmem:[#allocation10 + $0x8cc] ss:$28 sps:$4 sm:$0xff]  }
 0x5bd   :  { %6658 = vmatprep.subr.bf16.mxu1 %v8419_v37  ;;  %v8491_v14 = vld [vmem:[#allocation10 + $0xc4c] ss:$28 sps:$4 sm:$0xff]  }
 0x5be   :  { %v8486_v37 = vld [vmem:[#allocation10 + $0x8c8] ss:$28 sps:$4 sm:$0xff]  }
 0x5bf   :  { %6618 = vmatpush1.bf16.msra.mxu0 %v8414_v0  ;;  %v8489_v0 = vld [vmem:[#allocation10 + $0xc48] ss:$28 sps:$4 sm:$0xff]  }
 0x5c0   :  { %6659 = vmatpush1.bf16.msra.mxu1 %v8417_v63  ;;  %6619 = vmatprep.subr.bf16.mxu0 %v8422_v51  ;;  %v8494_v63 = vld [vmem:[#allocation10 + $0x19c] ss:$28 sps:$4 sm:$0xff]  }
 0x5c1   :  { %6660 = vmatprep.subr.bf16.mxu1 %v8425_v4  ;;  %v8497_v51 = vld [vmem:[#allocation10 + $0x51c] ss:$28 sps:$4 sm:$0xff]  }
 0x5c2   :  { %v8492_v4 = vld [vmem:[#allocation10 + $0x198] ss:$28 sps:$4 sm:$0xff]  }
 0x5c3   :  { %6620 = vmatpush1.bf16.msra.mxu0 %v8420_v25  ;;  %v8495_v25 = vld [vmem:[#allocation10 + $0x518] ss:$28 sps:$4 sm:$0xff]  }
 0x5c4   :  { %6661 = vmatpush1.bf16.msra.mxu1 %v8423_v5  ;;  %6621 = vmatprep.subr.bf16.mxu0 %v8428_v6  ;;  %v8500_v5 = vld [vmem:[#allocation10 + $0x164] ss:$28 sps:$4 sm:$0xff]  }
 0x5c5   :  { %6662 = vmatprep.subr.bf16.mxu1 %v8431_v55 }
 0x5c7   :  { %6622 = vmatpush1.bf16.msra.mxu0 %v8426_v58  ;;  %v8503_v58 = vld [vmem:[#allocation10 + $0x4e4] ss:$28 sps:$4 sm:$0xff]  }
 0x5c8   :  { %6663 = vmatpush1.bf16.msra.mxu1 %v8429_v61  ;;  %6623 = vmatprep.subr.bf16.mxu0 %v8434_v18  ;;  %v8498_v61 = vld [vmem:[#allocation10 + $0x160] ss:$28 sps:$4 sm:$0xff]  }
 0x5c9   :  { %6664 = vmatprep.subr.bf16.mxu1 %v8437_v20 }
 0x5cb   :  { %6624 = vmatpush1.bf16.msra.mxu0 %v8432_v22  ;;  %v8501_v22 = vld [vmem:[#allocation10 + $0x4e0] ss:$28 sps:$4 sm:$0xff]  }
 0x5cc   :  { %6665 = vmatpush1.bf16.msra.mxu1 %v8435_v23  ;;  %6625 = vmatprep.subr.bf16.mxu0 %v8440_v26  ;;  %v8506_v23 = vld [vmem:[#allocation10 + $0x12c] ss:$28 sps:$4 sm:$0xff]  }
 0x5cd   :  { %6666 = vmatprep.subr.bf16.mxu1 %v8443_v27  ;;  %v8509_v26 = vld [vmem:[#allocation10 + $0x4ac] ss:$28 sps:$4 sm:$0xff]  }
 0x5cf   :  { %6626 = vmatpush1.bf16.msra.mxu0 %v8438_v28 }
 0x5d0   :  { %6667 = vmatpush1.bf16.msra.mxu1 %v8441_v30  ;;  %6627 = vmatprep.subr.bf16.mxu0 %v8446_v36  ;;  %v8504_v30 = vld [vmem:[#allocation10 + $0x128] ss:$28 sps:$4 sm:$0xff]  }
 0x5d1   :  { %6668 = vmatprep.subr.bf16.mxu1 %v8449_v40 }
 0x5d3   :  { %6628 = vmatpush2.bf16.msra.mxu0 %v8444_v42  ;;  %v8507_v42 = vld [vmem:[#allocation10 + $0x4a8] ss:$28 sps:$4 sm:$0xff]  }
 0x5d4   :  { %6669 = vmatpush2.bf16.msra.mxu1 %v8447_v44  ;;  %6629 = vmatprep.subr.bf16.mxu0 %v8452_v15  ;;  %v8512_v44 = vld [vmem:[#allocation10 + $0xf4] ss:$28 sps:$4 sm:$0xff]  }
 0x5d5   :  { %6670 = vmatprep.subr.bf16.mxu1 %v8455_v24  ;;  %v8515_v15 = vld [vmem:[#allocation10 + $0x474] ss:$28 sps:$4 sm:$0xff]  }
 0x5d6   :  { %v8510_v24 = vld [vmem:[#allocation10 + $0xf0] ss:$28 sps:$4 sm:$0xff]  }
 0x5d7   :  { %6630 = vmatpush2.bf16.msra.mxu0 %v8450_v50  ;;  %v8513_v50 = vld [vmem:[#allocation10 + $0x470] ss:$28 sps:$4 sm:$0xff]  }
 0x5d8   :  { %6671 = vmatpush2.bf16.msra.mxu1 %v8453_v13  ;;  %6631 = vmatprep.subr.bf16.mxu0 %v8458_v52  ;;  %v8518_v13 = vld [vmem:[#allocation10 + $0xbc] ss:$28 sps:$4 sm:$0xff]  }
 0x5d9   :  { %6672 = vmatprep.subr.bf16.mxu1 %v8461_v8  ;;  %v8521_v52 = vld [vmem:[#allocation10 + $0x43c] ss:$28 sps:$4 sm:$0xff]  }
 0x5da   :  { %v8516_v8 = vld [vmem:[#allocation10 + $0xb8] ss:$28 sps:$4 sm:$0xff]  }
 0x5db   :  { %6632 = vmatpush2.bf16.msra.mxu0 %v8456_v54  ;;  %v8519_v54 = vld [vmem:[#allocation10 + $0x438] ss:$28 sps:$4 sm:$0xff]  }
 0x5dc   :  { %6673 = vmatpush2.bf16.msra.mxu1 %v8459_v10  ;;  %6633 = vmatprep.subr.bf16.mxu0 %v8464_v34  ;;  %v8524_v10 = vld [vmem:[#allocation10 + $0x84] ss:$28 sps:$4 sm:$0xff]  }
 0x5dd   :  { %6674 = vmatprep.subr.bf16.mxu1 %v8467_v35  ;;  %v8527_v34 = vld [vmem:[#allocation10 + $0x404] ss:$28 sps:$4 sm:$0xff]  }
 0x5de   :  { %v8522_v35 = vld [vmem:[#allocation10 + $0x80] ss:$28 sps:$4 sm:$0xff]  }
 0x5df   :  { %6634 = vmatpush2.bf16.msra.mxu0 %v8462_v29  ;;  %v8525_v29 = vld [vmem:[#allocation10 + $0x400] ss:$28 sps:$4 sm:$0xff]  }
 0x5e0   :  { %6675 = vmatpush2.bf16.msra.mxu1 %v8465_v56  ;;  %6635 = vmatprep.subr.bf16.mxu0 %v8470_v31  ;;  %v8530_v56 = vld [vmem:[#allocation10 + $0x4c] ss:$28 sps:$4 sm:$0xff]  }
 0x5e1   :  { %6676 = vmatprep.subr.bf16.mxu1 %v8473_v1  ;;  %v8533_v31 = vld [vmem:[#allocation10 + $0x3cc] ss:$28 sps:$4 sm:$0xff]  }
 0x5e2   :  { %v8528_v1 = vld [vmem:[#allocation10 + $0x48] ss:$28 sps:$4 sm:$0xff]  }
 0x5e3   :  { %6636 = vmatpush2.bf16.msra.mxu0 %v8468_v38  ;;  %v8531_v38 = vld [vmem:[#allocation10 + $0x3c8] ss:$28 sps:$4 sm:$0xff]  }
 0x5e4   :  { %6677 = vmatpush2.bf16.msra.mxu1 %v8471_v21  ;;  %6637 = vmatprep.subr.bf16.mxu0 %v8476_v9  ;;  %v8536_v21 = vld [vmem:[#allocation10 + $0x14] ss:$28 sps:$4 sm:$0xff]  }
 0x5e5   :  { %6678 = vmatprep.subr.bf16.mxu1 %v8479_v59  ;;  %v8539_v9 = vld [vmem:[#allocation10 + $0x394] ss:$28 sps:$4 sm:$0xff]  }
 0x5e6   :  { %v8534_v59 = vld [vmem:[#allocation10 + $0x10] ss:$28 sps:$4 sm:$0xff]  }
 0x5e7   :  { %6638 = vmatpush2.bf16.msra.mxu0 %v8474_v16  ;;  %v8537_v16 = vld [vmem:[#allocation10 + $0x390] ss:$28 sps:$4 sm:$0xff]  }
 0x5e8   :  { %6679 = vmatpush2.bf16.msra.mxu1 %v8477_v49  ;;  %6639 = vmatprep.subr.bf16.mxu0 %v8482_v45  ;;  %v8542_v49 = vld [vmem:[#allocation10 + $0x35c] ss:$28 sps:$4 sm:$0xff]  }
 0x5e9   :  { %6680 = vmatprep.subr.bf16.mxu1 %v8485_v53  ;;  %v8545_v45 = vld [vmem:[#allocation10 + $0x6dc] ss:$28 sps:$4 sm:$0xff]  }
 0x5ea   :  { %v8540_v53 = vld [vmem:[#allocation10 + $0x358] ss:$28 sps:$4 sm:$0xff]  }
 0x5eb   :  { %6640 = vmatpush2.bf16.msra.mxu0 %v8480_v2  ;;  %v8543_v2 = vld [vmem:[#allocation10 + $0x6d8] ss:$28 sps:$4 sm:$0xff]  }
 0x5ec   :  { %6681 = vmatpush2.bf16.msra.mxu1 %v8483_v32  ;;  %6641 = vmatprep.subr.bf16.mxu0 %v8488_v46  ;;  %v8548_v32 = vld [vmem:[#allocation10 + $0x324] ss:$28 sps:$4 sm:$0xff]  }
 0x5ed   :  { %6682 = vmatprep.subr.bf16.mxu1 %v8491_v14  ;;  %v8551_v46 = vld [vmem:[#allocation10 + $0x6a4] ss:$28 sps:$4 sm:$0xff]  }
 0x5ee   :  { %v8546_v14 = vld [vmem:[#allocation10 + $0x320] ss:$28 sps:$4 sm:$0xff]  }
 0x5ef   :  { %6642 = vmatpush2.bf16.msra.mxu0 %v8486_v37  ;;  %v8549_v37 = vld [vmem:[#allocation10 + $0x6a0] ss:$28 sps:$4 sm:$0xff]  }
 0x5f0   :  { %6683 = vmatpush2.bf16.msra.mxu1 %v8489_v0  ;;  %6693 = vmatprep.subr.bf16.mxu0 %v8494_v63  ;;  %v8554_v0 = vld [vmem:[#allocation10 + $0x2ec] ss:$28 sps:$4 sm:$0xff]  }
 0x5f1   :  { %6734 = vmatprep.subr.bf16.mxu1 %v8497_v51  ;;  %v8557_v63 = vld [vmem:[#allocation10 + $0x66c] ss:$28 sps:$4 sm:$0xff]  }
 0x5f2   :  { %6644 = vmatmul.mubr.bf16.vlgmr.msra.gmra.mxu0 %v9349_v47  ;;  %v9364_v6 = vpop.f32.mrf.mxu0  ;;  %v9366_v55 = vpop.f32.mrf.mxu1  ;;  %v8552_v51 = vld [vmem:[#allocation10 + $0x2e8] ss:$28 sps:$4 sm:$0xff]  }
 0x5f3   :  { %6685 = vmatmul.mubr.bf16.vlgmr.msra.gmra.mxu1 %v9353_v48  ;;  %6694 = vmatpush1.bf16.msra.mxu0 %v8492_v4  ;;  %v8555_v4 = vld [vmem:[#allocation10 + $0x668] ss:$28 sps:$4 sm:$0xff]  }
 0x5f4   :  { %6725 = vmatprep.mubr.bf16.mxu0 %v9329_v11  ;;  %6735 = vmatpush1.bf16.msra.mxu1 %v8495_v25  ;;  %v9370_v18 = vpop.f32.mrf.mxu0  ;;  %v9372_v20 = vpop.f32.mrf.mxu1  ;;  %v8560_v25 = vld [vmem:[#allocation10 + $0x2b4] ss:$28 sps:$4 sm:$0xff]  }
 0x5f5   :  { %6766 = vmatprep.mubr.bf16.mxu1 %v9331_v12  ;;  %6695 = vmatprep.subr.bf16.mxu0 %v8500_v5  ;;  %v8563_v5 = vld [vmem:[#allocation10 + $0x634] ss:$28 sps:$4 sm:$0xff]  }
 0x5f6   :  { %6736 = vmatprep.subr.bf16.mxu1 %v8503_v58  ;;  %v6403_v27 = vpop.f32.mrf.mxu0  ;;  %v6444_v28 = vpop.f32.mrf.mxu1  ;;  %v8558_v58 = vld [vmem:[#allocation10 + $0x2b0] ss:$28 sps:$4 sm:$0xff]  }
 0x5f7   :  { %6696 = vmatpush1.bf16.msra.mxu0 %v8498_v61  ;;  %v8561_v61 = vld [vmem:[#allocation10 + $0x630] ss:$28 sps:$4 sm:$0xff]   ;;  %v8567_v27 = vld [vmem:[#allocation10 + $0x5f8] ss:$28 sps:$4 sm:$0xff]   ;;  %v8572_v28 = vld [vmem:[#allocation10 + $0x244] ss:$28 sps:$4 sm:$0xff]  }
 0x5f8   :  { %6737 = vmatpush1.bf16.msra.mxu1 %v8501_v22  ;;  %v6404_v36 = vpop.f32.mrf.mxu0  ;;  %v6445_v40 = vpop.f32.mrf.mxu1  ;;  %6697 = vmatprep.subr.bf16.mxu0 %v8506_v23  ;;  %v8566_v22 = vld [vmem:[#allocation10 + $0x27c] ss:$28 sps:$4 sm:$0xff]  }
 0x5f9   :  { %6738 = vmatprep.subr.bf16.mxu1 %v8509_v26  ;;  %v8569_v23 = vld [vmem:[#allocation10 + $0x5fc] ss:$28 sps:$4 sm:$0xff]  }
 0x5fa   :  { %v8564_v26 = vld [vmem:[#allocation10 + $0x278] ss:$28 sps:$4 sm:$0xff]   ;;  %v8570_v36 = vld [vmem:[#allocation10 + $0x240] ss:$28 sps:$4 sm:$0xff]  }
 0x5fb   :  { %6698 = vmatpush1.bf16.msra.mxu0 %v8504_v30  ;;  %v8575_v30 = vld [vmem:[#allocation10 + $0x5c4] ss:$28 sps:$4 sm:$0xff]  }
 0x5fc   :  { %6739 = vmatpush1.bf16.msra.mxu1 %v8507_v42  ;;  %6699 = vmatprep.subr.bf16.mxu0 %v8512_v44  ;;  %v8573_v40 = vld [vmem:[#allocation10 + $0x5c0] ss:$28 sps:$4 sm:$0xff]   ;;  %v8578_v42 = vld [vmem:[#allocation10 + $0x20c] ss:$28 sps:$4 sm:$0xff]  }
 0x5fd   :  { %6740 = vmatprep.subr.bf16.mxu1 %v8515_v15  ;;  %v8581_v44 = vld [vmem:[#allocation10 + $0x58c] ss:$28 sps:$4 sm:$0xff]  }
 0x5fe   :  { %v9375_v15 = vld [vmem:[#allocation11 + $0x2d] sm:$0xff] }
 0x5ff   :  { %6700 = vmatpush1.bf16.msra.mxu0 %v8510_v24  ;;  %v8576_v24 = vld [vmem:[#allocation10 + $0x208] ss:$28 sps:$4 sm:$0xff]  }
 0x600   :  { %6741 = vmatpush1.bf16.msra.mxu1 %v8513_v50  ;;  %6701 = vmatprep.subr.bf16.mxu0 %v8518_v13  ;;  %v8579_v50 = vld [vmem:[#allocation10 + $0x588] ss:$28 sps:$4 sm:$0xff]   ;;  %v8584_v13 = vld [vmem:[#allocation10 + $0x1d4] ss:$28 sps:$4 sm:$0xff]  }
 0x601   :  { %6742 = vmatprep.subr.bf16.mxu1 %v8521_v52  ;;  %v4029_v52 = vrot.slane %v9375_v15, %v9027_v60  ;;  %v8591_v60 = vld [vmem:[#allocation10 + $0xc18] ss:$28 sps:$4 sm:$0xff]  }
 0x603   :  { %6702 = vmatpush1.bf16.msra.mxu0 %v8516_v8  ;;  %v8587_v8 = vld [vmem:[#allocation10 + $0x554] ss:$28 sps:$4 sm:$0xff]  }
 0x604   :  { %6743 = vmatpush1.bf16.msra.mxu1 %v8519_v54  ;;  %6703 = vmatprep.subr.bf16.mxu0 %v8524_v10  ;;  %v4033_v54 = vrot.slane %v9375_v15, %v9032_v7  ;;  %v8582_v10 = vld [vmem:[#allocation10 + $0x1d0] ss:$28 sps:$4 sm:$0xff]   ;;  %v8596_v7 = vld [vmem:[#allocation10 + $0x864] ss:$28 sps:$4 sm:$0xff]  }
 0x605   :  { %6744 = vmatprep.subr.bf16.mxu1 %v8527_v34  ;;  %v8585_v34 = vld [vmem:[#allocation10 + $0x550] ss:$28 sps:$4 sm:$0xff]  }
 0x607   :  { %6704 = vmatpush1.bf16.msra.mxu0 %v8522_v35  ;;  %v8590_v35 = vld [vmem:[#allocation10 + $0x89c] ss:$28 sps:$4 sm:$0xff]  }
 0x608   :  { %6745 = vmatpush1.bf16.msra.mxu1 %v8525_v29  ;;  %6705 = vmatprep.subr.bf16.mxu0 %v8530_v56  ;;  %v6400_v29 = vadd.f32 %v9364_v6, %v4029_v52  ;;  %v8593_v56 = vld [vmem:[#allocation10 + $0xc1c] ss:$28 sps:$4 sm:$0xff]   ;;  %v8627_v52 = vld [vmem:[#allocation10 + $0xac8] ss:$28 sps:$4 sm:$0xff]  }
 0x609   :  { %6746 = vmatprep.subr.bf16.mxu1 %v8533_v31  ;;  %v6402_v31 = vadd.f32 %v9370_v18, %v4033_v54  ;;  %v8594_v18 = vld [vmem:[#allocation10 + $0x860] ss:$28 sps:$4 sm:$0xff]   ;;  %v8635_v54 = vld [vmem:[#allocation10 + $0xa94] ss:$28 sps:$4 sm:$0xff]  }
 0x60b   :  { %6706 = vmatpush1.bf16.msra.mxu0 %v8528_v1  ;;  %v8588_v1 = vld [vmem:[#allocation10 + $0x898] ss:$28 sps:$4 sm:$0xff]   ;;  %v6443_v6 = vadd.f32 %v9372_v20, %v6402_v31 }
 0x60c   :  { %6747 = vmatpush1.bf16.msra.mxu1 %v8531_v38  ;;  %6707 = vmatprep.subr.bf16.mxu0 %v8536_v21  ;;  %v6441_v38 = vadd.f32 %v9366_v55, %v6400_v29  ;;  %v8597_v55 = vld [vmem:[#allocation10 + $0xbe0] ss:$28 sps:$4 sm:$0xff]   ;;  %v8639_v31 = vld [vmem:[#allocation10 + $0xdd8] ss:$28 sps:$4 sm:$0xff]  }
 0x60d   :  { %6748 = vmatprep.subr.bf16.mxu1 %v8539_v9  ;;  %v8641_v29 = vld [vmem:[#allocation10 + $0xddc] ss:$28 sps:$4 sm:$0xff]  }
 0x60f   :  { %6708 = vmatpush1.bf16.msra.mxu0 %v8534_v59  ;;  %v8599_v59 = vld [vmem:[#allocation10 + $0xbe4] ss:$28 sps:$4 sm:$0xff]  }
 0x610   :  { %6749 = vmatpush1.bf16.msra.mxu1 %v8537_v16  ;;  %6709 = vmatprep.subr.bf16.mxu0 %v8542_v49 }
 0x611   :  { %6750 = vmatprep.subr.bf16.mxu1 %v8545_v45 }
 0x613   :  { %6710 = vmatpush2.bf16.msra.mxu0 %v8540_v53  ;;  %v8602_v53 = vld [vmem:[#allocation10 + $0x82c] ss:$28 sps:$4 sm:$0xff]  }
 0x614   :  { %6751 = vmatpush2.bf16.msra.mxu1 %v8543_v2  ;;  %6711 = vmatprep.subr.bf16.mxu0 %v8548_v32 }
 0x615   :  { %6752 = vmatprep.subr.bf16.mxu1 %v8551_v46  ;;  %v8605_v46 = vld [vmem:[#allocation10 + $0xbac] ss:$28 sps:$4 sm:$0xff]  }
 0x617   :  { %6712 = vmatpush2.bf16.msra.mxu0 %v8546_v14 }
 0x618   :  { %6753 = vmatpush2.bf16.msra.mxu1 %v8549_v37  ;;  %6713 = vmatprep.subr.bf16.mxu0 %v8554_v0  ;;  %v8600_v0 = vld [vmem:[#allocation10 + $0x828] ss:$28 sps:$4 sm:$0xff]  }
 0x619   :  { %6754 = vmatprep.subr.bf16.mxu1 %v8557_v63 }
 0x61b   :  { %6714 = vmatpush2.bf16.msra.mxu0 %v8552_v51 }
 0x61c   :  { %6755 = vmatpush2.bf16.msra.mxu1 %v8555_v4  ;;  %6715 = vmatprep.subr.bf16.mxu0 %v8560_v25  ;;  %v8603_v4 = vld [vmem:[#allocation10 + $0xba8] ss:$28 sps:$4 sm:$0xff]   ;;  %v8608_v25 = vld [vmem:[#allocation10 + $0x7f4] ss:$28 sps:$4 sm:$0xff]  }
 0x61d   :  { %6756 = vmatprep.subr.bf16.mxu1 %v8563_v5  ;;  %v8611_v5 = vld [vmem:[#allocation10 + $0xb74] ss:$28 sps:$4 sm:$0xff]  }
 0x61f   :  { %6716 = vmatpush2.bf16.msra.mxu0 %v8558_v58  ;;  %v8606_v58 = vld [vmem:[#allocation10 + $0x7f0] ss:$28 sps:$4 sm:$0xff]  }
 0x620   :  { %6757 = vmatpush2.bf16.msra.mxu1 %v8561_v61  ;;  %6717 = vmatprep.subr.bf16.mxu0 %v8566_v22  ;;  %v8609_v61 = vld [vmem:[#allocation10 + $0xb70] ss:$28 sps:$4 sm:$0xff]   ;;  %v8614_v22 = vld [vmem:[#allocation10 + $0x7bc] ss:$28 sps:$4 sm:$0xff]  }
 0x621   :  { %6758 = vmatprep.subr.bf16.mxu1 %v8569_v23  ;;  %v8617_v23 = vld [vmem:[#allocation10 + $0xb3c] ss:$28 sps:$4 sm:$0xff]  }
 0x623   :  { %6718 = vmatpush2.bf16.msra.mxu0 %v8564_v26  ;;  %v8612_v26 = vld [vmem:[#allocation10 + $0x7b8] ss:$28 sps:$4 sm:$0xff]  }
 0x624   :  { %6759 = vmatpush2.bf16.msra.mxu1 %v8567_v27  ;;  %6719 = vmatprep.subr.bf16.mxu0 %v8572_v28  ;;  %v8615_v27 = vld [vmem:[#allocation10 + $0xb38] ss:$28 sps:$4 sm:$0xff]   ;;  %v8620_v28 = vld [vmem:[#allocation10 + $0x784] ss:$28 sps:$4 sm:$0xff]  }
 0x625   :  { %6760 = vmatprep.subr.bf16.mxu1 %v8575_v30  ;;  %v8623_v30 = vld [vmem:[#allocation10 + $0xb04] ss:$28 sps:$4 sm:$0xff]  }
 0x627   :  { %6720 = vmatpush2.bf16.msra.mxu0 %v8570_v36  ;;  %v8618_v36 = vld [vmem:[#allocation10 + $0x780] ss:$28 sps:$4 sm:$0xff]  }
 0x628   :  { %6761 = vmatpush2.bf16.msra.mxu1 %v8573_v40  ;;  %6721 = vmatprep.subr.bf16.mxu0 %v8578_v42  ;;  %v8621_v42 = vld [vmem:[#allocation10 + $0xb00] ss:$28 sps:$4 sm:$0xff]  }
 0x629   :  { %6762 = vmatprep.subr.bf16.mxu1 %v8581_v44  ;;  %v8626_v44 = vld [vmem:[#allocation10 + $0x74c] ss:$28 sps:$4 sm:$0xff]  }
 0x62b   :  { %6722 = vmatpush2.bf16.msra.mxu0 %v8576_v24  ;;  %v8629_v24 = vld [vmem:[#allocation10 + $0xacc] ss:$28 sps:$4 sm:$0xff]  }
 0x62c   :  { %6763 = vmatpush2.bf16.msra.mxu1 %v8579_v50  ;;  %6723 = vmatprep.subr.bf16.mxu0 %v8584_v13  ;;  %v8624_v13 = vld [vmem:[#allocation10 + $0x748] ss:$28 sps:$4 sm:$0xff]  }
 0x62d   :  { %6764 = vmatprep.subr.bf16.mxu1 %v8587_v8  ;;  %v8632_v8 = vld [vmem:[#allocation10 + $0x714] ss:$28 sps:$4 sm:$0xff]  }
 0x62f   :  { %6724 = vmatpush2.bf16.msra.mxu0 %v8582_v10  ;;  %v8630_v10 = vld [vmem:[#allocation10 + $0x710] ss:$28 sps:$4 sm:$0xff]  }
 0x630   :  { %6765 = vmatpush2.bf16.msra.mxu1 %v8585_v34  ;;  %6775 = vmatprep.subr.bf16.mxu0 %v8590_v35  ;;  %v8633_v34 = vld [vmem:[#allocation10 + $0xa90] ss:$28 sps:$4 sm:$0xff]   ;;  %v8638_v35 = vld [vmem:[#allocation10 + $0xa5c] ss:$28 sps:$4 sm:$0xff]  }
 0x631   :  { %6816 = vmatprep.subr.bf16.mxu1 %v8593_v56  ;;  %v8636_v56 = vld [vmem:[#allocation10 + $0xa58] ss:$28 sps:$4 sm:$0xff]  }
 0x632   :  { %v6481_v21 = vpop.f32.mrf.mxu0  ;;  %v6522_v9 = vpop.f32.mrf.mxu1  ;;  %6726 = vmatmul.mubr.bf16.vlgmr.msra.gmra.mxu0 %v9333_v17 }
 0x633   :  { %v6482_v16 = vadd.f32 %v6481_v21, %v6441_v38  ;;  %6767 = vmatmul.mubr.bf16.vlgmr.msra.gmra.mxu1 %v9335_v57  ;;  %6776 = vmatpush1.bf16.msra.mxu0 %v8588_v1  ;;  %v8644_v1 = vld [vmem:[#allocation10 + $0xa24] ss:$28 sps:$4 sm:$0xff]   ;;  %v8650_v21 = vld [vmem:[#allocation10 + $0x9ec] ss:$28 sps:$4 sm:$0xff]  }
 0x634   :  { %6807 = vmatprep.mubr.bf16.mxu0 %v9341_v33  ;;  %6817 = vmatpush1.bf16.msra.mxu1 %v8591_v60  ;;  %v6483_v49 = vpop.f32.mrf.mxu0  ;;  %v6524_v45 = vpop.f32.mrf.mxu1  ;;  %v8647_v60 = vld [vmem:[#allocation10 + $0xda4] ss:$28 sps:$4 sm:$0xff]  }
 0x635   :  { %v6523_v2 = vadd.f32 %v6522_v9, %v6482_v16  ;;  %6848 = vmatprep.mubr.bf16.mxu1 %v9343_v19  ;;  %v6484_v32 = vadd.f32 %v6483_v49, %v6443_v6  ;;  %6777 = vmatprep.subr.bf16.mxu0 %v8596_v7  ;;  %v8642_v38 = vld [vmem:[#allocation10 + $0xa20] ss:$28 sps:$4 sm:$0xff]   ;;  %v8653_v9 = vld [vmem:[#allocation10 + $0xd6c] ss:$28 sps:$4 sm:$0xff]   ;;  %v8656_v16 = vld [vmem:[#allocation10 + $0x9b4] ss:$28 sps:$4 sm:$0xff]  }
 0x636   :  { %v6485_v14 = vpop.f32.mrf.mxu0  ;;  %v6526_v20 = vpop.f32.mrf.mxu1  ;;  %6818 = vmatprep.subr.bf16.mxu1 %v8599_v59  ;;  %v8645_v7 = vld [vmem:[#allocation10 + $0xda0] ss:$28 sps:$4 sm:$0xff]   ;;  %v8648_v59 = vld [vmem:[#allocation10 + $0x9e8] ss:$28 sps:$4 sm:$0xff]   ;;  %v8654_v49 = vld [vmem:[#allocation10 + $0x9b0] ss:$28 sps:$4 sm:$0xff]  }
 0x637   :  { %8778 = vtanh.f32 %v6523_v2  ;;  %v6525_v37 = vadd.f32 %v6524_v45, %v6484_v32  ;;  %6778 = vmatpush1.bf16.msra.mxu0 %v8594_v18  ;;  %v8651_v6 = vld [vmem:[#allocation10 + $0xd68] ss:$28 sps:$4 sm:$0xff]   ;;  %v8659_v18 = vld [vmem:[#allocation10 + $0xd34] ss:$28 sps:$4 sm:$0xff]   ;;  %v8666_v20 = vld [vmem:[#allocation10 + $0x940] ss:$28 sps:$4 sm:$0xff]  }
 0x638   :  { %6819 = vmatpush1.bf16.msra.mxu1 %v8597_v55  ;;  %v6486_v63 = vpop.f32.mrf.mxu0  ;;  %v6527_v51 = vpop.f32.mrf.mxu1  ;;  %6779 = vmatprep.subr.bf16.mxu0 %v8602_v53  ;;  %v8657_v45 = vld [vmem:[#allocation10 + $0xd30] ss:$28 sps:$4 sm:$0xff]   ;;  %v8662_v55 = vld [vmem:[#allocation10 + $0x97c] ss:$28 sps:$4 sm:$0xff]   ;;  %v8671_v14 = vld [vmem:[#allocation10 + $0xcc4] ss:$28 sps:$4 sm:$0xff]  }
 0x639   :  { %8780 = vtanh.f32 %v6525_v37  ;;  %6820 = vmatprep.subr.bf16.mxu1 %v8605_v46  ;;  %v8665_v53 = vld [vmem:[#allocation10 + $0xcfc] ss:$28 sps:$4 sm:$0xff]   ;;  %v8668_v46 = vld [vmem:[#allocation10 + $0x944] ss:$28 sps:$4 sm:$0xff]   ;;  %v8677_v63 = vld [vmem:[#allocation10 + $0xc8c] ss:$28 sps:$4 sm:$0xff]  }
 0x63a   :  { %v8660_v2 = vld [vmem:[#allocation10 + $0x978] ss:$28 sps:$4 sm:$0xff]   ;;  %v8669_v37 = vld [vmem:[#allocation10 + $0xcc0] ss:$28 sps:$4 sm:$0xff]   ;;  %v8672_v51 = vld [vmem:[#allocation10 + $0x908] ss:$28 sps:$4 sm:$0xff]  }
 0x63b   :  { %6780 = vmatpush1.bf16.msra.mxu0 %v8600_v0  ;;  %v8663_v32 = vld [vmem:[#allocation10 + $0xcf8] ss:$28 sps:$4 sm:$0xff]   ;;  %v8674_v0 = vld [vmem:[#allocation10 + $0x90c] ss:$28 sps:$4 sm:$0xff]  }
 0x63c   :  { %6821 = vmatpush1.bf16.msra.mxu1 %v8603_v4  ;;  %6781 = vmatprep.subr.bf16.mxu0 %v8608_v25  ;;  %v8675_v4 = vld [vmem:[#allocation10 + $0xc88] ss:$28 sps:$4 sm:$0xff]   ;;  %v8680_v25 = vld [vmem:[#allocation10 + $0x8d4] ss:$28 sps:$4 sm:$0xff]  }
 0x63d   :  { %6822 = vmatprep.subr.bf16.mxu1 %v8611_v5  ;;  %v8683_v5 = vld [vmem:[#allocation10 + $0xc54] ss:$28 sps:$4 sm:$0xff]  }
 0x63f   :  { %6782 = vmatpush1.bf16.msra.mxu0 %v8606_v58  ;;  %v8678_v58 = vld [vmem:[#allocation10 + $0x8d0] ss:$28 sps:$4 sm:$0xff]  }
 0x640   :  { %6823 = vmatpush1.bf16.msra.mxu1 %v8609_v61  ;;  %6783 = vmatprep.subr.bf16.mxu0 %v8614_v22  ;;  %v8681_v61 = vld [vmem:[#allocation10 + $0xc50] ss:$28 sps:$4 sm:$0xff]   ;;  %v8684_v22 = vld [vmem:[#allocation10 + $0x360] ss:$28 sps:$4 sm:$0xff]  }
 0x641   :  { %6824 = vmatprep.subr.bf16.mxu1 %v8617_v23  ;;  %v8685_v23 = vld [vmem:[#allocation10 + $0x6e0] ss:$28 sps:$4 sm:$0xff]  }
 0x643   :  { %6784 = vmatpush1.bf16.msra.mxu0 %v8612_v26  ;;  %v8686_v26 = vld [vmem:[#allocation10 + $0x1a0] ss:$28 sps:$4 sm:$0xff]  }
 0x644   :  { %v8779_v40 = vpop.eup %8778  ;;  %6825 = vmatpush1.bf16.msra.mxu1 %v8615_v27  ;;  %6785 = vmatprep.subr.bf16.mxu0 %v8620_v28  ;;  %v8687_v27 = vld [vmem:[#allocation10 + $0x520] ss:$28 sps:$4 sm:$0xff]   ;;  %v8688_v28 = vld [vmem:[#allocation10 + $0x328] ss:$28 sps:$4 sm:$0xff]  }
 0x645   :  { %7024 = vst [vmem:[#allocation13] sm:$0xff] %v8779_v40  ;;  %6826 = vmatprep.subr.bf16.mxu1 %v8623_v30 }
 0x646   :  { %v8781_v50 = vpop.eup %8780 }
 0x647   :  { %7025 = vst [vmem:[#allocation13 + $0x8] sm:$0xff] %v8781_v50  ;;  %6786 = vmatpush1.bf16.msra.mxu0 %v8618_v36  ;;  %v8689_v36 = vld [vmem:[#allocation10 + $0x6a8] ss:$28 sps:$4 sm:$0xff]   ;;  %v8692_v50 = vld [vmem:[#allocation10 + $0x2f0] ss:$28 sps:$4 sm:$0xff]  }
 0x648   :  { %6827 = vmatpush1.bf16.msra.mxu1 %v8621_v42  ;;  %6787 = vmatprep.subr.bf16.mxu0 %v8626_v44  ;;  %v8690_v42 = vld [vmem:[#allocation10 + $0x168] ss:$28 sps:$4 sm:$0xff]  }
 0x649   :  { %6828 = vmatprep.subr.bf16.mxu1 %v8629_v24  ;;  %v8691_v24 = vld [vmem:[#allocation10 + $0x4e8] ss:$28 sps:$4 sm:$0xff]  }
 0x64b   :  { %6788 = vmatpush1.bf16.msra.mxu0 %v8624_v13 }
 0x64c   :  { %6829 = vmatpush1.bf16.msra.mxu1 %v8627_v52  ;;  %6789 = vmatprep.subr.bf16.mxu0 %v8632_v8  ;;  %v8693_v52 = vld [vmem:[#allocation10 + $0x670] ss:$28 sps:$4 sm:$0xff]  }
 0x64d   :  { %6830 = vmatprep.subr.bf16.mxu1 %v8635_v54 }
 0x64f   :  { %6790 = vmatpush1.bf16.msra.mxu0 %v8630_v10  ;;  %v8694_v10 = vld [vmem:[#allocation10 + $0x130] ss:$28 sps:$4 sm:$0xff]  }
 0x650   :  { %6831 = vmatpush1.bf16.msra.mxu1 %v8633_v34  ;;  %6791 = vmatprep.subr.bf16.mxu0 %v8638_v35  ;;  %v8696_v35 = vld [vmem:[#allocation10 + $0x2b8] ss:$28 sps:$4 sm:$0xff]  }
 0x651   :  { %6832 = vmatprep.subr.bf16.mxu1 %v8641_v29 }
 0x653   :  { %6792 = vmatpush2.bf16.msra.mxu0 %v8636_v56  ;;  %v8697_v56 = vld [vmem:[#allocation10 + $0x638] ss:$28 sps:$4 sm:$0xff]  }
 0x654   :  { %6833 = vmatpush2.bf16.msra.mxu1 %v8639_v31  ;;  %6793 = vmatprep.subr.bf16.mxu0 %v8644_v1  ;;  %v8698_v31 = vld [vmem:[#allocation10 + $0xf8] ss:$28 sps:$4 sm:$0xff]   ;;  %v8700_v1 = vld [vmem:[#allocation10 + $0x280] ss:$28 sps:$4 sm:$0xff]  }
 0x655   :  { %6834 = vmatprep.subr.bf16.mxu1 %v8647_v60  ;;  %v8701_v60 = vld [vmem:[#allocation10 + $0x600] ss:$28 sps:$4 sm:$0xff]  }
 0x657   :  { %6794 = vmatpush2.bf16.msra.mxu0 %v8642_v38  ;;  %v8702_v38 = vld [vmem:[#allocation10 + $0xc0] ss:$28 sps:$4 sm:$0xff]  }
 0x658   :  { %6835 = vmatpush2.bf16.msra.mxu1 %v8645_v7  ;;  %6795 = vmatprep.subr.bf16.mxu0 %v8650_v21  ;;  %v8703_v7 = vld [vmem:[#allocation10 + $0x440] ss:$28 sps:$4 sm:$0xff]   ;;  %v8704_v21 = vld [vmem:[#allocation10 + $0x248] ss:$28 sps:$4 sm:$0xff]  }
 0x659   :  { %6836 = vmatprep.subr.bf16.mxu1 %v8653_v9  ;;  %v8705_v9 = vld [vmem:[#allocation10 + $0x5c8] ss:$28 sps:$4 sm:$0xff]  }
 0x65b   :  { %6796 = vmatpush2.bf16.msra.mxu0 %v8648_v59  ;;  %v8706_v59 = vld [vmem:[#allocation10 + $0x88] ss:$28 sps:$4 sm:$0xff]  }
 0x65c   :  { %6837 = vmatpush2.bf16.msra.mxu1 %v8651_v6  ;;  %6797 = vmatprep.subr.bf16.mxu0 %v8656_v16  ;;  %v8707_v6 = vld [vmem:[#allocation10 + $0x408] ss:$28 sps:$4 sm:$0xff]   ;;  %v8708_v16 = vld [vmem:[#allocation10 + $0x210] ss:$28 sps:$4 sm:$0xff]  }
 0x65d   :  { %6838 = vmatprep.subr.bf16.mxu1 %v8659_v18  ;;  %v8709_v18 = vld [vmem:[#allocation10 + $0x590] ss:$28 sps:$4 sm:$0xff]  }
 0x65f   :  { %6798 = vmatpush2.bf16.msra.mxu0 %v8654_v49  ;;  %v8710_v49 = vld [vmem:[#allocation10 + $0x50] ss:$28 sps:$4 sm:$0xff]  }
 0x660   :  { %6839 = vmatpush2.bf16.msra.mxu1 %v8657_v45  ;;  %6799 = vmatprep.subr.bf16.mxu0 %v8662_v55  ;;  %v8711_v45 = vld [vmem:[#allocation10 + $0x3d0] ss:$28 sps:$4 sm:$0xff]   ;;  %v8712_v55 = vld [vmem:[#allocation10 + $0x1d8] ss:$28 sps:$4 sm:$0xff]  }
 0x661   :  { %6840 = vmatprep.subr.bf16.mxu1 %v8665_v53  ;;  %v8713_v53 = vld [vmem:[#allocation10 + $0x558] ss:$28 sps:$4 sm:$0xff]  }
 0x663   :  { %6800 = vmatpush2.bf16.msra.mxu0 %v8660_v2  ;;  %v8714_v2 = vld [vmem:[#allocation10 + $0x18] ss:$28 sps:$4 sm:$0xff]  }
 0x664   :  { %6841 = vmatpush2.bf16.msra.mxu1 %v8663_v32  ;;  %6801 = vmatprep.subr.bf16.mxu0 %v8668_v46  ;;  %v8715_v32 = vld [vmem:[#allocation10 + $0x398] ss:$28 sps:$4 sm:$0xff]   ;;  %v8716_v46 = vld [vmem:[#allocation10 + $0xa60] ss:$28 sps:$4 sm:$0xff]  }
 0x665   :  { %6842 = vmatprep.subr.bf16.mxu1 %v8671_v14  ;;  %v8717_v14 = vld [vmem:[#allocation10 + $0xde0] ss:$28 sps:$4 sm:$0xff]  }
 0x667   :  { %6802 = vmatpush2.bf16.msra.mxu0 %v8666_v20  ;;  %v8718_v20 = vld [vmem:[#allocation10 + $0x8a0] ss:$28 sps:$4 sm:$0xff]  }
 0x668   :  { %6843 = vmatpush2.bf16.msra.mxu1 %v8669_v37  ;;  %6803 = vmatprep.subr.bf16.mxu0 %v8674_v0  ;;  %v8719_v37 = vld [vmem:[#allocation10 + $0xc20] ss:$28 sps:$4 sm:$0xff]   ;;  %v8720_v0 = vld [vmem:[#allocation10 + $0xa28] ss:$28 sps:$4 sm:$0xff]  }
 0x669   :  { %6844 = vmatprep.subr.bf16.mxu1 %v8677_v63  ;;  %v8721_v63 = vld [vmem:[#allocation10 + $0xda8] ss:$28 sps:$4 sm:$0xff]  }
 0x66b   :  { %6804 = vmatpush2.bf16.msra.mxu0 %v8672_v51  ;;  %v8722_v51 = vld [vmem:[#allocation10 + $0x868] ss:$28 sps:$4 sm:$0xff]  }
 0x66c   :  { %6845 = vmatpush2.bf16.msra.mxu1 %v8675_v4  ;;  %6805 = vmatprep.subr.bf16.mxu0 %v8680_v25  ;;  %v8723_v4 = vld [vmem:[#allocation10 + $0xbe8] ss:$28 sps:$4 sm:$0xff]   ;;  %v8724_v25 = vld [vmem:[#allocation10 + $0x9f0] ss:$28 sps:$4 sm:$0xff]  }
 0x66d   :  { %6846 = vmatprep.subr.bf16.mxu1 %v8683_v5  ;;  %v8725_v5 = vld [vmem:[#allocation10 + $0xd70] ss:$28 sps:$4 sm:$0xff]  }
 0x66f   :  { %6806 = vmatpush2.bf16.msra.mxu0 %v8678_v58  ;;  %v8726_v58 = vld [vmem:[#allocation10 + $0x830] ss:$28 sps:$4 sm:$0xff]  }
 0x670   :  { %6847 = vmatpush2.bf16.msra.mxu1 %v8681_v61  ;;  %7851 = vmatprep.subr.bf16.mxu0 %v8684_v22  ;;  %v8728_v61 = vld [vmem:[#allocation10 + $0x9b8] ss:$28 sps:$4 sm:$0xff]  }
 0x671   :  { %7873 = vmatprep.subr.bf16.mxu1 %v8685_v23  ;;  %v8730_v22 = vld [vmem:[#allocation10 + $0x7f8] ss:$28 sps:$4 sm:$0xff]   ;;  %v8732_v23 = vld [vmem:[#allocation10 + $0x980] ss:$28 sps:$4 sm:$0xff]  }
 0x672   :  { %v9389_v30 = vpop.f32.mrf.mxu0  ;;  %6808 = vmatmul.mubr.bf16.vlgmr.msra.gmra.mxu0 %v9349_v47 }
 0x673   :  { %v9392_v40 = vpop.f32.mrf.mxu1  ;;  %6849 = vmatmul.mubr.bf16.vlgmr.msra.gmra.mxu1 %v9353_v48  ;;  %7852 = vmatpush3.bf16.msra.mxu0 %v8686_v26  ;;  %v8733_v26 = vld [vmem:[#allocation10 + $0xd00] ss:$28 sps:$4 sm:$0xff]  }
 0x674   :  { %6889 = vmatprep.mubr.bf16.mxu0 %v9329_v11  ;;  %7874 = vmatpush3.bf16.msra.mxu1 %v8687_v27  ;;  %v9396_v44 = vpop.f32.mrf.mxu0  ;;  %v8695_v11 = vld [vmem:[#allocation10 + $0x4b0] ss:$28 sps:$4 sm:$0xff]   ;;  %v8735_v27 = vld [vmem:[#allocation10 + $0xb40] ss:$28 sps:$4 sm:$0xff]  }
 0x675   :  { %6929 = vmatprep.mubr.bf16.mxu1 %v9331_v12  ;;  %v9399_v13 = vpop.f32.mrf.mxu1  ;;  %7853 = vmatprep.subr.bf16.mxu0 %v8688_v28  ;;  %v8699_v12 = vld [vmem:[#allocation10 + $0x478] ss:$28 sps:$4 sm:$0xff]   ;;  %v8736_v28 = vld [vmem:[#allocation10 + $0x948] ss:$28 sps:$4 sm:$0xff]  }
 0x676   :  { %v6567_v8 = vpop.f32.mrf.mxu0  ;;  %7875 = vmatprep.subr.bf16.mxu1 %v8689_v36  ;;  %v8737_v36 = vld [vmem:[#allocation10 + $0xcc8] ss:$28 sps:$4 sm:$0xff]  }
 0x677   :  { %v6608_v54 = vpop.f32.mrf.mxu1  ;;  %7854 = vmatpush3.bf16.msra.mxu0 %v8690_v42  ;;  %v8738_v42 = vld [vmem:[#allocation10 + $0x788] ss:$28 sps:$4 sm:$0xff]   ;;  %v8742_v8 = vld [vmem:[#allocation10 + $0x750] ss:$28 sps:$4 sm:$0xff]  }
 0x678   :  { %7876 = vmatpush3.bf16.msra.mxu1 %v8691_v24  ;;  %v6568_v34 = vpop.f32.mrf.mxu0  ;;  %7855 = vmatprep.subr.bf16.mxu0 %v8692_v50  ;;  %v8739_v24 = vld [vmem:[#allocation10 + $0xb08] ss:$28 sps:$4 sm:$0xff]   ;;  %v8740_v50 = vld [vmem:[#allocation10 + $0x910] ss:$28 sps:$4 sm:$0xff]  }
 0x679   :  { %v6609_v29 = vpop.f32.mrf.mxu1  ;;  %7877 = vmatprep.subr.bf16.mxu1 %v8693_v52  ;;  %v8741_v52 = vld [vmem:[#allocation10 + $0xc90] ss:$28 sps:$4 sm:$0xff]   ;;  %v4037_v34 = vrot.slane %v9375_v15, %v9071_v41 }
 0x67a   :  { %v8743_v54 = vld [vmem:[#allocation10 + $0xad0] ss:$28 sps:$4 sm:$0xff]   ;;  %v8746_v29 = vld [vmem:[#allocation10 + $0x718] ss:$28 sps:$4 sm:$0xff]  }
 0x67b   :  { %7856 = vmatpush3.bf16.msra.mxu0 %v8694_v10  ;;  %v8744_v10 = vld [vmem:[#allocation10 + $0x8d8] ss:$28 sps:$4 sm:$0xff]  }
 0x67c   :  { %7878 = vmatpush3.bf16.msra.mxu1 %v8695_v11  ;;  %7857 = vmatprep.subr.bf16.mxu0 %v8696_v35  ;;  %v8745_v11 = vld [vmem:[#allocation10 + $0xc58] ss:$28 sps:$4 sm:$0xff]   ;;  %v4041_v35 = vrot.slane %v9375_v15, %v9074_v43 }
 0x67d   :  { %7879 = vmatprep.subr.bf16.mxu1 %v8697_v56  ;;  %v8747_v56 = vld [vmem:[#allocation10 + $0xa98] ss:$28 sps:$4 sm:$0xff]  }
 0x67f   :  { %7858 = vmatpush3.bf16.msra.mxu0 %v8698_v31  ;;  %v6564_v31 = vadd.f32 %v9389_v30, %v4037_v34 }
 0x680   :  { %7880 = vmatpush3.bf16.msra.mxu1 %v8699_v12  ;;  %7859 = vmatprep.subr.bf16.mxu0 %v8700_v1  ;;  %v6566_v12 = vadd.f32 %v9396_v44, %v4041_v35 }
 0x681   :  { %7881 = vmatprep.subr.bf16.mxu1 %v8701_v60  ;;  %v6605_v1 = vadd.f32 %v9392_v40, %v6564_v31 }
 0x682   :  { %v6607_v60 = vadd.f32 %v9399_v13, %v6566_v12 }
 0x683   :  { %7860 = vmatpush3.bf16.msra.mxu0 %v8702_v38 }
 0x684   :  { %7882 = vmatpush3.bf16.msra.mxu1 %v8703_v7  ;;  %7861 = vmatprep.subr.bf16.mxu0 %v8704_v21 }
 0x685   :  { %7883 = vmatprep.subr.bf16.mxu1 %v8705_v9 }
 0x687   :  { %7862 = vmatpush3.bf16.msra.mxu0 %v8706_v59 }
 0x688   :  { %7884 = vmatpush3.bf16.msra.mxu1 %v8707_v6  ;;  %7863 = vmatprep.subr.bf16.mxu0 %v8708_v16 }
 0x689   :  { %7885 = vmatprep.subr.bf16.mxu1 %v8709_v18 }
 0x68b   :  { %7864 = vmatpush3.bf16.msra.mxu0 %v8710_v49 }
 0x68c   :  { %7886 = vmatpush3.bf16.msra.mxu1 %v8711_v45  ;;  %7865 = vmatprep.subr.bf16.mxu0 %v8712_v55 }
 0x68d   :  { %7887 = vmatprep.subr.bf16.mxu1 %v8713_v53 }
 0x68f   :  { %7866 = vmatpush3.bf16.msra.mxu0 %v8714_v2 }
 0x690   :  { %7888 = vmatpush3.bf16.msra.mxu1 %v8715_v32  ;;  %7895 = vmatprep.subr.bf16.mxu0 %v8716_v46  ;;  %v4045_v46 = vrot.slane %v9375_v15, %v9237_v62 }
 0x691   :  { %7917 = vmatprep.subr.bf16.mxu1 %v8717_v14  ;;  %v4049_v14 = vrot.slane %v9375_v15, %v9240_v3 }
 0x692   :  { %6890 = vmatmul.mubr.bf16.vlgmr.msra.gmra.mxu0 %v9333_v17  ;;  %v8727_v17 = vld [vmem:[#allocation10 + $0xbb0] ss:$28 sps:$4 sm:$0xff]  }
 0x693   :  { %6930 = vmatmul.mubr.bf16.vlgmr.msra.gmra.mxu1 %v9335_v57  ;;  %7896 = vmatpush3.bf16.msra.mxu0 %v8718_v20  ;;  %v8729_v57 = vld [vmem:[#allocation10 + $0xd38] ss:$28 sps:$4 sm:$0xff]  }
 0x694   :  { %6969 = vmatprep.mubr.bf16.mxu0 %v9341_v33  ;;  %7918 = vmatpush3.bf16.msra.mxu1 %v8719_v37  ;;  %v8731_v33 = vld [vmem:[#allocation10 + $0xb78] ss:$28 sps:$4 sm:$0xff]  }
 0x695   :  { %7009 = vmatprep.mubr.bf16.mxu1 %v9343_v19  ;;  %7897 = vmatprep.subr.bf16.mxu0 %v8720_v0  ;;  %v8734_v19 = vld [vmem:[#allocation10 + $0x7c0] ss:$28 sps:$4 sm:$0xff]  }
 0x696   :  { %7919 = vmatprep.subr.bf16.mxu1 %v8721_v63 }
 0x697   :  { %7898 = vmatpush3.bf16.msra.mxu0 %v8722_v51 }
 0x698   :  { %7920 = vmatpush3.bf16.msra.mxu1 %v8723_v4  ;;  %7899 = vmatprep.subr.bf16.mxu0 %v8724_v25 }
 0x699   :  { %7921 = vmatprep.subr.bf16.mxu1 %v8725_v5 }
 0x69b   :  { %7900 = vmatpush3.bf16.msra.mxu0 %v8726_v58 }
 0x69c   :  { %7922 = vmatpush3.bf16.msra.mxu1 %v8727_v17  ;;  %7901 = vmatprep.subr.bf16.mxu0 %v8728_v61 }
 0x69d   :  { %7923 = vmatprep.subr.bf16.mxu1 %v8729_v57 }
 0x69f   :  { %7902 = vmatpush3.bf16.msra.mxu0 %v8730_v22 }
 0x6a0   :  { %7924 = vmatpush3.bf16.msra.mxu1 %v8731_v33  ;;  %7903 = vmatprep.subr.bf16.mxu0 %v8732_v23 }
 0x6a1   :  { %7925 = vmatprep.subr.bf16.mxu1 %v8733_v26 }
 0x6a3   :  { %7904 = vmatpush3.bf16.msra.mxu0 %v8734_v19 }
 0x6a4   :  { %7926 = vmatpush3.bf16.msra.mxu1 %v8735_v27  ;;  %7905 = vmatprep.subr.bf16.mxu0 %v8736_v28 }
 0x6a5   :  { %7927 = vmatprep.subr.bf16.mxu1 %v8737_v36 }
 0x6a7   :  { %7906 = vmatpush3.bf16.msra.mxu0 %v8738_v42 }
 0x6a8   :  { %7928 = vmatpush3.bf16.msra.mxu1 %v8739_v24  ;;  %7907 = vmatprep.subr.bf16.mxu0 %v8740_v50 }
 0x6a9   :  { %7929 = vmatprep.subr.bf16.mxu1 %v8741_v52 }
 0x6ab   :  { %7908 = vmatpush3.bf16.msra.mxu0 %v8742_v8  ;;  %v4053_v8 = vrot.slane %v9375_v15, %v9269_v39 }
 0x6ac   :  { %7930 = vmatpush3.bf16.msra.mxu1 %v8743_v54  ;;  %7909 = vmatprep.subr.bf16.mxu0 %v8744_v10 }
 0x6ad   :  { %7931 = vmatprep.subr.bf16.mxu1 %v8745_v11 }
 0x6af   :  { %7910 = vmatpush3.bf16.msra.mxu0 %v8746_v29 }
 0x6b0   :  { %7932 = vmatpush3.bf16.msra.mxu1 %v8747_v56 }
 0x6b2   :  { %v6645_v41 = vpop.f32.mrf.mxu0  ;;  %6970 = vmatmul.mubr.bf16.vlgmr.msra.gmra.mxu0 %v9349_v47 }
 0x6b3   :  { %v6646_v43 = vadd.f32 %v6645_v41, %v6605_v1  ;;  %v6686_v38 = vpop.f32.mrf.mxu1  ;;  %7010 = vmatmul.mubr.bf16.vlgmr.msra.gmra.mxu1 %v9353_v48 }
 0x6b4   :  { %v6647_v7 = vpop.f32.mrf.mxu0 }
 0x6b5   :  { %v6687_v21 = vadd.f32 %v6686_v38, %v6646_v43  ;;  %v6648_v9 = vadd.f32 %v6647_v7, %v6607_v60  ;;  %v6688_v30 = vpop.f32.mrf.mxu1 }
 0x6b6   :  { %v6649_v59 = vpop.f32.mrf.mxu0 }
 0x6b7   :  { %8782 = vtanh.f32 %v6687_v21  ;;  %v6689_v44 = vadd.f32 %v6688_v30, %v6648_v9  ;;  %v6690_v6 = vpop.f32.mrf.mxu1 }
 0x6b8   :  { %v6650_v16 = vpop.f32.mrf.mxu0 }
 0x6b9   :  { %8784 = vtanh.f32 %v6689_v44  ;;  %v6691_v40 = vpop.f32.mrf.mxu1 }
 0x6c4   :  { %v8783_v18 = vpop.eup %8782 }
 0x6c5   :  { %7026 = vst [vmem:[#allocation13 + $0x10] sm:$0xff] %v8783_v18 }
 0x6c6   :  { %v8785_v47 = vpop.eup %8784 }
 0x6c7   :  { %7027 = vst [vmem:[#allocation13 + $0x18] sm:$0xff] %v8785_v47 }
 0x6f2   :  { %v6727_v13 = vpop.f32.mrf.mxu0 }
 0x6f3   :  { %v6768_v49 = vpop.f32.mrf.mxu1  ;;  %v6728_v20 = vadd.f32 %v6727_v13, %v4045_v46 }
 0x6f4   :  { %v6729_v45 = vpop.f32.mrf.mxu0 }
 0x6f5   :  { %v6770_v55 = vpop.f32.mrf.mxu1  ;;  %v6730_v37 = vadd.f32 %v6729_v45, %v4049_v14  ;;  %v6769_v0 = vadd.f32 %v6768_v49, %v6728_v20 }
 0x6f6   :  { %v6731_v48 = vpop.f32.mrf.mxu0 }
 0x6f7   :  { %v6772_v53 = vpop.f32.mrf.mxu1  ;;  %v6771_v51 = vadd.f32 %v6770_v55, %v6730_v37 }
 0x6f8   :  { %v6732_v2 = vpop.f32.mrf.mxu0 }
 0x6f9   :  { %v6773_v32 = vpop.f32.mrf.mxu1 }
 0x732   :  { %v6809_v63 = vpop.f32.mrf.mxu0 }
 0x733   :  { %v6810_v4 = vadd.f32 %v6809_v63, %v6769_v0  ;;  %v6850_v25 = vpop.f32.mrf.mxu1 }
 0x734   :  { %v6811_v5 = vpop.f32.mrf.mxu0 }
 0x735   :  { %v6851_v58 = vadd.f32 %v6850_v25, %v6810_v4  ;;  %v6812_v17 = vadd.f32 %v6811_v5, %v6771_v51  ;;  %v6852_v61 = vpop.f32.mrf.mxu1 }
 0x736   :  { %v6813_v57 = vpop.f32.mrf.mxu0 }
 0x737   :  { %8786 = vtanh.f32 %v6851_v58  ;;  %v6853_v22 = vadd.f32 %v6852_v61, %v6812_v17  ;;  %v6854_v33 = vpop.f32.mrf.mxu1 }
 0x738   :  { %v6814_v23 = vpop.f32.mrf.mxu0 }
 0x739   :  { %8788 = vtanh.f32 %v6853_v22  ;;  %v6855_v62 = vpop.f32.mrf.mxu1 }
 0x744   :  { %v8787_v26 = vpop.eup %8786 }
 0x745   :  { %7028 = vst [vmem:[#allocation13 + $0x20] sm:$0xff] %v8787_v26 }
 0x746   :  { %v8789_v3 = vpop.eup %8788 }
 0x747   :  { %7029 = vst [vmem:[#allocation13 + $0x28] sm:$0xff] %v8789_v3 }
 0x752   :  { %v7867_v19 = vpop.f32.mrf.mxu0 }
 0x753   :  { %v7889_v27 = vpop.f32.mrf.mxu1 }
 0x754   :  { %v7868_v28 = vpop.f32.mrf.mxu0 }
 0x755   :  { %v7890_v36 = vpop.f32.mrf.mxu1  ;;  %v7869_v54 = vadd.f32 %v7868_v28, %v7867_v19 }
 0x756   :  { %v7870_v42 = vpop.f32.mrf.mxu0  ;;  %v7891_v11 = vadd.f32 %v7890_v36, %v7889_v27 }
 0x757   :  { %v7892_v24 = vpop.f32.mrf.mxu1  ;;  %v6892_v10 = vadd.f32 %v7869_v54, %v4053_v8 }
 0x758   :  { %v7871_v50 = vpop.f32.mrf.mxu0 }
 0x759   :  { %v7893_v52 = vpop.f32.mrf.mxu1  ;;  %v6932_v56 = vadd.f32 %v7891_v11, %v6892_v10 }
 0x772   :  { %v7911_v34 = vpop.f32.mrf.mxu0 }
 0x773   :  { %v7933_v35 = vpop.f32.mrf.mxu1 }
 0x774   :  { %v7912_v29 = vpop.f32.mrf.mxu0 }
 0x775   :  { %v7913_v31 = vadd.f32 %v7912_v29, %v7911_v34  ;;  %v7934_v12 = vpop.f32.mrf.mxu1 }
 0x776   :  { %v7914_v1 = vpop.f32.mrf.mxu0  ;;  %v7935_v60 = vadd.f32 %v7934_v12, %v7933_v35 }
 0x777   :  { %v6972_v41 = vadd.f32 %v7913_v31, %v6932_v56  ;;  %v7936_v43 = vpop.f32.mrf.mxu1 }
 0x778   :  { %v7915_v38 = vpop.f32.mrf.mxu0 }
 0x779   :  { %v7012_v7 = vadd.f32 %v7935_v60, %v6972_v41  ;;  %v7937_v21 = vpop.f32.mrf.mxu1 }
 0x77b   :  { %8790 = vtanh.f32 %v7012_v7 }
 0x788   :  { %v8791_v39 = vpop.eup %8790 }
 0x789   :  { %7030 = vst [vmem:[#allocation13 + $0x30] sm:$0xff] %v8791_v39 }
 0x78a   :  { %8923 = shalt.err (!%p8920_p6)
}
 0x78b   :  { %7040 = dma.vmem_to_hbm [thread:$0]  %s7038_s14, 896, %s9431_s7, [#allocation4]  }
 0x78c   :  { %8940 = dma.done.wait [#allocation4], 896  }
 0x78d   :  { %8941 = vsyncadd [#allocation4], 4294966400 }
 0x78e   :  { %7044 = vsyncpa [#allocation3], 1 }
 0x78f   :  { %7045 = vsyncpa [#allocation6], 1 }
 0x790   :  { %7046 = vsyncpa [#allocation9], 1 }
 0x791   :  { %7047 = vsyncpa [#allocation12], 1 }
 0x792   :  { %7048 = vsyncpa [#allocation4], 1 }

</bundles_post_ra>
